<compile_context>
chip_gen: v6e
topology: v6e:2x2x1
jax: 0.10.0
libtpu: 0.0.40
codegen_flags: <defaults>
</compile_context>

<pallas_src>
import functools

import jax
import jax.numpy as jnp
from jax import lax
from jax.experimental import pallas as pl
from jax.experimental.pallas import tpu as pltpu

OUT_CHANNELS = 256
NUM_COLOURS = 16
NUM_HEADS = 4
HEAD_DIM = OUT_CHANNELS // NUM_HEADS
TEMPERATURE = 0.001
LN_EPS = 1e-5


# ----------------------------- in-kernel math -------------------------------

def _erf(x):
    # Abramowitz & Stegun 7.1.26 polynomial (|err| < 1.5e-7).  Mosaic has no
    # erf primitive; exp/abs/where are VPU/EUP-native.
    a1, a2, a3, a4, a5 = 0.254829592, -0.284496736, 1.421413741, -1.453152027, 1.061405429
    p = 0.3275911
    s = jnp.where(x < 0.0, -1.0, 1.0)
    z = jnp.abs(x)
    t = 1.0 / (1.0 + p * z)
    poly = t * (a1 + t * (a2 + t * (a3 + t * (a4 + t * a5))))
    return s * (1.0 - poly * jnp.exp(-z * z))


def _gelu(x):
    # nn.GELU default (exact erf form).
    return 0.5 * x * (1.0 + _erf(x * 0.7071067811865476))


def _layernorm(x, g, b):
    mu = jnp.mean(x, axis=-1, keepdims=True)
    xc = x - mu
    var = jnp.mean(xc * xc, axis=-1, keepdims=True)
    return xc * lax.rsqrt(var + LN_EPS) * g + b


# -------------------- fused transformer + palette kernel --------------------

def _transformer_kernel(t_ref, a_ref, vw_ref, projw_ref, m1w_ref, m1b_ref,
                        m2w_ref, cp1w_ref, cp2wt_ref, cp2b_ref, vecs_ref,
                        pal_ref, *, num_heads, num_colours, head_dim):
    bf16 = jnp.bfloat16
    f32 = jnp.float32

    t = t_ref[0]                                   # (N, C) f32 tokens
    ln1_g, ln1_b = vecs_ref[0], vecs_ref[1]        # (1, C)
    ln2_g, ln2_b = vecs_ref[2], vecs_ref[3]
    proj_b, mlp2_b, cp1_b = vecs_ref[4], vecs_ref[5], vecs_ref[6]

    # ---- LayerNorm1 + Query_Attention (K projection pre-folded into A) ----
    tn = _layernorm(t, ln1_g, ln1_b).astype(bf16)  # (N, C) bf16

    # all head scores at once: (H*Kc, C) x (N, C)^T -> (H*Kc, N), scale baked in
    s_all = lax.dot_general(a_ref[...], tn, (((1,), (1,)), ((), ())),
                            preferred_element_type=f32)            # (64, N)
    s_all = s_all - jnp.max(s_all, axis=-1, keepdims=True)
    e_all = jnp.exp(s_all)
    p_all = e_all * pl.reciprocal(jnp.sum(e_all, axis=-1, keepdims=True),
                                  approx=True)                     # (64, N)
    p_bf = p_all.astype(bf16)

    # single V projection (256-lane-wide output), bf16 operands, f32 acc
    v_bf = jnp.dot(tn, vw_ref[...], preferred_element_type=f32).astype(bf16)  # (N, C)

    # per-head attention outputs, concatenated -> (Kc, C)
    o_heads = []
    for h in range(num_heads):
        p_h = p_bf[h * num_colours:(h + 1) * num_colours, :]        # (Kc, N)
        v_h = v_bf[:, h * head_dim:(h + 1) * head_dim]              # (N, D)
        o_heads.append(jnp.dot(p_h, v_h, preferred_element_type=f32))
    o_cat = jnp.concatenate(o_heads, axis=-1).astype(bf16)          # (Kc, C)

    # fused output projection (single (Kc,C)@(C,C) matmul) + bias
    x2 = jnp.dot(o_cat, projw_ref[...], preferred_element_type=f32) + proj_b
    # NOTE: reference has NO residual on the attention branch.

    # ---- LN2 + Mlp (C -> 4C -> C) with residual ----
    x2n = _layernorm(x2, ln2_g, ln2_b).astype(bf16)
    h1 = _gelu(jnp.dot(x2n, m1w_ref[...], preferred_element_type=f32)
               + m1b_ref[...])                                      # (Kc, 4C)
    x2 = x2 + jnp.dot(h1.astype(bf16), m2w_ref[...],
                      preferred_element_type=f32) + mlp2_b          # (Kc, C)

    # ---- Colour_Coordinate_Projection (C -> C -> 3) + sigmoid ----
    c1 = _gelu(jnp.dot(x2.astype(bf16), cp1w_ref[...],
                       preferred_element_type=f32) + cp1_b)         # (Kc, C)
    # produce palette^T (3, Kc) directly (feeds quantise kernel, no transpose)
    z = lax.dot_general(cp2wt_ref[...], c1.astype(bf16),
                        (((1,), (1,)), ((), ())),
                        preferred_element_type=f32) + cp2b_ref[...]  # (3, Kc)
    pal_ref[0] = 1.0 / (1.0 + jnp.exp(-z))


def colour_cluster_transformer(tokens, pp):
    """tokens: (B, N, C) f32 -> palette^T: (B, 3, NUM_COLOURS) f32."""
    B, N, C = tokens.shape
    kernel = functools.partial(_transformer_kernel, num_heads=NUM_HEADS,
                               num_colours=NUM_COLOURS, head_dim=HEAD_DIM)
    # TODO(synk): for N >~ 8-16K tokens (v7x 64 MiB VMEM) the whole-sequence
    # residency needs an N-tiled inner loop with online softmax.
    return pl.pallas_call(
        kernel,
        out_shape=jax.ShapeDtypeStruct((B, 3, NUM_COLOURS), jnp.float32),
        grid=(B,),
        in_specs=[
            pl.BlockSpec((1, N, C), lambda b: (b, 0, 0)),
            pl.BlockSpec(pp["attn_A"].shape, lambda b: (0, 0)),
            pl.BlockSpec(pp["v_w"].shape, lambda b: (0, 0)),
            pl.BlockSpec(pp["proj_w"].shape, lambda b: (0, 0)),
            pl.BlockSpec(pp["mlp1_w"].shape, lambda b: (0, 0)),
            pl.BlockSpec(pp["mlp1_b"].shape, lambda b: (0, 0)),
            pl.BlockSpec(pp["mlp2_w"].shape, lambda b: (0, 0)),
            pl.BlockSpec(pp["cp1_w"].shape, lambda b: (0, 0)),
            pl.BlockSpec(pp["cp2_wt"].shape, lambda b: (0, 0)),
            pl.BlockSpec(pp["cp2_b"].shape, lambda b: (0, 0)),
            pl.BlockSpec(pp["vecs"].shape, lambda b: (0, 0, 0)),
        ],
        out_specs=pl.BlockSpec((1, 3, NUM_COLOURS), lambda b: (b, 0, 0)),
        compiler_params=pltpu.CompilerParams(
            dimension_semantics=("parallel",),
            vmem_limit_bytes=32 * 1024 * 1024),
    )(tokens, pp["attn_A"], pp["v_w"], pp["proj_w"], pp["mlp1_w"],
      pp["mlp1_b"], pp["mlp2_w"], pp["cp1_w"], pp["cp2_wt"], pp["cp2_b"],
      pp["vecs"])


# ------------- fused encoder head + Softmax2d + palette-mix kernel ----------

def _quantise_kernel(x_ref, ewt_ref, eb_ref, pal_ref, prob_ref, img_ref, *,
                     inv_temperature):
    x = x_ref[0]                                                  # (3, T) f32
    ewt = ewt_ref[...]                                            # (K, 3)
    # encoder logit head: contraction depth 3 -> 3 VPU FMAs (no MXU pass)
    logits = (eb_ref[...]
              + ewt[:, 0:1] * x[0:1, :]
              + ewt[:, 1:2] * x[1:2, :]
              + ewt[:, 2:3] * x[2:3, :])                          # (K, T)
    # Softmax2d over channels (origin_probability_map) -- exact normalization,
    # because this result is amplified by 1/T = 1000 right after.
    m1 = jnp.max(logits, axis=0, keepdims=True)
    e1 = jnp.exp(logits - m1)
    p1 = e1 / jnp.sum(e1, axis=0, keepdims=True)
    # Softmax2d(origin_probability_map / temperature)
    y = p1 * inv_temperature
    m2 = jnp.max(y, axis=0, keepdims=True)
    e2 = jnp.exp(y - m2)
    p2 = e2 * pl.reciprocal(jnp.sum(e2, axis=0, keepdims=True), approx=True)
    prob_ref[0] = p2.astype(prob_ref.dtype)                       # (K, T) bf16
    # img[rgb, t] = sum_k palette[rgb, k] * p2[k, t] -- bf16 operands, f32 acc
    img_ref[0] = jnp.dot(pal_ref[0].astype(jnp.bfloat16),
                         p2.astype(jnp.bfloat16),
                         preferred_element_type=jnp.float32)


def colour_quantise(x_flat, enc_wt, enc_b, palette_t, temperature):
    """x_flat (B,3,HW), enc_wt (K,3), enc_b (K,1), palette_t (B,3,K)
       -> prob (B,K,HW) bf16, img (B,3,HW) f32 (channel-major / lane dense)."""
    B, _, HW = x_flat.shape
    K = enc_wt.shape[0]
    # Size the pixel tile large (mem-bound kernel: per-step overhead dominates
    # at small tiles).  Even 32768 lanes keeps the double-buffered working set
    # at a few MB, well within v7x VMEM.
    hw_tile = HW
    for cand in (32768, 16384, 8192, 4096, 2048, 1024, 512, 256, 128):
        if HW % cand == 0:
            hw_tile = cand
            break
    n_hw = HW // hw_tile
    kernel = functools.partial(_quantise_kernel,
                               inv_temperature=1.0 / temperature)
    return pl.pallas_call(
        kernel,
        out_shape=(jax.ShapeDtypeStruct((B, K, HW), jnp.bfloat16),
                   jax.ShapeDtypeStruct((B, 3, HW), jnp.float32)),
        grid=(B, n_hw),
        in_specs=[
            pl.BlockSpec((1, 3, hw_tile), lambda b, j: (b, 0, j)),
            pl.BlockSpec((K, 3), lambda b, j: (0, 0)),
            pl.BlockSpec((K, 1), lambda b, j: (0, 0)),
            pl.BlockSpec((1, 3, K), lambda b, j: (b, 0, 0)),
        ],
        out_specs=(
            pl.BlockSpec((1, K, hw_tile), lambda b, j: (b, 0, j)),
            pl.BlockSpec((1, 3, hw_tile), lambda b, j: (b, 0, j)),
        ),
        compiler_params=pltpu.CompilerParams(
            dimension_semantics=("parallel", "parallel"),
            vmem_limit_bytes=32 * 1024 * 1024),
    )(x_flat, enc_wt, enc_b, palette_t)


# ------------------------------- XLA glue ------------------------------------

def conv2d_nhwc(x, w, b, stride, padding):
    out = lax.conv_general_dilated(
        x, w, window_strides=(stride, stride),
        padding=((padding, padding), (padding, padding)),
        dimension_numbers=("NHWC", "HWIO", "NHWC"))
    return out + b


def depthwise_conv3x3_nhwc(x, w, b):
    C = x.shape[-1]
    out = lax.conv_general_dilated(
        x, w, window_strides=(1, 1), padding=((1, 1), (1, 1)),
        dimension_numbers=("NHWC", "HWIO", "NHWC"), feature_group_count=C)
    return out + b


def batchnorm_train_nhwc(x, gamma, beta, eps=1e-5):
    mean = jnp.mean(x, axis=(0, 1, 2), keepdims=True)
    var = jnp.mean((x - mean) ** 2, axis=(0, 1, 2), keepdims=True)
    xn = (x - mean) * lax.rsqrt(var + eps)
    return xn * gamma + beta


# ------------------------------ parameters -----------------------------------

def init_params(key):
    ks = list(jax.random.split(key, 16))

    def tnorm(k, shape, std=0.02):
        return (std * jax.random.truncated_normal(k, -2.0, 2.0, shape)).astype(jnp.float32)

    def conv_init(k, shape, std=0.05):
        return (std * jax.random.normal(k, shape)).astype(jnp.float32)

    C = OUT_CHANNELS
    return {
        # TODO(synk): UNext Image_Encoder source not provided; a deterministic
        # 1x1-conv logit head stands in (fused into the quantise kernel).
        "enc_w": conv_init(ks[0], (3, NUM_COLOURS)),
        "enc_b": jnp.zeros((NUM_COLOURS,), jnp.float32),
        # conv_embedding (conv_large), OIHW here; relaid to HWIO at pack time
        "c1_w": conv_init(ks[1], (C // 2, 3, 3, 3)),
        "c1_b": jnp.zeros((C // 2,), jnp.float32),
        "bn1_g": jnp.ones((C // 2,), jnp.float32),
        "bn1_b": jnp.zeros((C // 2,), jnp.float32),
        "c2_w": conv_init(ks[2], (C, C // 2, 3, 3)),
        "c2_b": jnp.zeros((C,), jnp.float32),
        "bn2_g": jnp.ones((C,), jnp.float32),
        "bn2_b": jnp.zeros((C,), jnp.float32),
        # Colour_Cluster_Transformer
        "pos_w": conv_init(ks[3], (C, 1, 3, 3)),
        "pos_b": jnp.zeros((C,), jnp.float32),
        "ln1_g": jnp.ones((C,), jnp.float32),
        "ln1_b": jnp.zeros((C,), jnp.float32),
        "q": jax.random.normal(ks[4], (1, NUM_COLOURS, C)).astype(jnp.float32),
        "k_w": tnorm(ks[5], (C, C)),            # (in, out); qkv_bias=False
        "v_w": tnorm(ks[6], (C, C)),
        "proj_w": tnorm(ks[7], (C, C)),
        "proj_b": jnp.zeros((C,), jnp.float32),
        "ln2_g": jnp.ones((C,), jnp.float32),
        "ln2_b": jnp.zeros((C,), jnp.float32),
        "mlp1_w": tnorm(ks[8], (C, 4 * C)),
        "mlp1_b": jnp.zeros((4 * C,), jnp.float32),
        "mlp2_w": tnorm(ks[9], (4 * C, C)),
        "mlp2_b": jnp.zeros((C,), jnp.float32),
        # Colour_Coordinate_Projection (Mlp 256 -> 256 -> 3)
        "cp1_w": tnorm(ks[10], (C, C)),
        "cp1_b": jnp.zeros((C,), jnp.float32),
        "cp2_w": tnorm(ks[11], (C, 3)),
        "cp2_b": jnp.zeros((3,), jnp.float32),
    }


def pack_params(p):
    """One-time re-layout (outside jit): NHWC conv weights, head-folded
    attention score matrix A, bf16 matmul operands, kernel-friendly shapes."""
    C, H, D, Kc = OUT_CHANNELS, NUM_HEADS, HEAD_DIM, NUM_COLOURS
    bf16 = jnp.bfloat16
    scale = D ** -0.5

    # Fold the K projection + 1/sqrt(D) scale into the query at pack time:
    #   A[h*Kc + k, c] = scale * sum_d q_h[k, d] * k_w_h[c, d]
    q3 = p["q"][0].reshape(Kc, H, D)                                # (Kc, H, D)
    kw3 = p["k_w"].reshape(C, H, D)                                 # (C, H, D)
    A = scale * jnp.einsum("khd,chd->hkc", q3, kw3)                 # (H, Kc, C)
    A = A.reshape(H * Kc, C).astype(bf16)

    return {
        # conv / bn / pos-embed in NHWC-native layouts
        "c1_w": p["c1_w"].transpose(2, 3, 1, 0), "c1_b": p["c1_b"],
        "bn1_g": p["bn1_g"], "bn1_b": p["bn1_b"],
        "c2_w": p["c2_w"].transpose(2, 3, 1, 0), "c2_b": p["c2_b"],
        "bn2_g": p["bn2_g"], "bn2_b": p["bn2_b"],
        "pos_w": p["pos_w"].transpose(2, 3, 1, 0), "pos_b": p["pos_b"],
        # fused transformer kernel operands
        "attn_A": A,                                                # (H*Kc, C) bf16
        "v_w": p["v_w"].astype(bf16),                               # (C, C)
        "proj_w": p["proj_w"].astype(bf16),                         # (C, C)
        "mlp1_w": p["mlp1_w"].astype(bf16),                         # (C, 4C)
        "mlp1_b": p["mlp1_b"].reshape(1, 4 * C),
        "mlp2_w": p["mlp2_w"].astype(bf16),                         # (4C, C)
        "cp1_w": p["cp1_w"].astype(bf16),                           # (C, C)
        "cp2_wt": p["cp2_w"].T.astype(bf16),                        # (3, C)
        "cp2_b": p["cp2_b"].reshape(3, 1),
        "vecs": jnp.stack([p["ln1_g"], p["ln1_b"], p["ln2_g"], p["ln2_b"],
                           p["proj_b"], p["mlp2_b"], p["cp1_b"],
                           jnp.zeros((C,), jnp.float32)], axis=0)[:, None, :],  # (8,1,C)
        # fused encoder-head / quantise kernel operands
        "enc_wt": p["enc_w"].T,                                     # (K, 3)
        "enc_b": p["enc_b"].reshape(NUM_COLOURS, 1),                # (K, 1)
    }


# -------------------------------- forward ------------------------------------

def model_forward(pp, x_rgb):
    """training=True branch of Model.forward.  x_rgb: (B, 3, H, W) float32."""
    B, _, H, W = x_rgb.shape
    C = OUT_CHANNELS

    # ---- conv_large = conv_embedding(3, 256), NHWC (TPU-native, no token
    #      transpose afterwards) ----
    x_nhwc = x_rgb.transpose(0, 2, 3, 1)                           # tiny (3-ch)
    h = conv2d_nhwc(x_nhwc, pp["c1_w"], pp["c1_b"], stride=2, padding=1)
    h = batchnorm_train_nhwc(h, pp["bn1_g"], pp["bn1_b"])
    h = jax.nn.gelu(h, approximate=False)
    h = conv2d_nhwc(h, pp["c2_w"], pp["c2_b"], stride=2, padding=1)
    h = batchnorm_train_nhwc(h, pp["bn2_g"], pp["bn2_b"])          # (B, H/4, W/4, C)

    # ---- pos_embed (depthwise 3x3) + flatten to tokens: pure reshape ----
    h = h + depthwise_conv3x3_nhwc(h, pp["pos_w"], pp["pos_b"])
    Bc, Hc, Wc, _ = h.shape
    tokens = h.reshape(Bc, Hc * Wc, C)                             # (B, N, C)

    # ---- fused transformer + colour-coordinate projection -> palette^T ----
    # TODO(synk): when B == 1 on v7x, add a second parallel grid axis (split N)
    # so both TensorCores stay busy.
    palette_t = colour_cluster_transformer(tokens, pp)             # (B, 3, K)

    # ---- fused encoder head + Softmax2d / temperature + palette mix ----
    x_flat = x_rgb.reshape(B, 3, H * W)                            # NCHW flatten, no transpose
    prob_t, img_t = colour_quantise(x_flat, pp["enc_wt"], pp["enc_b"],
                                    palette_t, TEMPERATURE)
    # probability map stays bf16 (HBM-write-bound kernel); upcast only if a
    # downstream consumer needs f32.
    probability_map = prob_t.reshape(B, NUM_COLOURS, H, W)
    transformed_img = img_t.reshape(B, 3, H, W)
    return transformed_img, probability_map


# ---------------------------------- main --------------------------------------

if __name__ == "__main__":
    key = jax.random.PRNGKey(0)
    k_in, k_par = jax.random.split(key)
    x_rgb = jax.random.uniform(k_in, (2, 3, 16, 16), dtype=jnp.float32)
    params = pack_params(init_params(k_par))

    fwd = jax.jit(model_forward)
    transformed_img, probability_map = fwd(params, x_rgb)
    jax.block_until_ready((transformed_img, probability_map))

    assert transformed_img.shape == (2, 3, 16, 16)
    assert probability_map.shape == (2, NUM_COLOURS, 16, 16)
    assert bool(jnp.all(jnp.isfinite(transformed_img)))
    assert bool(jnp.all(jnp.isfinite(probability_map.astype(jnp.float32))))
    print("KERNEL_OK")
</pallas_src>

<mosaic_0001>
module attributes {stable_mosaic.version = 11 : i64} {
  func.func @_transformer_kernel(%arg0: i32, %arg1: memref<1x16x256xf32, #tpu.memory_space<vmem>>, %arg2: memref<64x256xbf16, #tpu.memory_space<vmem>>, %arg3: memref<256x256xbf16, #tpu.memory_space<vmem>>, %arg4: memref<256x256xbf16, #tpu.memory_space<vmem>>, %arg5: memref<256x1024xbf16, #tpu.memory_space<vmem>>, %arg6: memref<1x1024xf32, #tpu.memory_space<vmem>>, %arg7: memref<1024x256xbf16, #tpu.memory_space<vmem>>, %arg8: memref<256x256xbf16, #tpu.memory_space<vmem>>, %arg9: memref<3x256xbf16, #tpu.memory_space<vmem>>, %arg10: memref<3x1xf32, #tpu.memory_space<vmem>>, %arg11: memref<8x1x256xf32, #tpu.memory_space<vmem>>, %arg12: memref<1x3x16xf32, #tpu.memory_space<vmem>>) attributes {dimension_semantics = [#tpu.dimension_semantics<parallel>], iteration_bounds = array<i64: 2>, scalar_prefetch = 0 : i64, scratch_operands = 0 : i64, tpu.core_type = #tpu.core_type<tc>, window_params = [{transform_indices = @transform_0, window_bounds = array<i64: 1, 16, 256>}, {pipeline_mode = #tpu.pipeline_mode<synchronous>, transform_indices = @transform_1, window_bounds = array<i64: 64, 256>}, {pipeline_mode = #tpu.pipeline_mode<synchronous>, transform_indices = @transform_2, window_bounds = array<i64: 256, 256>}, {pipeline_mode = #tpu.pipeline_mode<synchronous>, transform_indices = @transform_3, window_bounds = array<i64: 256, 256>}, {pipeline_mode = #tpu.pipeline_mode<synchronous>, transform_indices = @transform_4, window_bounds = array<i64: 256, 1024>}, {pipeline_mode = #tpu.pipeline_mode<synchronous>, transform_indices = @transform_5, window_bounds = array<i64: 1, 1024>}, {pipeline_mode = #tpu.pipeline_mode<synchronous>, transform_indices = @transform_6, window_bounds = array<i64: 1024, 256>}, {pipeline_mode = #tpu.pipeline_mode<synchronous>, transform_indices = @transform_7, window_bounds = array<i64: 256, 256>}, {pipeline_mode = #tpu.pipeline_mode<synchronous>, transform_indices = @transform_8, window_bounds = array<i64: 3, 256>}, {pipeline_mode = #tpu.pipeline_mode<synchronous>, transform_indices = @transform_9, window_bounds = array<i64: 3, 1>}, {pipeline_mode = #tpu.pipeline_mode<synchronous>, transform_indices = @transform_10, window_bounds = array<i64: 8, 1, 256>}, {transform_indices = @transform_11, window_bounds = array<i64: 1, 3, 16>}]} {
    %c0 = arith.constant 0 : index
    %c0_0 = arith.constant 0 : index
    %c0_1 = arith.constant 0 : index
    %0 = vector.load %arg1[%c0, %c0_0, %c0_1] : memref<1x16x256xf32, #tpu.memory_space<vmem>>, vector<1x16x256xf32>
    %1 = vector.shape_cast %0 : vector<1x16x256xf32> to vector<16x256xf32>
    %c0_2 = arith.constant 0 : index
    %c0_3 = arith.constant 0 : index
    %c0_4 = arith.constant 0 : index
    %2 = vector.load %arg11[%c0_2, %c0_3, %c0_4] : memref<8x1x256xf32, #tpu.memory_space<vmem>>, vector<1x1x256xf32>
    %3 = vector.shape_cast %2 : vector<1x1x256xf32> to vector<1x256xf32>
    %c1 = arith.constant 1 : index
    %c0_5 = arith.constant 0 : index
    %c0_6 = arith.constant 0 : index
    %4 = vector.load %arg11[%c1, %c0_5, %c0_6] : memref<8x1x256xf32, #tpu.memory_space<vmem>>, vector<1x1x256xf32>
    %5 = vector.shape_cast %4 : vector<1x1x256xf32> to vector<1x256xf32>
    %c2 = arith.constant 2 : index
    %c0_7 = arith.constant 0 : index
    %c0_8 = arith.constant 0 : index
    %6 = vector.load %arg11[%c2, %c0_7, %c0_8] : memref<8x1x256xf32, #tpu.memory_space<vmem>>, vector<1x1x256xf32>
    %7 = vector.shape_cast %6 : vector<1x1x256xf32> to vector<1x256xf32>
    %c3 = arith.constant 3 : index
    %c0_9 = arith.constant 0 : index
    %c0_10 = arith.constant 0 : index
    %8 = vector.load %arg11[%c3, %c0_9, %c0_10] : memref<8x1x256xf32, #tpu.memory_space<vmem>>, vector<1x1x256xf32>
    %9 = vector.shape_cast %8 : vector<1x1x256xf32> to vector<1x256xf32>
    %c4 = arith.constant 4 : index
    %c0_11 = arith.constant 0 : index
    %c0_12 = arith.constant 0 : index
    %10 = vector.load %arg11[%c4, %c0_11, %c0_12] : memref<8x1x256xf32, #tpu.memory_space<vmem>>, vector<1x1x256xf32>
    %11 = vector.shape_cast %10 : vector<1x1x256xf32> to vector<1x256xf32>
    %c5 = arith.constant 5 : index
    %c0_13 = arith.constant 0 : index
    %c0_14 = arith.constant 0 : index
    %12 = vector.load %arg11[%c5, %c0_13, %c0_14] : memref<8x1x256xf32, #tpu.memory_space<vmem>>, vector<1x1x256xf32>
    %13 = vector.shape_cast %12 : vector<1x1x256xf32> to vector<1x256xf32>
    %c6 = arith.constant 6 : index
    %c0_15 = arith.constant 0 : index
    %c0_16 = arith.constant 0 : index
    %14 = vector.load %arg11[%c6, %c0_15, %c0_16] : memref<8x1x256xf32, #tpu.memory_space<vmem>>, vector<1x1x256xf32>
    %15 = vector.shape_cast %14 : vector<1x1x256xf32> to vector<1x256xf32>
    %cst = arith.constant dense<0.000000e+00> : vector<16xf32>
    %16 = vector.multi_reduction <add>, %1, %cst [1] : vector<16x256xf32> to vector<16xf32>
    %17 = vector.shape_cast %16 : vector<16xf32> to vector<16x1xf32>
    %cst_17 = arith.constant 2.560000e+02 : f32
    %18 = vector.broadcast %cst_17 : f32 to vector<16x1xf32>
    %19 = arith.divf %17, %18 : vector<16x1xf32>
    %20 = vector.broadcast %19 : vector<16x1xf32> to vector<16x256xf32>
    %21 = arith.subf %1, %20 : vector<16x256xf32>
    %22 = arith.mulf %21, %21 : vector<16x256xf32>
    %cst_18 = arith.constant dense<0.000000e+00> : vector<16xf32>
    %23 = vector.multi_reduction <add>, %22, %cst_18 [1] : vector<16x256xf32> to vector<16xf32>
    %24 = vector.shape_cast %23 : vector<16xf32> to vector<16x1xf32>
    %cst_19 = arith.constant 2.560000e+02 : f32
    %25 = vector.broadcast %cst_19 : f32 to vector<16x1xf32>
    %26 = arith.divf %24, %25 : vector<16x1xf32>
    %cst_20 = arith.constant 9.99999974E-6 : f32
    %27 = vector.broadcast %cst_20 : f32 to vector<16x1xf32>
    %28 = arith.addf %26, %27 : vector<16x1xf32>
    %29 = math.rsqrt %28 : vector<16x1xf32>
    %30 = vector.broadcast %29 : vector<16x1xf32> to vector<16x256xf32>
    %31 = arith.mulf %21, %30 : vector<16x256xf32>
    %32 = vector.broadcast %3 : vector<1x256xf32> to vector<16x256xf32>
    %33 = arith.mulf %31, %32 : vector<16x256xf32>
    %34 = vector.broadcast %5 : vector<1x256xf32> to vector<16x256xf32>
    %35 = arith.addf %33, %34 : vector<16x256xf32>
    %36 = arith.truncf %35 : vector<16x256xf32> to vector<16x256xbf16>
    %c0_21 = arith.constant 0 : index
    %c0_22 = arith.constant 0 : index
    %37 = vector.load %arg2[%c0_21, %c0_22] : memref<64x256xbf16, #tpu.memory_space<vmem>>, vector<64x256xbf16>
    %cst_23 = arith.constant dense<0.000000e+00> : vector<64x16xf32>
    %38 = tpu.matmul %37, %36, %cst_23 {dimension_numbers = #tpu.dot_dimension_numbers<[1], [1], [0], [0], [0, 0, 1, 0], [], []>} : vector<64x256xbf16>, vector<16x256xbf16>, vector<64x16xf32> -> vector<64x16xf32>
    %cst_24 = arith.constant dense<0xFF800000> : vector<64xf32>
    %39 = vector.multi_reduction <maximumf>, %38, %cst_24 [1] : vector<64x16xf32> to vector<64xf32>
    %40 = vector.shape_cast %39 : vector<64xf32> to vector<64x1xf32>
    %41 = vector.broadcast %40 : vector<64x1xf32> to vector<64x16xf32>
    %42 = arith.subf %38, %41 : vector<64x16xf32>
    %43 = math.exp %42 : vector<64x16xf32>
    %cst_25 = arith.constant dense<0.000000e+00> : vector<64xf32>
    %44 = vector.multi_reduction <add>, %43, %cst_25 [1] : vector<64x16xf32> to vector<64xf32>
    %45 = vector.shape_cast %44 : vector<64xf32> to vector<64x1xf32>
    %46 = tpu.reciprocal %45 {approx = true} : vector<64x1xf32> -> vector<64x1xf32>
    %47 = vector.broadcast %46 : vector<64x1xf32> to vector<64x16xf32>
    %48 = arith.mulf %43, %47 : vector<64x16xf32>
    %49 = arith.truncf %48 : vector<64x16xf32> to vector<64x16xbf16>
    %c0_26 = arith.constant 0 : index
    %c0_27 = arith.constant 0 : index
    %50 = vector.load %arg3[%c0_26, %c0_27] : memref<256x256xbf16, #tpu.memory_space<vmem>>, vector<256x256xbf16>
    %cst_28 = arith.constant dense<0.000000e+00> : vector<16x256xf32>
    %51 = tpu.matmul %36, %50, %cst_28 {dimension_numbers = #tpu.dot_dimension_numbers<[1], [0], [0], [1], [0, 0, 1, 1], [], []>} : vector<16x256xbf16>, vector<256x256xbf16>, vector<16x256xf32> -> vector<16x256xf32>
    %52 = arith.truncf %51 : vector<16x256xf32> to vector<16x256xbf16>
    %53 = vector.extract_strided_slice %49 {offsets = [0, 0], sizes = [16, 16], strides = [1, 1]} : vector<64x16xbf16> to vector<16x16xbf16>
    %54 = vector.extract_strided_slice %52 {offsets = [0, 0], sizes = [16, 64], strides = [1, 1]} : vector<16x256xbf16> to vector<16x64xbf16>
    %cst_29 = arith.constant dense<0.000000e+00> : vector<16x64xf32>
    %55 = tpu.matmul %53, %54, %cst_29 {dimension_numbers = #tpu.dot_dimension_numbers<[1], [0], [0], [1], [0, 0, 1, 1], [], []>} : vector<16x16xbf16>, vector<16x64xbf16>, vector<16x64xf32> -> vector<16x64xf32>
    %56 = vector.extract_strided_slice %49 {offsets = [16, 0], sizes = [16, 16], strides = [1, 1]} : vector<64x16xbf16> to vector<16x16xbf16>
    %57 = vector.extract_strided_slice %52 {offsets = [0, 64], sizes = [16, 64], strides = [1, 1]} : vector<16x256xbf16> to vector<16x64xbf16>
    %cst_30 = arith.constant dense<0.000000e+00> : vector<16x64xf32>
    %58 = tpu.matmul %56, %57, %cst_30 {dimension_numbers = #tpu.dot_dimension_numbers<[1], [0], [0], [1], [0, 0, 1, 1], [], []>} : vector<16x16xbf16>, vector<16x64xbf16>, vector<16x64xf32> -> vector<16x64xf32>
    %59 = vector.extract_strided_slice %49 {offsets = [32, 0], sizes = [16, 16], strides = [1, 1]} : vector<64x16xbf16> to vector<16x16xbf16>
    %60 = vector.extract_strided_slice %52 {offsets = [0, 128], sizes = [16, 64], strides = [1, 1]} : vector<16x256xbf16> to vector<16x64xbf16>
    %cst_31 = arith.constant dense<0.000000e+00> : vector<16x64xf32>
    %61 = tpu.matmul %59, %60, %cst_31 {dimension_numbers = #tpu.dot_dimension_numbers<[1], [0], [0], [1], [0, 0, 1, 1], [], []>} : vector<16x16xbf16>, vector<16x64xbf16>, vector<16x64xf32> -> vector<16x64xf32>
    %62 = vector.extract_strided_slice %49 {offsets = [48, 0], sizes = [16, 16], strides = [1, 1]} : vector<64x16xbf16> to vector<16x16xbf16>
    %63 = vector.extract_strided_slice %52 {offsets = [0, 192], sizes = [16, 64], strides = [1, 1]} : vector<16x256xbf16> to vector<16x64xbf16>
    %cst_32 = arith.constant dense<0.000000e+00> : vector<16x64xf32>
    %64 = tpu.matmul %62, %63, %cst_32 {dimension_numbers = #tpu.dot_dimension_numbers<[1], [0], [0], [1], [0, 0, 1, 1], [], []>} : vector<16x16xbf16>, vector<16x64xbf16>, vector<16x64xf32> -> vector<16x64xf32>
    %65 = tpu.concatenate %55, %58, %61, %64 in 1 : vector<16x64xf32>, vector<16x64xf32>, vector<16x64xf32>, vector<16x64xf32> -> vector<16x256xf32>
    %66 = arith.truncf %65 : vector<16x256xf32> to vector<16x256xbf16>
    %c0_33 = arith.constant 0 : index
    %c0_34 = arith.constant 0 : index
    %67 = vector.load %arg4[%c0_33, %c0_34] : memref<256x256xbf16, #tpu.memory_space<vmem>>, vector<256x256xbf16>
    %cst_35 = arith.constant dense<0.000000e+00> : vector<16x256xf32>
    %68 = tpu.matmul %66, %67, %cst_35 {dimension_numbers = #tpu.dot_dimension_numbers<[1], [0], [0], [1], [0, 0, 1, 1], [], []>} : vector<16x256xbf16>, vector<256x256xbf16>, vector<16x256xf32> -> vector<16x256xf32>
    %69 = vector.broadcast %11 : vector<1x256xf32> to vector<16x256xf32>
    %70 = arith.addf %68, %69 : vector<16x256xf32>
    %cst_36 = arith.constant dense<0.000000e+00> : vector<16xf32>
    %71 = vector.multi_reduction <add>, %70, %cst_36 [1] : vector<16x256xf32> to vector<16xf32>
    %72 = vector.shape_cast %71 : vector<16xf32> to vector<16x1xf32>
    %cst_37 = arith.constant 2.560000e+02 : f32
    %73 = vector.broadcast %cst_37 : f32 to vector<16x1xf32>
    %74 = arith.divf %72, %73 : vector<16x1xf32>
    %75 = vector.broadcast %74 : vector<16x1xf32> to vector<16x256xf32>
    %76 = arith.subf %70, %75 : vector<16x256xf32>
    %77 = arith.mulf %76, %76 : vector<16x256xf32>
    %cst_38 = arith.constant dense<0.000000e+00> : vector<16xf32>
    %78 = vector.multi_reduction <add>, %77, %cst_38 [1] : vector<16x256xf32> to vector<16xf32>
    %79 = vector.shape_cast %78 : vector<16xf32> to vector<16x1xf32>
    %cst_39 = arith.constant 2.560000e+02 : f32
    %80 = vector.broadcast %cst_39 : f32 to vector<16x1xf32>
    %81 = arith.divf %79, %80 : vector<16x1xf32>
    %cst_40 = arith.constant 9.99999974E-6 : f32
    %82 = vector.broadcast %cst_40 : f32 to vector<16x1xf32>
    %83 = arith.addf %81, %82 : vector<16x1xf32>
    %84 = math.rsqrt %83 : vector<16x1xf32>
    %85 = vector.broadcast %84 : vector<16x1xf32> to vector<16x256xf32>
    %86 = arith.mulf %76, %85 : vector<16x256xf32>
    %87 = vector.broadcast %7 : vector<1x256xf32> to vector<16x256xf32>
    %88 = arith.mulf %86, %87 : vector<16x256xf32>
    %89 = vector.broadcast %9 : vector<1x256xf32> to vector<16x256xf32>
    %90 = arith.addf %88, %89 : vector<16x256xf32>
    %91 = arith.truncf %90 : vector<16x256xf32> to vector<16x256xbf16>
    %c0_41 = arith.constant 0 : index
    %c0_42 = arith.constant 0 : index
    %92 = vector.load %arg5[%c0_41, %c0_42] : memref<256x1024xbf16, #tpu.memory_space<vmem>>, vector<256x1024xbf16>
    %cst_43 = arith.constant dense<0.000000e+00> : vector<16x1024xf32>
    %93 = tpu.matmul %91, %92, %cst_43 {dimension_numbers = #tpu.dot_dimension_numbers<[1], [0], [0], [1], [0, 0, 1, 1], [], []>} : vector<16x256xbf16>, vector<256x1024xbf16>, vector<16x1024xf32> -> vector<16x1024xf32>
    %c0_44 = arith.constant 0 : index
    %c0_45 = arith.constant 0 : index
    %94 = vector.load %arg6[%c0_44, %c0_45] : memref<1x1024xf32, #tpu.memory_space<vmem>>, vector<1x1024xf32>
    %95 = vector.broadcast %94 : vector<1x1024xf32> to vector<16x1024xf32>
    %96 = arith.addf %93, %95 : vector<16x1024xf32>
    %cst_46 = arith.constant 5.000000e-01 : f32
    %97 = vector.broadcast %cst_46 : f32 to vector<16x1024xf32>
    %98 = arith.mulf %97, %96 : vector<16x1024xf32>
    %cst_47 = arith.constant 0.707106769 : f32
    %99 = vector.broadcast %cst_47 : f32 to vector<16x1024xf32>
    %100 = arith.mulf %96, %99 : vector<16x1024xf32>
    %cst_48 = arith.constant 0.000000e+00 : f32
    %101 = vector.broadcast %cst_48 : f32 to vector<16x1024xf32>
    %102 = arith.cmpf olt, %100, %101 : vector<16x1024xf32>
    %cst_49 = arith.constant -1.000000e+00 : f32
    %cst_50 = arith.constant 1.000000e+00 : f32
    %103 = vector.broadcast %cst_49 : f32 to vector<16x1024xf32>
    %104 = vector.broadcast %cst_50 : f32 to vector<16x1024xf32>
    %105 = arith.select %102, %103, %104 : vector<16x1024xi1>, vector<16x1024xf32>
    %106 = math.absf %100 : vector<16x1024xf32>
    %cst_51 = arith.constant 0.327591091 : f32
    %107 = vector.broadcast %cst_51 : f32 to vector<16x1024xf32>
    %108 = arith.mulf %107, %106 : vector<16x1024xf32>
    %cst_52 = arith.constant 1.000000e+00 : f32
    %109 = vector.broadcast %cst_52 : f32 to vector<16x1024xf32>
    %110 = arith.addf %109, %108 : vector<16x1024xf32>
    %cst_53 = arith.constant 1.000000e+00 : f32
    %111 = vector.broadcast %cst_53 : f32 to vector<16x1024xf32>
    %112 = arith.divf %111, %110 : vector<16x1024xf32>
    %cst_54 = arith.constant 1.06140542 : f32
    %113 = vector.broadcast %cst_54 : f32 to vector<16x1024xf32>
    %114 = arith.mulf %112, %113 : vector<16x1024xf32>
    %cst_55 = arith.constant -1.45315206 : f32
    %115 = vector.broadcast %cst_55 : f32 to vector<16x1024xf32>
    %116 = arith.addf %115, %114 : vector<16x1024xf32>
    %117 = arith.mulf %112, %116 : vector<16x1024xf32>
    %cst_56 = arith.constant 1.42141378 : f32
    %118 = vector.broadcast %cst_56 : f32 to vector<16x1024xf32>
    %119 = arith.addf %118, %117 : vector<16x1024xf32>
    %120 = arith.mulf %112, %119 : vector<16x1024xf32>
    %cst_57 = arith.constant -0.284496725 : f32
    %121 = vector.broadcast %cst_57 : f32 to vector<16x1024xf32>
    %122 = arith.addf %121, %120 : vector<16x1024xf32>
    %123 = arith.mulf %112, %122 : vector<16x1024xf32>
    %cst_58 = arith.constant 0.254829586 : f32
    %124 = vector.broadcast %cst_58 : f32 to vector<16x1024xf32>
    %125 = arith.addf %124, %123 : vector<16x1024xf32>
    %126 = arith.mulf %112, %125 : vector<16x1024xf32>
    %cst_59 = arith.constant 0.000000e+00 : f32
    %127 = vector.broadcast %cst_59 : f32 to vector<16x1024xf32>
    %128 = arith.subf %127, %106 : vector<16x1024xf32>
    %129 = arith.mulf %128, %106 : vector<16x1024xf32>
    %130 = math.exp %129 : vector<16x1024xf32>
    %131 = arith.mulf %126, %130 : vector<16x1024xf32>
    %cst_60 = arith.constant 1.000000e+00 : f32
    %132 = vector.broadcast %cst_60 : f32 to vector<16x1024xf32>
    %133 = arith.subf %132, %131 : vector<16x1024xf32>
    %134 = arith.mulf %105, %133 : vector<16x1024xf32>
    %cst_61 = arith.constant 1.000000e+00 : f32
    %135 = vector.broadcast %cst_61 : f32 to vector<16x1024xf32>
    %136 = arith.addf %135, %134 : vector<16x1024xf32>
    %137 = arith.mulf %98, %136 : vector<16x1024xf32>
    %138 = arith.truncf %137 : vector<16x1024xf32> to vector<16x1024xbf16>
    %c0_62 = arith.constant 0 : index
    %c0_63 = arith.constant 0 : index
    %139 = vector.load %arg7[%c0_62, %c0_63] : memref<1024x256xbf16, #tpu.memory_space<vmem>>, vector<1024x256xbf16>
    %cst_64 = arith.constant dense<0.000000e+00> : vector<16x256xf32>
    %140 = tpu.matmul %138, %139, %cst_64 {dimension_numbers = #tpu.dot_dimension_numbers<[1], [0], [0], [1], [0, 0, 1, 1], [], []>} : vector<16x1024xbf16>, vector<1024x256xbf16>, vector<16x256xf32> -> vector<16x256xf32>
    %141 = arith.addf %70, %140 : vector<16x256xf32>
    %142 = vector.broadcast %13 : vector<1x256xf32> to vector<16x256xf32>
    %143 = arith.addf %141, %142 : vector<16x256xf32>
    %144 = arith.truncf %143 : vector<16x256xf32> to vector<16x256xbf16>
    %c0_65 = arith.constant 0 : index
    %c0_66 = arith.constant 0 : index
    %145 = vector.load %arg8[%c0_65, %c0_66] : memref<256x256xbf16, #tpu.memory_space<vmem>>, vector<256x256xbf16>
    %cst_67 = arith.constant dense<0.000000e+00> : vector<16x256xf32>
    %146 = tpu.matmul %144, %145, %cst_67 {dimension_numbers = #tpu.dot_dimension_numbers<[1], [0], [0], [1], [0, 0, 1, 1], [], []>} : vector<16x256xbf16>, vector<256x256xbf16>, vector<16x256xf32> -> vector<16x256xf32>
    %147 = vector.broadcast %15 : vector<1x256xf32> to vector<16x256xf32>
    %148 = arith.addf %146, %147 : vector<16x256xf32>
    %cst_68 = arith.constant 5.000000e-01 : f32
    %149 = vector.broadcast %cst_68 : f32 to vector<16x256xf32>
    %150 = arith.mulf %149, %148 : vector<16x256xf32>
    %cst_69 = arith.constant 0.707106769 : f32
    %151 = vector.broadcast %cst_69 : f32 to vector<16x256xf32>
    %152 = arith.mulf %148, %151 : vector<16x256xf32>
    %cst_70 = arith.constant 0.000000e+00 : f32
    %153 = vector.broadcast %cst_70 : f32 to vector<16x256xf32>
    %154 = arith.cmpf olt, %152, %153 : vector<16x256xf32>
    %cst_71 = arith.constant -1.000000e+00 : f32
    %cst_72 = arith.constant 1.000000e+00 : f32
    %155 = vector.broadcast %cst_71 : f32 to vector<16x256xf32>
    %156 = vector.broadcast %cst_72 : f32 to vector<16x256xf32>
    %157 = arith.select %154, %155, %156 : vector<16x256xi1>, vector<16x256xf32>
    %158 = math.absf %152 : vector<16x256xf32>
    %cst_73 = arith.constant 0.327591091 : f32
    %159 = vector.broadcast %cst_73 : f32 to vector<16x256xf32>
    %160 = arith.mulf %159, %158 : vector<16x256xf32>
    %cst_74 = arith.constant 1.000000e+00 : f32
    %161 = vector.broadcast %cst_74 : f32 to vector<16x256xf32>
    %162 = arith.addf %161, %160 : vector<16x256xf32>
    %cst_75 = arith.constant 1.000000e+00 : f32
    %163 = vector.broadcast %cst_75 : f32 to vector<16x256xf32>
    %164 = arith.divf %163, %162 : vector<16x256xf32>
    %cst_76 = arith.constant 1.06140542 : f32
    %165 = vector.broadcast %cst_76 : f32 to vector<16x256xf32>
    %166 = arith.mulf %164, %165 : vector<16x256xf32>
    %cst_77 = arith.constant -1.45315206 : f32
    %167 = vector.broadcast %cst_77 : f32 to vector<16x256xf32>
    %168 = arith.addf %167, %166 : vector<16x256xf32>
    %169 = arith.mulf %164, %168 : vector<16x256xf32>
    %cst_78 = arith.constant 1.42141378 : f32
    %170 = vector.broadcast %cst_78 : f32 to vector<16x256xf32>
    %171 = arith.addf %170, %169 : vector<16x256xf32>
    %172 = arith.mulf %164, %171 : vector<16x256xf32>
    %cst_79 = arith.constant -0.284496725 : f32
    %173 = vector.broadcast %cst_79 : f32 to vector<16x256xf32>
    %174 = arith.addf %173, %172 : vector<16x256xf32>
    %175 = arith.mulf %164, %174 : vector<16x256xf32>
    %cst_80 = arith.constant 0.254829586 : f32
    %176 = vector.broadcast %cst_80 : f32 to vector<16x256xf32>
    %177 = arith.addf %176, %175 : vector<16x256xf32>
    %178 = arith.mulf %164, %177 : vector<16x256xf32>
    %cst_81 = arith.constant 0.000000e+00 : f32
    %179 = vector.broadcast %cst_81 : f32 to vector<16x256xf32>
    %180 = arith.subf %179, %158 : vector<16x256xf32>
    %181 = arith.mulf %180, %158 : vector<16x256xf32>
    %182 = math.exp %181 : vector<16x256xf32>
    %183 = arith.mulf %178, %182 : vector<16x256xf32>
    %cst_82 = arith.constant 1.000000e+00 : f32
    %184 = vector.broadcast %cst_82 : f32 to vector<16x256xf32>
    %185 = arith.subf %184, %183 : vector<16x256xf32>
    %186 = arith.mulf %157, %185 : vector<16x256xf32>
    %cst_83 = arith.constant 1.000000e+00 : f32
    %187 = vector.broadcast %cst_83 : f32 to vector<16x256xf32>
    %188 = arith.addf %187, %186 : vector<16x256xf32>
    %189 = arith.mulf %150, %188 : vector<16x256xf32>
    %c0_84 = arith.constant 0 : index
    %c0_85 = arith.constant 0 : index
    %190 = vector.load %arg9[%c0_84, %c0_85] : memref<3x256xbf16, #tpu.memory_space<vmem>>, vector<3x256xbf16>
    %191 = arith.truncf %189 : vector<16x256xf32> to vector<16x256xbf16>
    %cst_86 = arith.constant dense<0.000000e+00> : vector<3x16xf32>
    %192 = tpu.matmul %190, %191, %cst_86 {dimension_numbers = #tpu.dot_dimension_numbers<[1], [1], [0], [0], [0, 0, 1, 0], [], []>} : vector<3x256xbf16>, vector<16x256xbf16>, vector<3x16xf32> -> vector<3x16xf32>
    %c0_87 = arith.constant 0 : index
    %c0_88 = arith.constant 0 : index
    %193 = vector.load %arg10[%c0_87, %c0_88] : memref<3x1xf32, #tpu.memory_space<vmem>>, vector<3x1xf32>
    %194 = vector.broadcast %193 : vector<3x1xf32> to vector<3x16xf32>
    %195 = arith.addf %192, %194 : vector<3x16xf32>
    %cst_89 = arith.constant 0.000000e+00 : f32
    %196 = vector.broadcast %cst_89 : f32 to vector<3x16xf32>
    %197 = arith.subf %196, %195 : vector<3x16xf32>
    %198 = math.exp %197 : vector<3x16xf32>
    %cst_90 = arith.constant 1.000000e+00 : f32
    %199 = vector.broadcast %cst_90 : f32 to vector<3x16xf32>
    %200 = arith.addf %199, %198 : vector<3x16xf32>
    %cst_91 = arith.constant 1.000000e+00 : f32
    %201 = vector.broadcast %cst_91 : f32 to vector<3x16xf32>
    %202 = arith.divf %201, %200 : vector<3x16xf32>
    %c0_92 = arith.constant 0 : index
    %c0_93 = arith.constant 0 : index
    %c0_94 = arith.constant 0 : index
    %203 = vector.load %arg12[%c0_92, %c0_93, %c0_94] : memref<1x3x16xf32, #tpu.memory_space<vmem>>, vector<1x3x16xf32>
    %204 = vector.shape_cast %203 : vector<1x3x16xf32> to vector<3x16xf32>
    %205 = vector.shape_cast %202 : vector<3x16xf32> to vector<1x3x16xf32>
    tpu.vector_store %arg12[%c0_92, %c0_93, %c0_94], %205 {strides = array<i32>} : memref<1x3x16xf32, #tpu.memory_space<vmem>>, vector<1x3x16xf32>,
    return
  }
  func.func @transform_0(%arg0: i32) -> (i32, i32, i32) {
    %c0_i32 = arith.constant 0 : i32
    %c0_i32_0 = arith.constant 0 : i32
    %c0_i32_1 = arith.constant 0 : i32
    return %arg0, %c0_i32, %c0_i32_0 : i32, i32, i32
  }
  func.func @transform_1(%arg0: i32) -> (i32, i32) {
    %c0_i32 = arith.constant 0 : i32
    %c0_i32_0 = arith.constant 0 : i32
    %c0_i32_1 = arith.constant 0 : i32
    return %c0_i32, %c0_i32_0 : i32, i32
  }
  func.func @transform_2(%arg0: i32) -> (i32, i32) {
    %c0_i32 = arith.constant 0 : i32
    %c0_i32_0 = arith.constant 0 : i32
    %c0_i32_1 = arith.constant 0 : i32
    return %c0_i32, %c0_i32_0 : i32, i32
  }
  func.func @transform_3(%arg0: i32) -> (i32, i32) {
    %c0_i32 = arith.constant 0 : i32
    %c0_i32_0 = arith.constant 0 : i32
    %c0_i32_1 = arith.constant 0 : i32
    return %c0_i32, %c0_i32_0 : i32, i32
  }
  func.func @transform_4(%arg0: i32) -> (i32, i32) {
    %c0_i32 = arith.constant 0 : i32
    %c0_i32_0 = arith.constant 0 : i32
    %c0_i32_1 = arith.constant 0 : i32
    return %c0_i32, %c0_i32_0 : i32, i32
  }
  func.func @transform_5(%arg0: i32) -> (i32, i32) {
    %c0_i32 = arith.constant 0 : i32
    %c0_i32_0 = arith.constant 0 : i32
    %c0_i32_1 = arith.constant 0 : i32
    return %c0_i32, %c0_i32_0 : i32, i32
  }
  func.func @transform_6(%arg0: i32) -> (i32, i32) {
    %c0_i32 = arith.constant 0 : i32
    %c0_i32_0 = arith.constant 0 : i32
    %c0_i32_1 = arith.constant 0 : i32
    return %c0_i32, %c0_i32_0 : i32, i32
  }
  func.func @transform_7(%arg0: i32) -> (i32, i32) {
    %c0_i32 = arith.constant 0 : i32
    %c0_i32_0 = arith.constant 0 : i32
    %c0_i32_1 = arith.constant 0 : i32
    return %c0_i32, %c0_i32_0 : i32, i32
  }
  func.func @transform_8(%arg0: i32) -> (i32, i32) {
    %c0_i32 = arith.constant 0 : i32
    %c0_i32_0 = arith.constant 0 : i32
    %c0_i32_1 = arith.constant 0 : i32
    return %c0_i32, %c0_i32_0 : i32, i32
  }
  func.func @transform_9(%arg0: i32) -> (i32, i32) {
    %c0_i32 = arith.constant 0 : i32
    %c0_i32_0 = arith.constant 0 : i32
    %c0_i32_1 = arith.constant 0 : i32
    return %c0_i32, %c0_i32_0 : i32, i32
  }
  func.func @transform_10(%arg0: i32) -> (i32, i32, i32) {
    %c0_i32 = arith.constant 0 : i32
    %c0_i32_0 = arith.constant 0 : i32
    %c0_i32_1 = arith.constant 0 : i32
    %c0_i32_2 = arith.constant 0 : i32
    return %c0_i32, %c0_i32_0, %c0_i32_1 : i32, i32, i32
  }
  func.func @transform_11(%arg0: i32) -> (i32, i32, i32) {
    %c0_i32 = arith.constant 0 : i32
    %c0_i32_0 = arith.constant 0 : i32
    %c0_i32_1 = arith.constant 0 : i32
    return %arg0, %c0_i32, %c0_i32_0 : i32, i32, i32
  }
}

module attributes {stable_mosaic.version = 11 : i64} {
  func.func @_quantise_kernel(%arg0: i32, %arg1: i32, %arg2: memref<1x3x256xf32, #tpu.memory_space<vmem>>, %arg3: memref<16x3xf32, #tpu.memory_space<vmem>>, %arg4: memref<16x1xf32, #tpu.memory_space<vmem>>, %arg5: memref<1x3x16xf32, #tpu.memory_space<vmem>>, %arg6: memref<1x16x256xbf16, #tpu.memory_space<vmem>>, %arg7: memref<1x3x256xf32, #tpu.memory_space<vmem>>) attributes {dimension_semantics = [#tpu.dimension_semantics<parallel>, #tpu.dimension_semantics<parallel>], iteration_bounds = array<i64: 2, 1>, scalar_prefetch = 0 : i64, scratch_operands = 0 : i64, tpu.core_type = #tpu.core_type<tc>, window_params = [{transform_indices = @transform_0, window_bounds = array<i64: 1, 3, 256>}, {pipeline_mode = #tpu.pipeline_mode<synchronous>, transform_indices = @transform_1, window_bounds = array<i64: 16, 3>}, {pipeline_mode = #tpu.pipeline_mode<synchronous>, transform_indices = @transform_2, window_bounds = array<i64: 16, 1>}, {transform_indices = @transform_3, window_bounds = array<i64: 1, 3, 16>}, {transform_indices = @transform_4, window_bounds = array<i64: 1, 16, 256>}, {transform_indices = @transform_5, window_bounds = array<i64: 1, 3, 256>}]} {
    %c0 = arith.constant 0 : index
    %c0_0 = arith.constant 0 : index
    %c0_1 = arith.constant 0 : index
    %0 = vector.load %arg2[%c0, %c0_0, %c0_1] : memref<1x3x256xf32, #tpu.memory_space<vmem>>, vector<1x3x256xf32>
    %1 = vector.shape_cast %0 : vector<1x3x256xf32> to vector<3x256xf32>
    %c0_2 = arith.constant 0 : index
    %c0_3 = arith.constant 0 : index
    %2 = vector.load %arg3[%c0_2, %c0_3] : memref<16x3xf32, #tpu.memory_space<vmem>>, vector<16x3xf32>
    %c0_4 = arith.constant 0 : index
    %c0_5 = arith.constant 0 : index
    %3 = vector.load %arg4[%c0_4, %c0_5] : memref<16x1xf32, #tpu.memory_space<vmem>>, vector<16x1xf32>
    %4 = vector.extract_strided_slice %2 {offsets = [0, 0], sizes = [16, 1], strides = [1, 1]} : vector<16x3xf32> to vector<16x1xf32>
    %5 = vector.extract_strided_slice %1 {offsets = [0, 0], sizes = [1, 256], strides = [1, 1]} : vector<3x256xf32> to vector<1x256xf32>
    %6 = vector.broadcast %4 : vector<16x1xf32> to vector<16x256xf32>
    %7 = vector.broadcast %5 : vector<1x256xf32> to vector<16x256xf32>
    %8 = arith.mulf %6, %7 : vector<16x256xf32>
    %9 = vector.broadcast %3 : vector<16x1xf32> to vector<16x256xf32>
    %10 = arith.addf %9, %8 : vector<16x256xf32>
    %11 = vector.extract_strided_slice %2 {offsets = [0, 1], sizes = [16, 1], strides = [1, 1]} : vector<16x3xf32> to vector<16x1xf32>
    %12 = vector.extract_strided_slice %1 {offsets = [1, 0], sizes = [1, 256], strides = [1, 1]} : vector<3x256xf32> to vector<1x256xf32>
    %13 = vector.broadcast %11 : vector<16x1xf32> to vector<16x256xf32>
    %14 = vector.broadcast %12 : vector<1x256xf32> to vector<16x256xf32>
    %15 = arith.mulf %13, %14 : vector<16x256xf32>
    %16 = arith.addf %10, %15 : vector<16x256xf32>
    %17 = vector.extract_strided_slice %2 {offsets = [0, 2], sizes = [16, 1], strides = [1, 1]} : vector<16x3xf32> to vector<16x1xf32>
    %18 = vector.extract_strided_slice %1 {offsets = [2, 0], sizes = [1, 256], strides = [1, 1]} : vector<3x256xf32> to vector<1x256xf32>
    %19 = vector.broadcast %17 : vector<16x1xf32> to vector<16x256xf32>
    %20 = vector.broadcast %18 : vector<1x256xf32> to vector<16x256xf32>
    %21 = arith.mulf %19, %20 : vector<16x256xf32>
    %22 = arith.addf %16, %21 : vector<16x256xf32>
    %cst = arith.constant dense<0xFF800000> : vector<256xf32>
    %23 = vector.multi_reduction <maximumf>, %22, %cst [0] : vector<16x256xf32> to vector<256xf32>
    %24 = vector.shape_cast %23 : vector<256xf32> to vector<1x256xf32>
    %25 = vector.broadcast %24 : vector<1x256xf32> to vector<16x256xf32>
    %26 = arith.subf %22, %25 : vector<16x256xf32>
    %27 = math.exp %26 : vector<16x256xf32>
    %cst_6 = arith.constant dense<0.000000e+00> : vector<256xf32>
    %28 = vector.multi_reduction <add>, %27, %cst_6 [0] : vector<16x256xf32> to vector<256xf32>
    %29 = vector.shape_cast %28 : vector<256xf32> to vector<1x256xf32>
    %30 = vector.broadcast %29 : vector<1x256xf32> to vector<16x256xf32>
    %31 = arith.divf %27, %30 : vector<16x256xf32>
    %cst_7 = arith.constant 1.000000e+03 : f32
    %32 = vector.broadcast %cst_7 : f32 to vector<16x256xf32>
    %33 = arith.mulf %31, %32 : vector<16x256xf32>
    %cst_8 = arith.constant dense<0xFF800000> : vector<256xf32>
    %34 = vector.multi_reduction <maximumf>, %33, %cst_8 [0] : vector<16x256xf32> to vector<256xf32>
    %35 = vector.shape_cast %34 : vector<256xf32> to vector<1x256xf32>
    %36 = vector.broadcast %35 : vector<1x256xf32> to vector<16x256xf32>
    %37 = arith.subf %33, %36 : vector<16x256xf32>
    %38 = math.exp %37 : vector<16x256xf32>
    %cst_9 = arith.constant dense<0.000000e+00> : vector<256xf32>
    %39 = vector.multi_reduction <add>, %38, %cst_9 [0] : vector<16x256xf32> to vector<256xf32>
    %40 = vector.shape_cast %39 : vector<256xf32> to vector<1x256xf32>
    %41 = tpu.reciprocal %40 {approx = true} : vector<1x256xf32> -> vector<1x256xf32>
    %42 = vector.broadcast %41 : vector<1x256xf32> to vector<16x256xf32>
    %43 = arith.mulf %38, %42 : vector<16x256xf32>
    %44 = arith.truncf %43 : vector<16x256xf32> to vector<16x256xbf16>
    %c0_10 = arith.constant 0 : index
    %c0_11 = arith.constant 0 : index
    %c0_12 = arith.constant 0 : index
    %45 = vector.load %arg6[%c0_10, %c0_11, %c0_12] : memref<1x16x256xbf16, #tpu.memory_space<vmem>>, vector<1x16x256xbf16>
    %46 = vector.shape_cast %45 : vector<1x16x256xbf16> to vector<16x256xbf16>
    %47 = vector.shape_cast %44 : vector<16x256xbf16> to vector<1x16x256xbf16>
    tpu.vector_store %arg6[%c0_10, %c0_11, %c0_12], %47 {strides = array<i32>} : memref<1x16x256xbf16, #tpu.memory_space<vmem>>, vector<1x16x256xbf16>,
    %c0_13 = arith.constant 0 : index
    %c0_14 = arith.constant 0 : index
    %c0_15 = arith.constant 0 : index
    %48 = vector.load %arg5[%c0_13, %c0_14, %c0_15] : memref<1x3x16xf32, #tpu.memory_space<vmem>>, vector<1x3x16xf32>
    %49 = vector.shape_cast %48 : vector<1x3x16xf32> to vector<3x16xf32>
    %50 = arith.truncf %49 : vector<3x16xf32> to vector<3x16xbf16>
    %51 = arith.truncf %43 : vector<16x256xf32> to vector<16x256xbf16>
    %cst_16 = arith.constant dense<0.000000e+00> : vector<3x256xf32>
    %52 = tpu.matmul %50, %51, %cst_16 {dimension_numbers = #tpu.dot_dimension_numbers<[1], [0], [0], [1], [0, 0, 1, 1], [], []>} : vector<3x16xbf16>, vector<16x256xbf16>, vector<3x256xf32> -> vector<3x256xf32>
    %c0_17 = arith.constant 0 : index
    %c0_18 = arith.constant 0 : index
    %c0_19 = arith.constant 0 : index
    %53 = vector.load %arg7[%c0_17, %c0_18, %c0_19] : memref<1x3x256xf32, #tpu.memory_space<vmem>>, vector<1x3x256xf32>
    %54 = vector.shape_cast %53 : vector<1x3x256xf32> to vector<3x256xf32>
    %55 = vector.shape_cast %52 : vector<3x256xf32> to vector<1x3x256xf32>
    tpu.vector_store %arg7[%c0_17, %c0_18, %c0_19], %55 {strides = array<i32>} : memref<1x3x256xf32, #tpu.memory_space<vmem>>, vector<1x3x256xf32>,
    return
  }
  func.func @transform_0(%arg0: i32, %arg1: i32) -> (i32, i32, i32) {
    %c0_i32 = arith.constant 0 : i32
    %c0_i32_0 = arith.constant 0 : i32
    return %arg0, %c0_i32, %arg1 : i32, i32, i32
  }
  func.func @transform_1(%arg0: i32, %arg1: i32) -> (i32, i32) {
    %c0_i32 = arith.constant 0 : i32
    %c0_i32_0 = arith.constant 0 : i32
    %c0_i32_1 = arith.constant 0 : i32
    return %c0_i32, %c0_i32_0 : i32, i32
  }
  func.func @transform_2(%arg0: i32, %arg1: i32) -> (i32, i32) {
    %c0_i32 = arith.constant 0 : i32
    %c0_i32_0 = arith.constant 0 : i32
    %c0_i32_1 = arith.constant 0 : i32
    return %c0_i32, %c0_i32_0 : i32, i32
  }
  func.func @transform_3(%arg0: i32, %arg1: i32) -> (i32, i32, i32) {
    %c0_i32 = arith.constant 0 : i32
    %c0_i32_0 = arith.constant 0 : i32
    %c0_i32_1 = arith.constant 0 : i32
    return %arg0, %c0_i32, %c0_i32_0 : i32, i32, i32
  }
  func.func @transform_4(%arg0: i32, %arg1: i32) -> (i32, i32, i32) {
    %c0_i32 = arith.constant 0 : i32
    %c0_i32_0 = arith.constant 0 : i32
    return %arg0, %c0_i32, %arg1 : i32, i32, i32
  }
  func.func @transform_5(%arg0: i32, %arg1: i32) -> (i32, i32, i32) {
    %c0_i32 = arith.constant 0 : i32
    %c0_i32_0 = arith.constant 0 : i32
    return %arg0, %c0_i32, %arg1 : i32, i32, i32
  }
}

</mosaic_0001>

<bundles_post_ra>
// kernel: model_forward.3
= control target key start
LH: loop header
LB: loop body
LE: loop exit
PB: predicated region body
PF: predicated region fallthrough
CT: control target
= control target key end

     0   :  { %s873_s18 = smov 0   ;;  %s875_s19 = smov 0   ;;  %s937_s0 = inlined_call_operand.vmem [shape: f32[2,3,256], index: 0, kind: input, shape index: {}]   ;;  %s938_s1 = inlined_call_operand.vmem [shape: f32[16,3], index: 1, kind: input, shape index: {}]   ;;  %s939_s2 = inlined_call_operand.vmem [shape: f32[16,1], index: 2, kind: input, shape index: {}]   ;;  %s940_s3 = inlined_call_operand.vmem [shape: f32[2,3,16], index: 3, kind: input, shape index: {}]   ;;  %s941_s4 = inlined_call_operand.vmem [shape: bf16[2,16,256], index: 4, kind: output, shape index: {0}]   ;;  %s942_s5 = inlined_call_operand.vmem [shape: f32[2,3,256], index: 5, kind: output, shape index: {1}]  }
   0x1   :  { %s877_s20 = smov 0  }
   0x2 LB: > { %s28_s21 = sadd.s32 1, %s834_s19  ;;  %p741_p0 = scmp.ge.s32.totalorder %s838_s20, 1  ;;  %s838_s20 = sphi %s877_s20, %s16_s20   ;;  %s834_s19 = sphi %s875_s19, %s944_s19   ;;  %s830_s18 = sphi %s873_s18, %s943_s18  }
   0x3   : > { %p30_p1 = scmp.ge.s32.totalorder %s28_s21, 2  ;;  %p222_p2 = scmp.lt.s32.totalorder %s838_s20, 3 }
   0x5   : > { %s946_s21 = smov (%p30_p1, %s28_s21), 0  ;;  %p223_p3 = pnand %p741_p0, %p222_p2 }
   0x6   : > { %p272_p4 = scmp.lt.s32.totalorder (!%p223_p3), %s830_s18, 1 }
   0x7   : > { %226 = sbr.rel (%p223_p3) target bundleno = 491 (0x1eb), region = 36 }
   0xc   : > { %v309_v0 = vld [vmem:[%s939_s2] sm:$0xff]  ;;  %v840_v2 = vmov 0   ;;  %v310_v3 = vld [vmem:[%s939_s2 + $0x8] sm:$0xff]  ;;  %v841_v5 = vmov 1   ;;  %v842_v6 = vmov 2   ;;  %s948_s18 = smov (!%p272_p4, %s830_s18), 1  ;;  %v322_v7 = vlaneseq }
   0xd   : > { %v307_v1 = vld [vmem:[%s938_s1] sm:$0xff]  ;;  %787 = vset.pattern.permute.xlu1 %v840_v2  ;;  %786 = vset.pattern.permute.xlu0 %v840_v2  ;;  %v308_v4 = vld [vmem:[%s938_s1 + $0x8] sm:$0xff]  ;;  %s754_s30 = sshll.u32 %s948_s18, 3  ;;  %s744_s9 = sshll.u32 %s948_s18, 2  ;;  %vm538_vm0 = vcmask 130048  }
   0xe   : > { %346 = vperm.xlu1 %787, %v309_v0   ;;  %313 = vperm.xlu0 %786, %v307_v1   ;;  %v323_v8 = vshrl.u32 %v322_v7, 7  ;;  %s279_s8 = scalar_lea.vmem %s937_s0, %s754_s30  ;;  %s284_s12 = scalar_lea.vmem %s940_s3, %s744_s9 }
   0xf   : > { %574 = vmatprep.mubr.bf16.mxu0 %v840_v2  ;;  %v306_v11 = vld [vmem:[%s279_s8] sm:$0x77]  ;;  %s755_s13 = sshll.u32 %s948_s18, 4  ;;  %s303_s23 = scalar_lea.vmem %s942_s5, %s754_s30 }
  0x10   : > { %v324_v9 = vsub.s32 0, %v323_v8  ;;  %v328_v10 = vsub.s32 4, %v323_v8  ;;  %v368_v12 = vsub.s32 1, %v323_v8  ;;  %v372_v13 = vsub.s32 5, %v323_v8  ;;  %s293_s16 = scalar_lea.vmem %s941_s4, %s755_s13 }
  0x11   : > { %v402_v20 = vsub.s32 2, %v323_v8  ;;  %v406_v21 = vsub.s32 6, %v323_v8 }
  0x12   : > { %351 = vperm.xlu1 %787, %v310_v3   ;;  %318 = vperm.xlu0 %786, %v308_v4   ;;  %v325_v16 = vrot.slane %v306_v11, %v324_v9  ;;  %v329_v17 = vrot.slane %v306_v11, %v328_v10  ;;  %v369_v18 = vrot.slane %v306_v11, %v368_v12 }
  0x13   : > { %v373_v19 = vrot.slane %v306_v11, %v372_v13  ;;  %v403_v28 = vrot.slane %v306_v11, %v402_v20  ;;  %v407_v29 = vrot.slane %v306_v11, %v406_v21 }
  0x14   : > { %v335_v22 = vrot.slane %v325_v16, %v324_v9  ;;  %v339_v23 = vrot.slane %v329_v17, %v324_v9  ;;  %v379_v26 = vrot.slane %v369_v18, %v368_v12 }
  0x15   : > { %v383_v27 = vrot.slane %v373_v19, %v368_v12  ;;  %v413_v40 = vrot.slane %v403_v28, %v402_v20  ;;  %v417_v41 = vrot.slane %v407_v29, %v402_v20 }
  0x16   : > { %789 = vset.pattern.permute.xlu1 %v841_v5  ;;  %788 = vset.pattern.permute.xlu0 %v841_v5 }
  0x17   : > { %363 = vperm.xlu1 %789, %v308_v4   ;;  %359 = vperm.xlu0 %788, %v307_v1  }
  0x1b   : > { %790 = vset.pattern.permute.xlu1 %v842_v6  ;;  %791 = vset.pattern.permute.xlu0 %v842_v6 }
  0x1c   : > { %393 = vperm.xlu1 %790, %v307_v1   ;;  %397 = vperm.xlu0 %791, %v308_v4  }
  0x89   : > { %v347_v14 = vpop.permute.xlu1 %346  ;;  %v314_v15 = vpop.permute.xlu0 %313 }
  0x8a   : > { %v340_v30 = vmul.f32 %v335_v22, %v314_v15  ;;  %v341_v31 = vmul.f32 %v339_v23, %v314_v15 }
  0x8c   : > { %v354_v42 = vadd.f32 %v347_v14, %v340_v30  ;;  %v355_v43 = vadd.f32 %v347_v14, %v341_v31 }
  0x8d   : > { %v352_v24 = vpop.permute.xlu1 %351  ;;  %v319_v25 = vpop.permute.xlu0 %318 }
  0x8e   : > { %v342_v32 = vmul.f32 %v335_v22, %v319_v25  ;;  %v343_v33 = vmul.f32 %v339_v23, %v319_v25 }
  0x90   : > { %v356_v44 = vadd.f32 %v352_v24, %v342_v32  ;;  %v357_v45 = vadd.f32 %v352_v24, %v343_v33 }
  0x92   : > { %v364_v34 = vpop.permute.xlu1 %363  ;;  %v360_v35 = vpop.permute.xlu0 %359 }
  0x93   : > { %v386_v36 = vmul.f32 %v379_v26, %v364_v34  ;;  %v387_v37 = vmul.f32 %v383_v27, %v364_v34  ;;  %v384_v38 = vmul.f32 %v379_v26, %v360_v35  ;;  %v385_v39 = vmul.f32 %v383_v27, %v360_v35 }
  0x95   : > { %v390_v46 = vadd.f32 %v386_v36, %v356_v44  ;;  %v391_v47 = vadd.f32 %v387_v37, %v357_v45  ;;  %v388_v48 = vadd.f32 %v384_v38, %v354_v42  ;;  %v389_v49 = vadd.f32 %v385_v39, %v355_v43 }
  0x97   : > { %v394_v50 = vpop.permute.xlu1 %393  ;;  %v398_v51 = vpop.permute.xlu0 %397 }
  0x98   : > { %v418_v52 = vmul.f32 %v413_v40, %v394_v50  ;;  %v419_v53 = vmul.f32 %v417_v41, %v394_v50  ;;  %v420_v54 = vmul.f32 %v413_v40, %v398_v51  ;;  %v421_v55 = vmul.f32 %v417_v41, %v398_v51 }
  0x9a   : > { %v422_v56 = vadd.f32 %v418_v52, %v388_v48  ;;  %v423_v57 = vadd.f32 %v419_v53, %v389_v49  ;;  %v424_v58 = vadd.f32 %v420_v54, %v390_v46  ;;  %v425_v59 = vadd.f32 %v421_v55, %v391_v47 }
  0x9c   : > { %v426_v60 = vmax.f32 %v422_v56, %v424_v58  ;;  %v433_v61 = vmax.f32 %v423_v57, %v425_v59 }
  0x9e   : > { %v427_v62 = vrot.slane %v426_v60, 4  ;;  %v434_v63 = vrot.slane %v433_v61, 4 }
  0xa0   : > { %v428_v0 = vmax.f32 %v426_v60, %v427_v62  ;;  %v435_v1 = vmax.f32 %v433_v61, %v434_v63 }
  0xa2   : > { %v429_v2 = vrot.slane %v428_v0, 2  ;;  %v436_v3 = vrot.slane %v435_v1, 2 }
  0xa4   : > { %v430_v4 = vmax.f32 %v428_v0, %v429_v2  ;;  %v437_v5 = vmax.f32 %v435_v1, %v436_v3 }
  0xa6   : > { %v431_v6 = vrot.slane %v430_v4, 1  ;;  %v438_v7 = vrot.slane %v437_v5, 1 }
  0xa8   : > { %v432_v8 = vmax.f32 %v430_v4, %v431_v6  ;;  %v439_v9 = vmax.f32 %v437_v5, %v438_v7 }
  0xaa   : > { %v440_v10 = vsub.f32 %v422_v56, %v432_v8  ;;  %v441_v11 = vsub.f32 %v423_v57, %v439_v9  ;;  %v442_v12 = vsub.f32 %v424_v58, %v432_v8  ;;  %v443_v13 = vsub.f32 %v425_v59, %v439_v9 }
  0xac   : > { %v444_v14 = vmul.f32 1.442695, %v440_v10  ;;  %v446_v15 = vmul.f32 1.442695, %v441_v11  ;;  %v448_v16 = vmul.f32 1.442695, %v442_v12 }
  0xad   : > { %v450_v17 = vmul.f32 1.442695, %v443_v13 }
  0xae   : > { %792 = vpow2.f32 %v444_v14 }
  0xaf   : > { %794 = vpow2.f32 %v446_v15 }
  0xb0   : > { %796 = vpow2.f32 %v448_v16 }
  0xb1   : > { %798 = vpow2.f32 %v450_v17 }
  0xbb   : > { %v793_v18 = vpop.eup %792 }
  0xbc   : > { %v795_v19 = vpop.eup %794 }
  0xbd   : > { %v797_v20 = vpop.eup %796 }
  0xbe   : > { %v799_v21 = vpop.eup %798  ;;  %v452_v22 = vadd.f32 %v797_v20, %v793_v18 }
  0xbf   : > { %v459_v23 = vadd.f32 %v799_v21, %v795_v19 }
  0xc0   : > { %v453_v24 = vrot.slane %v452_v22, 4 }
  0xc1   : > { %v460_v25 = vrot.slane %v459_v23, 4 }
  0xc2   : > { %v454_v26 = vadd.f32 %v453_v24, %v452_v22 }
  0xc3   : > { %v461_v27 = vadd.f32 %v460_v25, %v459_v23 }
  0xc4   : > { %v455_v28 = vrot.slane %v454_v26, 2 }
  0xc5   : > { %v462_v29 = vrot.slane %v461_v27, 2 }
  0xc6   : > { %v456_v30 = vadd.f32 %v455_v28, %v454_v26  ;;  %v536_v28 = vld [vmem:[%s284_s12] sm:$0x7] }
  0xc7   : > { %v463_v31 = vadd.f32 %v462_v29, %v461_v27 }
  0xc8   : > { %v457_v32 = vrot.slane %v456_v30, 1 }
  0xc9   : > { %v464_v33 = vrot.slane %v463_v31, 1 }
  0xca   : > { %v458_v34 = vadd.f32 %v457_v32, %v456_v30 }
  0xcb   : > { %v465_v35 = vadd.f32 %v464_v33, %v463_v31  ;;  %v537_v33 = vpack.c.bf16 %v536_v28, %v536_v28 }
  0xcc   : > { %800 = vrcp.f32 %v458_v34 }
  0xcd   : > { %802 = vrcp.f32 %v465_v35 }
  0xd9   : > { %v801_v36 = vpop.eup %800 }
  0xda   : > { %v803_v37 = vpop.eup %802  ;;  %v470_v38 = vmul.f32 %v801_v36, %v797_v20  ;;  %v467_v39 = vmul.f32 %v801_v36, %v793_v18 }
  0xdb   : > { %v469_v40 = vmul.f32 %v803_v37, %v795_v19  ;;  %v471_v41 = vmul.f32 %v803_v37, %v799_v21 }
  0xdc   : > { %v474_v42 = vmul.f32 1000.0, %v470_v38  ;;  %v472_v43 = vmul.f32 1000.0, %v467_v39 }
  0xdd   : > { %v473_v44 = vmul.f32 1000.0, %v469_v40  ;;  %v475_v45 = vmul.f32 1000.0, %v471_v41 }
  0xde   : > { %v476_v46 = vmax.f32 %v472_v43, %v474_v42 }
  0xdf   : > { %v483_v47 = vmax.f32 %v473_v44, %v475_v45 }
  0xe0   : > { %v477_v48 = vrot.slane %v476_v46, 4 }
  0xe1   : > { %v484_v49 = vrot.slane %v483_v47, 4 }
  0xe2   : > { %v478_v50 = vmax.f32 %v476_v46, %v477_v48 }
  0xe3   : > { %v485_v51 = vmax.f32 %v483_v47, %v484_v49 }
  0xe4   : > { %v479_v52 = vrot.slane %v478_v50, 2 }
  0xe5   : > { %v486_v53 = vrot.slane %v485_v51, 2 }
  0xe6   : > { %v480_v54 = vmax.f32 %v478_v50, %v479_v52 }
  0xe7   : > { %v487_v55 = vmax.f32 %v485_v51, %v486_v53 }
  0xe8   : > { %v481_v56 = vrot.slane %v480_v54, 1 }
  0xe9   : > { %v488_v57 = vrot.slane %v487_v55, 1 }
  0xea   : > { %v482_v58 = vmax.f32 %v480_v54, %v481_v56 }
  0xeb   : > { %v489_v59 = vmax.f32 %v487_v55, %v488_v57 }
  0xec   : > { %v490_v60 = vsub.f32 %v472_v43, %v482_v58  ;;  %v492_v61 = vsub.f32 %v474_v42, %v482_v58 }
  0xed   : > { %v491_v62 = vsub.f32 %v473_v44, %v489_v59  ;;  %v493_v63 = vsub.f32 %v475_v45, %v489_v59 }
  0xee   : > { %v494_v0 = vmul.f32 1.442695, %v490_v60  ;;  %v498_v3 = vmul.f32 1.442695, %v492_v61 }
  0xef   : > { %v496_v1 = vmul.f32 1.442695, %v491_v62  ;;  %v500_v2 = vmul.f32 1.442695, %v493_v63 }
  0xf0   : > { %804 = vpow2.f32 %v494_v0 }
  0xf1   : > { %806 = vpow2.f32 %v496_v1 }
  0xf2   : > { %808 = vpow2.f32 %v500_v2 }
  0xf3   : > { %810 = vpow2.f32 %v498_v3 }
  0xfd   : > { %v805_v4 = vpop.eup %804 }
  0xfe   : > { %v807_v5 = vpop.eup %806 }
  0xff   : > { %v809_v6 = vpop.eup %808 }
 0x100   : > { %v811_v7 = vpop.eup %810  ;;  %v509_v8 = vadd.f32 %v809_v6, %v807_v5 }
 0x101   : > { %v502_v9 = vadd.f32 %v811_v7, %v805_v4 }
 0x102   : > { %v510_v10 = vrot.slane %v509_v8, 4 }
 0x103   : > { %v503_v11 = vrot.slane %v502_v9, 4 }
 0x104   : > { %v511_v12 = vadd.f32 %v510_v10, %v509_v8 }
 0x105   : > { %v504_v13 = vadd.f32 %v503_v11, %v502_v9 }
 0x106   : > { %v512_v14 = vrot.slane %v511_v12, 2 }
 0x107   : > { %v505_v15 = vrot.slane %v504_v13, 2 }
 0x108   : > { %v513_v16 = vadd.f32 %v512_v14, %v511_v12 }
 0x109   : > { %v506_v17 = vadd.f32 %v505_v15, %v504_v13 }
 0x10a   : > { %v514_v18 = vrot.slane %v513_v16, 1 }
 0x10b   : > { %v507_v19 = vrot.slane %v506_v17, 1 }
 0x10c   : > { %v515_v20 = vadd.f32 %v514_v18, %v513_v16 }
 0x10d   : > { %v508_v21 = vadd.f32 %v507_v19, %v506_v17 }
 0x10e   : > { %812 = vrcp.f32 %v515_v20 }
 0x10f   : > { %814 = vrcp.f32 %v508_v21 }
 0x11b   : > { %v813_v22 = vpop.eup %812 }
 0x11c   : > { %v815_v23 = vpop.eup %814  ;;  %v519_v24 = vmul.f32 %v813_v22, %v807_v5  ;;  %v521_v25 = vmul.f32 %v813_v22, %v809_v6 }
 0x11d   : > { %v518_v26 = vmul.f32 %v815_v23, %v805_v4  ;;  %v520_v27 = vmul.f32 %v815_v23, %v811_v7 }
 0x11e   : > { %v523_v29 = vpack.c.bf16 %v521_v25, %v519_v24 }
 0x11f   : > { %v522_v30 = vpack.c.bf16 %v520_v27, %v518_v26  ;;  %v757_v31 = vpack.c.bf16 %v519_v24, %v518_v26  ;;  %v758_v32 = vpack.c.bf16 %v521_v25, %v520_v27 }
 0x120   : > { %556 = vmatprep.subr.bf16.mxu0 %v523_v29 }
 0x121   : > { %534 = vst [vmem:[%s293_s16] sm:$0xff] %v757_v31  ;;  %535 = vst [vmem:[%s293_s16 + $0x8] sm:$0xff] %v758_v32  ;;  %557 = vmatpush1.bf16.msra.mxu0 %v522_v30 }
 0x124   : > { %751 = vmatmul.mubr.msk.bf16.vlgmr.msra.gmra.mxu0 %vm538_vm0, %v537_v33 }
 0x1e4   : > { %v576_v34 = vpop.f32.mrf.mxu0 }
 0x1e6   : > { %v578_v35 = vpop.f32.mrf.mxu0 }
 0x1e7   : > { %v585_v36 = vcombine.low %v576_v34, %v578_v35 }
 0x1e8   : > { %v580_v37 = vpop.f32.mrf.mxu0 }
 0x1e9   : > { %587 = vst [vmem:[%s303_s23] sm:$0x77] %v585_v36 }
 0x1ea   : > { %v581_v38 = vpop.f32.mrf.mxu0 }
 0x1eb PF: > { %s16_s20 = sadd.s32 1, %s838_s20   ;;  %s943_s18 = smov %s834_s19 }
 0x1ec   : > { %p13_p5 = scmp.ge.s32.totalorder %s16_s20, 4   ;;  %s944_s19 = smov %s946_s21 }
 0x1ee   :  { %15 = sbr.rel (!%p13_p5) target bundleno = 2 (0x2), region = 81 }

// kernel: model_forward.2
= control target key start
LH: loop header
LB: loop body
LE: loop exit
PB: predicated region body
PF: predicated region fallthrough
CT: control target
= control target key end

     0   :  { %s5269_s17 = smov 0   ;;  %s6941_s0 = inlined_call_operand.vmem [shape: f32[2,16,256], index: 0, kind: input, shape index: {}]   ;;  %s6942_s1 = inlined_call_operand.vmem [shape: bf16[64,256], index: 1, kind: input, shape index: {}]   ;;  %s6943_s2 = inlined_call_operand.vmem [shape: bf16[256,256], index: 2, kind: input, shape index: {}]   ;;  %s6944_s3 = inlined_call_operand.vmem [shape: bf16[256,256], index: 3, kind: input, shape index: {}]   ;;  %s6945_s4 = inlined_call_operand.vmem [shape: bf16[256,1024], index: 4, kind: input, shape index: {}]   ;;  %s6946_s5 = inlined_call_operand.vmem [shape: f32[1,1024], index: 5, kind: input, shape index: {}]   ;;  %s6947_s6 = inlined_call_operand.vmem [shape: bf16[1024,256], index: 6, kind: input, shape index: {}]   ;;  %s6948_s7 = inlined_call_operand.vmem [shape: bf16[256,256], index: 7, kind: input, shape index: {}]   ;;  %s6949_s8 = inlined_call_operand.vmem [shape: bf16[3,256], index: 8, kind: input, shape index: {}]   ;;  %s6950_s9 = inlined_call_operand.vmem [shape: f32[3,1], index: 9, kind: input, shape index: {}]   ;;  %s6951_s10 = inlined_call_operand.vmem [shape: f32[8,1,256], index: 10, kind: input, shape index: {}]   ;;  %s6952_s11 = inlined_call_operand.vmem [shape: f32[2,3,16], index: 11, kind: output, shape index: {}]  }
   0x1 LB: > { %s4286_s18 = sadd.s32 4294967295, %s5202_s17   ;;  %p4290_p0 = scmp.ge.s32.totalorder %s5202_s17, 1  ;;  %s5202_s17 = sphi %s5269_s17, %s21_s17  }
   0x2   : > { %p337_p1 = scmp.lt.s32.totalorder %s5202_s17, 3 }
   0x4   : > { %p338_p2 = pnand %p4290_p0, %p337_p1 }
   0x5   : > { %p376_p3 = scmp.lt.s32.totalorder (!%p338_p2), %s4286_s18, 1 }
   0x6   : > { %341 = sbr.rel (%p338_p2) target bundleno = 2741 (0xab5), region = 64 }
   0xb   : > { %s6954_s18 = smov (!%p376_p3, %s4286_s18), 1  ;;  %v4724_v6 = vld [vmem:[%s6943_s2 + $0x74] ss:$8 sps:$4 sm:$0xff]   ;;  %v4726_v7 = vld [vmem:[%s6943_s2 + $0x70] ss:$8 sps:$4 sm:$0xff]   ;;  %v437_v59 = vlaneseq  ;;  %vm581_vm0 = vcmask 130048  }
   0xc   : > { %s4667_s19 = sshll.u32 %s6954_s18, 5  ;;  %v4727_v8 = vld [vmem:[%s6943_s2 + $0x64] ss:$8 sps:$4 sm:$0xff]   ;;  %866 = vmatprep.subr.bf16.mxu1 %v4724_v6  ;;  %v4729_v9 = vld [vmem:[%s6943_s2 + $0x60] ss:$8 sps:$4 sm:$0xff]   ;;  %vm5205_vm1 = vmmov 0  }
   0xd   : > { %s380_s22 = scalar_lea.vmem %s6941_s0, %s4667_s19  ;;  %867 = vmatpush1.bf16.msra.mxu1 %v4726_v7  ;;  %v4730_v10 = vld [vmem:[%s6943_s2 + $0x54] ss:$8 sps:$4 sm:$0xff]   ;;  %v4732_v11 = vld [vmem:[%s6943_s2 + $0x50] ss:$8 sps:$4 sm:$0xff]   ;;  %v4733_v12 = vld [vmem:[%s6943_s2 + $0x44] ss:$8 sps:$4 sm:$0xff]  }
   0xe   : > { %v386_v0 = vld [vmem:[%s380_s22] sm:$0xff]  ;;  %v387_v1 = vld [vmem:[%s380_s22 + $0x8] sm:$0xff]  ;;  %v388_v2 = vld [vmem:[%s380_s22 + $0x10] sm:$0xff]  ;;  %868 = vmatprep.subr.bf16.mxu1 %v4727_v8  ;;  %v5390_v60 = vshrl.u32 %v437_v59, 7  ;;  %vm1111_vm2 = vcmask 523264   ;;  %s4293_s19 = sshll.u32 %s6954_s18, 2 }
   0xf   : > { %v403_v3 = vadd.f32 %v387_v1, %v386_v0  ;;  %v389_v4 = vld [vmem:[%s380_s22 + $0x18] sm:$0xff]  ;;  %v4735_v13 = vld [vmem:[%s6943_s2 + $0x40] ss:$8 sps:$4 sm:$0xff]   ;;  %v4739_v16 = vld [vmem:[%s6943_s2 + $0x24] ss:$8 sps:$4 sm:$0xff]   ;;  %s5206_s22 = smov 64   ;;  %s384_s23 = scalar_lea.vmem %s6952_s11, %s4293_s19 }
  0x10   : > { %v406_v5 = vadd.f32 %v389_v4, %v388_v2  ;;  %v4736_v14 = vld [vmem:[%s6943_s2 + $0x34] ss:$8 sps:$4 sm:$0xff]   ;;  %v4738_v15 = vld [vmem:[%s6943_s2 + $0x30] ss:$8 sps:$4 sm:$0xff]   ;;  %v4741_v17 = vld [vmem:[%s6943_s2 + $0x20] ss:$8 sps:$4 sm:$0xff]  }
  0x11   : > { %404 = vadd.xlane.f32.xlu0 %v403_v3  ;;  %869 = vmatpush1.bf16.msra.mxu1 %v4729_v9  ;;  %v4742_v18 = vld [vmem:[%s6943_s2 + $0x14] ss:$8 sps:$4 sm:$0xff]   ;;  %v4744_v19 = vld [vmem:[%s6943_s2 + $0x10] ss:$8 sps:$4 sm:$0xff]   ;;  %v4745_v20 = vld [vmem:[%s6943_s2 + $0x4] ss:$8 sps:$4 sm:$0xff]  }
  0x12   : > { %870 = vmatprep.subr.bf16.mxu1 %v4730_v10  ;;  %v4747_v21 = vld [vmem:[%s6943_s2] ss:$8 sps:$4 sm:$0xff]   ;;  %v4748_v22 = vld [vmem:[%s6943_s2 + $0xf4] ss:$8 sps:$4 sm:$0xff]   ;;  %v4750_v37 = vld [vmem:[%s6943_s2 + $0xf0] ss:$8 sps:$4 sm:$0xff]  }
  0x13   : > { %v4751_v38 = vld [vmem:[%s6943_s2 + $0xe4] ss:$8 sps:$4 sm:$0xff]   ;;  %v4753_v39 = vld [vmem:[%s6943_s2 + $0xe0] ss:$8 sps:$4 sm:$0xff]   ;;  %v4754_v40 = vld [vmem:[%s6943_s2 + $0xd4] ss:$8 sps:$4 sm:$0xff]  }
  0x14   : > { %v4756_v41 = vld [vmem:[%s6943_s2 + $0xd0] ss:$8 sps:$4 sm:$0xff]   ;;  %v4757_v42 = vld [vmem:[%s6943_s2 + $0xc4] ss:$8 sps:$4 sm:$0xff]   ;;  %v4759_v43 = vld [vmem:[%s6943_s2 + $0xc0] ss:$8 sps:$4 sm:$0xff]  }
  0x15   : > { %407 = vadd.xlane.f32.xlu0 %v406_v5  ;;  %871 = vmatpush1.bf16.msra.mxu1 %v4732_v11  ;;  %v4760_v44 = vld [vmem:[%s6943_s2 + $0xb4] ss:$8 sps:$4 sm:$0xff]   ;;  %v4762_v45 = vld [vmem:[%s6943_s2 + $0xb0] ss:$8 sps:$4 sm:$0xff]   ;;  %v4763_v46 = vld [vmem:[%s6943_s2 + $0xa4] ss:$8 sps:$4 sm:$0xff]  }
  0x16   : > { %872 = vmatprep.subr.bf16.mxu1 %v4733_v12  ;;  %v4765_v47 = vld [vmem:[%s6943_s2 + $0xa0] ss:$8 sps:$4 sm:$0xff]   ;;  %v4766_v48 = vld [vmem:[%s6943_s2 + $0x94] ss:$8 sps:$4 sm:$0xff]   ;;  %v4768_v49 = vld [vmem:[%s6943_s2 + $0x90] ss:$8 sps:$4 sm:$0xff]  }
  0x17   : > { %v4769_v50 = vld [vmem:[%s6943_s2 + $0x84] ss:$8 sps:$4 sm:$0xff]   ;;  %v4771_v51 = vld [vmem:[%s6943_s2 + $0x80] ss:$8 sps:$4 sm:$0xff]   ;;  %v5393_v61 = vsub.s32 1, %v5390_v60  ;;  %v5396_v62 = vsub.s32 0, %v5390_v60 }
  0x18   : > { %v4774_v52 = vld [vmem:[%s6942_s1 + $0x4] ss:$8 sps:$4 sm:$0xff]   ;;  %v390_v63 = vld [vmem:[%s6951_s10] sm:$0x3] }
  0x19   : > { %873 = vmatpush1.bf16.msra.mxu1 %v4735_v13  ;;  %548 = vmatprep.mubr.bf16.mxu0 %v4774_v52  ;;  %v444_v3 = vrot.slane %v390_v63, %v5393_v61  ;;  %v440_v5 = vrot.slane %v390_v63, %v5396_v62 }
  0x1a   : > { %874 = vmatprep.subr.bf16.mxu1 %v4736_v14 }
  0x1d   : > { %875 = vmatpush1.bf16.msra.mxu1 %v4738_v15 }
  0x1e   : > { %876 = vmatprep.subr.bf16.mxu1 %v4739_v16 }
  0x21   : > { %877 = vmatpush1.bf16.msra.mxu1 %v4741_v17 }
  0x22   : > { %878 = vmatprep.subr.bf16.mxu1 %v4742_v18 }
  0x25   : > { %879 = vmatpush1.bf16.msra.mxu1 %v4744_v19 }
  0x26   : > { %880 = vmatprep.subr.bf16.mxu1 %v4745_v20 }
  0x29   : > { %881 = vmatpush1.bf16.msra.mxu1 %v4747_v21  ;;  %v4772_v21 = vld [vmem:[%s6942_s1] ss:$8 sps:$4 sm:$0xff]  }
  0x2a   : > { %882 = vmatprep.subr.bf16.mxu1 %v4748_v22  ;;  %v4775_v22 = vld [vmem:[%s6942_s1 + $0x14] ss:$8 sps:$4 sm:$0xff]  }
  0x2d   : > { %883 = vmatpush2.bf16.msra.mxu1 %v4750_v37 }
  0x2e   : > { %884 = vmatprep.subr.bf16.mxu1 %v4751_v38 }
  0x31   : > { %885 = vmatpush2.bf16.msra.mxu1 %v4753_v39 }
  0x32   : > { %886 = vmatprep.subr.bf16.mxu1 %v4754_v40 }
  0x35   : > { %887 = vmatpush2.bf16.msra.mxu1 %v4756_v41 }
  0x36   : > { %888 = vmatprep.subr.bf16.mxu1 %v4757_v42 }
  0x39   : > { %889 = vmatpush2.bf16.msra.mxu1 %v4759_v43 }
  0x3a   : > { %890 = vmatprep.subr.bf16.mxu1 %v4760_v44 }
  0x3d   : > { %891 = vmatpush2.bf16.msra.mxu1 %v4762_v45 }
  0x3e   : > { %892 = vmatprep.subr.bf16.mxu1 %v4763_v46 }
  0x41   : > { %893 = vmatpush2.bf16.msra.mxu1 %v4765_v47 }
  0x42   : > { %894 = vmatprep.subr.bf16.mxu1 %v4766_v48 }
  0x45   : > { %895 = vmatpush2.bf16.msra.mxu1 %v4768_v49 }
  0x46   : > { %896 = vmatprep.subr.bf16.mxu1 %v4769_v50 }
  0x49   : > { %897 = vmatpush2.bf16.msra.mxu1 %v4771_v51 }
  0x9a   : > { %v405_v23 = vpop.xlane.xlu0 %404 }
  0x9b   : > { %v410_v24 = vmul.f32 0.00390625, %v405_v23  ;;  %v4777_v23 = vld [vmem:[%s6942_s1 + $0x10] ss:$8 sps:$4 sm:$0xff]  }
  0x9d   : > { %v5334_v25 = vsub.f32 %v386_v0, %v410_v24  ;;  %v413_v26 = vsub.f32 %v387_v1, %v410_v24  ;;  %v4294_v1 = vld [vmem:[%s6951_s10 + $0x2] sm:$0x3]  ;;  %v4778_v24 = vld [vmem:[%s6942_s1 + $0x24] ss:$8 sps:$4 sm:$0xff]  }
  0x9e   : > { %v408_v27 = vpop.xlane.xlu0 %407  ;;  %v459_v7 = vrot.slane %v4294_v1, %v5393_v61  ;;  %v455_v8 = vrot.slane %v4294_v1, %v5396_v62 }
  0x9f   : > { %v411_v28 = vmul.f32 0.00390625, %v408_v27  ;;  %v416_v29 = vmul.f32 %v5334_v25, %v5334_v25  ;;  %v417_v30 = vmul.f32 %v413_v26, %v413_v26  ;;  %v4783_v27 = vld [vmem:[%s6942_s1 + $0x30] ss:$8 sps:$4 sm:$0xff]  }
  0xa1   : > { %v5338_v31 = vsub.f32 %v388_v2, %v411_v28  ;;  %v415_v32 = vsub.f32 %v389_v4, %v411_v28  ;;  %v420_v33 = vadd.f32 %v417_v30, %v416_v29  ;;  %v5204_v28 = vmov 0.0  }
  0xa3   : > { %421 = vadd.xlane.f32.xlu1 %v420_v33  ;;  %v418_v34 = vmul.f32 %v5338_v31, %v5338_v31  ;;  %v419_v35 = vmul.f32 %v415_v32, %v415_v32 }
  0xa5   : > { %v423_v36 = vadd.f32 %v419_v35, %v418_v34 }
  0xa7   : > { %424 = vadd.xlane.f32.xlu1 %v423_v36 }
 0x12c   : > { %v422_v53 = vpop.xlane.xlu1 %421 }
 0x12d   : > { %v426_v54 = vmul.f32 0.00390625, %v422_v53 }
 0x12f   : > { %v428_v55 = vadd.f32 1e-05, %v426_v54 }
 0x130   : > { %v425_v56 = vpop.xlane.xlu1 %424 }
 0x131   : > { %5072 = vrsqrt.f32 %v428_v55  ;;  %v427_v57 = vmul.f32 0.00390625, %v425_v56 }
 0x133   : > { %v429_v58 = vadd.f32 1e-05, %v427_v57 }
 0x135   : > { %5074 = vrsqrt.f32 %v429_v58 }
 0x13e   : > { %v5073_v0 = vpop.eup %5072 }
 0x13f   : > { %v433_v2 = vmul.f32 %v5073_v0, %v413_v26  ;;  %v432_v4 = vmul.f32 %v5073_v0, %v5334_v25  ;;  %v4780_v25 = vld [vmem:[%s6942_s1 + $0x20] ss:$8 sps:$4 sm:$0xff]   ;;  %v4781_v26 = vld [vmem:[%s6942_s1 + $0x34] ss:$8 sps:$4 sm:$0xff]  }
 0x141   : > { %v448_v10 = vmul.f32 %v444_v3, %v433_v2  ;;  %v447_v12 = vmul.f32 %v440_v5, %v432_v4 }
 0x142   : > { %v5075_v6 = vpop.eup %5074 }
 0x143   : > { %v435_v9 = vmul.f32 %v5075_v6, %v415_v32  ;;  %v434_v11 = vmul.f32 %v5075_v6, %v5338_v31  ;;  %v463_v15 = vadd.f32 %v459_v7, %v448_v10  ;;  %v462_v17 = vadd.f32 %v455_v8, %v447_v12 }
 0x145   : > { %v450_v13 = vmul.f32 %v444_v3, %v435_v9  ;;  %v449_v14 = vmul.f32 %v440_v5, %v434_v11 }
 0x147   : > { %v465_v16 = vadd.f32 %v459_v7, %v450_v13  ;;  %v464_v18 = vadd.f32 %v455_v8, %v449_v14 }
 0x149   : > { %v467_v19 = vpack.c.bf16 %v465_v16, %v463_v15  ;;  %v466_v20 = vpack.c.bf16 %v464_v18, %v462_v17 }
 0x14b   : > { %530 = vmatprep.subr.bf16.mxu0 %v467_v19  ;;  %898 = vmatprep.mubr.bf16.mxu1 %v467_v19 }
 0x14c   : > { %531 = vmatpush1.bf16.xpose.msra.mxu0 %v466_v20  ;;  %899 = vmatmul.mubr.bf16.vlgmr.msra.gmra.mxu1 %v466_v20 }
 0x14d   : > { %4676 = vmatprep.subr.bf16.mxu0 %v5204_v28 }
 0x153   : > { %549 = vmatmul.mubr.bf16.vlgmr.msra.gmra.mxu0 %v4772_v21 }
 0x154   : > { %556 = vmatprep.mubr.bf16.mxu0 %v4775_v22 }
 0x15b   : > { %557 = vmatmul.mubr.bf16.gmra.mxu0 %v4777_v23 }
 0x15c   : > { %564 = vmatprep.mubr.bf16.mxu0 %v4778_v24 }
 0x163   : > { %565 = vmatmul.mubr.bf16.gmra.mxu0 %v4780_v25 }
 0x164   : > { %572 = vmatprep.mubr.bf16.mxu0 %v4781_v26 }
 0x16b   : > { %573 = vmatmul.mubr.bf16.gmra.mxu0 %v4783_v27 }
 0x16c   : > { %4678 = vmatprep.mubr.msk.bf16.mxu0 %vm5205_vm1, %v5204_v28 }
 0x20c   : > { %v900_v29 = vpop.f32.mrf.mxu1 }
 0x20e   : > { %v5432_v30 = vpop.f32.mrf.mxu1 }
 0x210   : > { %v904_v31 = vpop.f32.mrf.mxu1 }
 0x211   : > { %v5434_v32 = vpack.c.bf16 %v904_v31, %v900_v29 }
 0x213   : > { %v550_v33 = vpop.f32.mrf.mxu0  ;;  %4677 = vmatpush3.bf16.msra.mxu0 %v5434_v32 }
 0x214   : > { %v582_v34 = vsel %vm581_vm0, %v550_v33, -inf  ;;  %4682 = vmatprep.subr.bf16.mxu0 %v5204_v28 }
 0x215   : > { %583 = vmax.xlane.f32.xlu0 %v582_v34  ;;  %v552_v35 = vpop.f32.mrf.mxu0 }
 0x217   : > { %v553_v36 = vpop.f32.mrf.mxu0 }
 0x218   : > { %v585_v37 = vsel %vm581_vm0, %v553_v36, -inf }
 0x219   : > { %586 = vmax.xlane.f32.xlu1 %v585_v37  ;;  %v555_v38 = vpop.f32.mrf.mxu0 }
 0x21b   : > { %v558_v39 = vpop.f32.mrf.mxu0 }
 0x21c   : > { %v588_v40 = vsel %vm581_vm0, %v558_v39, -inf }
 0x21d   : > { %589 = vmax.xlane.f32.xlu0 %v588_v40  ;;  %v560_v41 = vpop.f32.mrf.mxu0 }
 0x21f   : > { %v561_v42 = vpop.f32.mrf.mxu0 }
 0x220   : > { %v591_v43 = vsel %vm581_vm0, %v561_v42, -inf }
 0x221   : > { %592 = vmax.xlane.f32.xlu1 %v591_v43  ;;  %v563_v44 = vpop.f32.mrf.mxu0 }
 0x223   : > { %v566_v45 = vpop.f32.mrf.mxu0 }
 0x224   : > { %v594_v46 = vsel %vm581_vm0, %v566_v45, -inf }
 0x225   : > { %595 = vmax.xlane.f32.xlu0 %v594_v46  ;;  %v568_v47 = vpop.f32.mrf.mxu0 }
 0x227   : > { %v569_v48 = vpop.f32.mrf.mxu0 }
 0x228   : > { %v597_v49 = vsel %vm581_vm0, %v569_v48, -inf }
 0x229   : > { %598 = vmax.xlane.f32.xlu1 %v597_v49  ;;  %v571_v50 = vpop.f32.mrf.mxu0 }
 0x22b   : > { %v574_v51 = vpop.f32.mrf.mxu0 }
 0x22c   : > { %v600_v52 = vsel %vm581_vm0, %v574_v51, -inf }
 0x22d   : > { %601 = vmax.xlane.f32.xlu0 %v600_v52  ;;  %v576_v53 = vpop.f32.mrf.mxu0 }
 0x22f   : > { %v577_v54 = vpop.f32.mrf.mxu0 }
 0x230   : > { %v603_v55 = vsel %vm581_vm0, %v577_v54, -inf }
 0x231   : > { %604 = vmax.xlane.f32.xlu1 %v603_v55  ;;  %v579_v56 = vpop.f32.mrf.mxu0 }
 0x29e   : > { %v584_v57 = vpop.xlane.xlu0 %583 }
 0x29f   : > { %v606_v58 = vsub.f32 %v550_v33, %v584_v57 }
 0x2a1   : > { %v614_v59 = vmul.f32 1.442695, %v606_v58 }
 0x2a2   : > { %v587_v63 = vpop.xlane.xlu1 %586 }
 0x2a3   : > { %5076 = vpow2.f32 %v614_v59  ;;  %v607_v0 = vsub.f32 %v553_v36, %v587_v63 }
 0x2a5   : > { %v616_v1 = vmul.f32 1.442695, %v607_v0 }
 0x2a6   : > { %v590_v2 = vpop.xlane.xlu0 %589 }
 0x2a7   : > { %5078 = vpow2.f32 %v616_v1  ;;  %v608_v3 = vsub.f32 %v558_v39, %v590_v2  ;;  %v906_v39 = vpop.f32.mrf.mxu1 }
 0x2a8   : > { %v910_v40 = vpack.c.bf16 %v906_v39, %v5432_v30 }
 0x2a9   : > { %v618_v4 = vmul.f32 1.442695, %v608_v3 }
 0x2aa   : > { %v593_v5 = vpop.xlane.xlu1 %592 }
 0x2ab   : > { %5080 = vpow2.f32 %v618_v4  ;;  %v609_v6 = vsub.f32 %v561_v42, %v593_v5 }
 0x2ad   : > { %v620_v7 = vmul.f32 1.442695, %v609_v6 }
 0x2ae   : > { %v596_v8 = vpop.xlane.xlu0 %595 }
 0x2af   : > { %5082 = vpow2.f32 %v620_v7  ;;  %v610_v9 = vsub.f32 %v566_v45, %v596_v8  ;;  %v4784_v8 = vld [vmem:[%s6944_s3 + $0x70] ss:$8 sps:$4 sm:$0xff]  }
 0x2b0   : > { %v5077_v10 = vpop.eup %5076 }
 0x2b1   : > { %v622_v11 = vmul.f32 1.442695, %v610_v9  ;;  %v630_v12 = vsel %vm581_vm0, %v5077_v10, 0.0  ;;  %v4786_v9 = vld [vmem:[%s6944_s3 + $0x74] ss:$8 sps:$4 sm:$0xff]  }
 0x2b2   : > { %v599_v13 = vpop.xlane.xlu1 %598  ;;  %631 = vadd.xlane.f32.xlu0 %v630_v12  ;;  %v4790_v12 = vld [vmem:[%s6944_s3 + $0x50] ss:$8 sps:$4 sm:$0xff]  }
 0x2b3   : > { %5084 = vpow2.f32 %v622_v11  ;;  %v611_v14 = vsub.f32 %v569_v48, %v599_v13  ;;  %v4792_v11 = vld [vmem:[%s6944_s3 + $0x54] ss:$8 sps:$4 sm:$0xff]   ;;  %v4795_v13 = vld [vmem:[%s6944_s3 + $0x44] ss:$8 sps:$4 sm:$0xff]  }
 0x2b4   : > { %v5079_v15 = vpop.eup %5078 }
 0x2b5   : > { %v624_v16 = vmul.f32 1.442695, %v611_v14  ;;  %v633_v17 = vsel %vm581_vm0, %v5079_v15, 0.0  ;;  %v4793_v14 = vld [vmem:[%s6944_s3 + $0x40] ss:$8 sps:$4 sm:$0xff]  }
 0x2b6   : > { %v602_v18 = vpop.xlane.xlu0 %601  ;;  %634 = vadd.xlane.f32.xlu1 %v633_v17  ;;  %v4801_v17 = vld [vmem:[%s6944_s3 + $0x24] ss:$8 sps:$4 sm:$0xff]  }
 0x2b7   : > { %5086 = vpow2.f32 %v624_v16  ;;  %v612_v19 = vsub.f32 %v574_v51, %v602_v18  ;;  %v4796_v16 = vld [vmem:[%s6944_s3 + $0x30] ss:$8 sps:$4 sm:$0xff]   ;;  %v4799_v18 = vld [vmem:[%s6944_s3 + $0x20] ss:$8 sps:$4 sm:$0xff]  }
 0x2b8   : > { %v5081_v20 = vpop.eup %5080 }
 0x2b9   : > { %v626_v21 = vmul.f32 1.442695, %v612_v19  ;;  %v636_v22 = vsel %vm581_vm0, %v5081_v20, 0.0  ;;  %v4804_v19 = vld [vmem:[%s6944_s3 + $0x14] ss:$8 sps:$4 sm:$0xff]  }
 0x2ba   : > { %637 = vadd.xlane.f32.xlu0 %v636_v22  ;;  %v605_v23 = vpop.xlane.xlu1 %604  ;;  %v4805_v22 = vld [vmem:[%s6944_s3] ss:$8 sps:$4 sm:$0xff]  }
 0x2bb   : > { %5088 = vpow2.f32 %v626_v21  ;;  %v613_v24 = vsub.f32 %v577_v54, %v605_v23  ;;  %v4807_v21 = vld [vmem:[%s6944_s3 + $0x4] ss:$8 sps:$4 sm:$0xff]   ;;  %v4810_v23 = vld [vmem:[%s6944_s3 + $0xf4] ss:$8 sps:$4 sm:$0xff]  }
 0x2bc   : > { %v5083_v25 = vpop.eup %5082 }
 0x2bd   : > { %v628_v26 = vmul.f32 1.442695, %v613_v24  ;;  %v639_v27 = vsel %vm581_vm0, %v5083_v25, 0.0  ;;  %v4808_v24 = vld [vmem:[%s6944_s3 + $0xf0] ss:$8 sps:$4 sm:$0xff]  }
 0x2be   : > { %640 = vadd.xlane.f32.xlu1 %v639_v27  ;;  %v4816_v27 = vld [vmem:[%s6944_s3 + $0xd4] ss:$8 sps:$4 sm:$0xff]  }
 0x2bf   : > { %5090 = vpow2.f32 %v628_v26  ;;  %v4811_v26 = vld [vmem:[%s6944_s3 + $0xe0] ss:$8 sps:$4 sm:$0xff]  }
 0x2c0   : > { %v5085_v29 = vpop.eup %5084 }
 0x2c1   : > { %v642_v31 = vsel %vm581_vm0, %v5085_v29, 0.0 }
 0x2c2   : > { %643 = vadd.xlane.f32.xlu0 %v642_v31  ;;  %v4819_v31 = vld [vmem:[%s6944_s3 + $0xc4] ss:$8 sps:$4 sm:$0xff]  }
 0x2c4   : > { %v5087_v33 = vpop.eup %5086 }
 0x2c5   : > { %v645_v34 = vsel %vm581_vm0, %v5087_v33, 0.0 }
 0x2c6   : > { %646 = vadd.xlane.f32.xlu1 %v645_v34  ;;  %v4822_v34 = vld [vmem:[%s6944_s3 + $0xb4] ss:$8 sps:$4 sm:$0xff]  }
 0x2c8   : > { %v5089_v35 = vpop.eup %5088 }
 0x2c9   : > { %v648_v36 = vsel %vm581_vm0, %v5089_v35, 0.0 }
 0x2ca   : > { %649 = vadd.xlane.f32.xlu0 %v648_v36  ;;  %v4825_v36 = vld [vmem:[%s6944_s3 + $0xa4] ss:$8 sps:$4 sm:$0xff]  }
 0x2cc   : > { %v5091_v37 = vpop.eup %5090 }
 0x2cd   : > { %v651_v38 = vsel %vm581_vm0, %v5091_v37, 0.0 }
 0x2ce   : > { %652 = vadd.xlane.f32.xlu1 %v651_v38 }
 0x2df   : > { %1048 = vrot.lane.b32.xlu1 %v910_v40, %s5206_s22 }
 0x2e0   : > { %956 = vrot.lane.b32.xlu0 %v5434_v32, %s5206_s22 }
 0x33b   : > { %v632_v41 = vpop.xlane.xlu0 %631 }
 0x33c   : > { %5092 = vrcp.f32 %v632_v41 }
 0x33f   : > { %v635_v42 = vpop.xlane.xlu1 %634 }
 0x340   : > { %5094 = vrcp.f32 %v635_v42 }
 0x343   : > { %v638_v43 = vpop.xlane.xlu0 %637 }
 0x344   : > { %5096 = vrcp.f32 %v638_v43 }
 0x347   : > { %v641_v44 = vpop.xlane.xlu1 %640 }
 0x348   : > { %5098 = vrcp.f32 %v641_v44 }
 0x349   : > { %v5093_v45 = vpop.eup %5092 }
 0x34a   : > { %v662_v48 = vmul.f32 %v5093_v45, %v5077_v10  ;;  %v4789_v10 = vld [vmem:[%s6944_s3 + $0x64] ss:$8 sps:$4 sm:$0xff]  }
 0x34b   : > { %v644_v46 = vpop.xlane.xlu0 %643 }
 0x34c   : > { %5100 = vrcp.f32 %v644_v46 }
 0x34d   : > { %v5095_v47 = vpop.eup %5094 }
 0x34e   : > { %v663_v49 = vmul.f32 %v5095_v47, %v5079_v15  ;;  %v4798_v15 = vld [vmem:[%s6944_s3 + $0x34] ss:$8 sps:$4 sm:$0xff]  }
 0x34f   : > { %v647_v30 = vpop.xlane.xlu1 %646 }
 0x350   : > { %v670_v50 = vpack.c.bf16 %v663_v49, %v662_v48  ;;  %5102 = vrcp.f32 %v647_v30  ;;  %v4826_v48 = vld [vmem:[%s6944_s3 + $0x90] ss:$8 sps:$4 sm:$0xff]   ;;  %v4828_v49 = vld [vmem:[%s6944_s3 + $0x94] ss:$8 sps:$4 sm:$0xff]  }
 0x351   : > { %v5097_v32 = vpop.eup %5096 }
 0x352   : > { %4679 = vmatmul.mubr.msk.bf16.vlgmr.msra.gmra.mxu0 %vm581_vm0, %v670_v50  ;;  %v664_v53 = vmul.f32 %v5097_v32, %v5081_v20  ;;  %v4802_v20 = vld [vmem:[%s6944_s3 + $0x10] ss:$8 sps:$4 sm:$0xff]   ;;  %v4831_v32 = vld [vmem:[%s6944_s3 + $0x84] ss:$8 sps:$4 sm:$0xff]  }
 0x353   : > { %v650_v51 = vpop.xlane.xlu0 %649  ;;  %4684 = vmatprep.mubr.msk.bf16.mxu0 %vm5205_vm1, %v5204_v28 }
 0x354   : > { %5104 = vrcp.f32 %v650_v51  ;;  %v4829_v51 = vld [vmem:[%s6944_s3 + $0x80] ss:$8 sps:$4 sm:$0xff]  }
 0x355   : > { %v5099_v52 = vpop.eup %5098 }
 0x356   : > { %v665_v54 = vmul.f32 %v5099_v52, %v5083_v25  ;;  %v4813_v25 = vld [vmem:[%s6944_s3 + $0xe4] ss:$8 sps:$4 sm:$0xff]  }
 0x357   : > { %v957_v55 = vpop.permute.xlu0 %956  ;;  %v653_v56 = vpop.xlane.xlu1 %652 }
 0x358   : > { %5106 = vrcp.f32 %v653_v56  ;;  %4683 = vmatpush3.bf16.msra.mxu0 %v957_v55  ;;  %v671_v57 = vpack.c.bf16 %v665_v54, %v664_v53 }
 0x359   : > { %4688 = vmatprep.subr.bf16.mxu0 %v5204_v28  ;;  %v5101_v58 = vpop.eup %5100 }
 0x35a   : > { %v666_v63 = vmul.f32 %v5101_v58, %v5085_v29  ;;  %v4814_v29 = vld [vmem:[%s6944_s3 + $0xd0] ss:$8 sps:$4 sm:$0xff]  }
 0x35b   : > { %4685 = vmatmul.mubr.msk.bf16.vlgmr.msra.gmra.mxu0 %vm581_vm0, %v671_v57  ;;  %v1049_v3 = vpop.permute.xlu1 %1048 }
 0x35c   : > { %4689 = vmatpush3.bf16.msra.mxu0 %v910_v40  ;;  %4690 = vmatprep.mubr.msk.bf16.mxu0 %vm5205_vm1, %v5204_v28 }
 0x35d   : > { %v5103_v59 = vpop.eup %5102  ;;  %4694 = vmatprep.subr.bf16.mxu0 %v5204_v28 }
 0x35e   : > { %v667_v0 = vmul.f32 %v5103_v59, %v5087_v33  ;;  %v4817_v33 = vld [vmem:[%s6944_s3 + $0xc0] ss:$8 sps:$4 sm:$0xff]  }
 0x360   : > { %v672_v1 = vpack.c.bf16 %v667_v0, %v666_v63 }
 0x361   : > { %v5105_v2 = vpop.eup %5104 }
 0x362   : > { %v668_v5 = vmul.f32 %v5105_v2, %v5089_v35  ;;  %v4820_v35 = vld [vmem:[%s6944_s3 + $0xb0] ss:$8 sps:$4 sm:$0xff]  }
 0x363   : > { %4691 = vmatmul.mubr.msk.bf16.vlgmr.msra.gmra.mxu0 %vm581_vm0, %v672_v1 }
 0x364   : > { %4695 = vmatpush3.bf16.msra.mxu0 %v1049_v3  ;;  %4696 = vmatprep.mubr.msk.bf16.mxu0 %vm5205_vm1, %v5204_v28  ;;  %v4787_v28 = vld [vmem:[%s6944_s3 + $0x60] ss:$8 sps:$4 sm:$0xff]  }
 0x365   : > { %v5107_v4 = vpop.eup %5106  ;;  %1321 = vmatprep.subr.bf16.mxu0 %v4786_v9  ;;  %v4297_v9 = vld [vmem:[%s6951_s10 + $0x8] sm:$0x3] }
 0x366   : > { %v669_v6 = vmul.f32 %v5107_v4, %v5091_v37  ;;  %v4823_v37 = vld [vmem:[%s6944_s3 + $0xa0] ss:$8 sps:$4 sm:$0xff]  }
 0x368   : > { %v673_v7 = vpack.c.bf16 %v669_v6, %v668_v5 }
 0x36b   : > { %4697 = vmatmul.mubr.msk.bf16.vlgmr.msra.gmra.mxu0 %vm581_vm0, %v673_v7 }
 0x36c   : > { %1322 = vmatpush1.bf16.msra.mxu0 %v4784_v8 }
 0x36d   : > { %1323 = vmatprep.subr.bf16.mxu0 %v4789_v10  ;;  %v1154_v10 = vrot.slane %v4297_v9, %v5396_v62 }
 0x370   : > { %1324 = vmatpush1.bf16.msra.mxu0 %v4787_v28  ;;  %v1158_v28 = vrot.slane %v4297_v9, %v5393_v61  ;;  %v1437_v9 = vld [vmem:[%s6945_s4 + $0x48] sm:$0xff] }
 0x371   : > { %1325 = vmatprep.subr.bf16.mxu0 %v4792_v11 }
 0x374   : > { %1326 = vmatpush1.bf16.msra.mxu0 %v4790_v12 }
 0x375   : > { %1327 = vmatprep.subr.bf16.mxu0 %v4795_v13 }
 0x378   : > { %1328 = vmatpush1.bf16.msra.mxu0 %v4793_v14 }
 0x379   : > { %1329 = vmatprep.subr.bf16.mxu0 %v4798_v15 }
 0x37c   : > { %1330 = vmatpush1.bf16.msra.mxu0 %v4796_v16 }
 0x37d   : > { %1331 = vmatprep.subr.bf16.mxu0 %v4801_v17 }
 0x380   : > { %1332 = vmatpush1.bf16.msra.mxu0 %v4799_v18 }
 0x381   : > { %1333 = vmatprep.subr.bf16.mxu0 %v4804_v19 }
 0x384   : > { %1334 = vmatpush1.bf16.msra.mxu0 %v4802_v20 }
 0x385   : > { %1335 = vmatprep.subr.bf16.mxu0 %v4807_v21  ;;  %v1484_v21 = vld [vmem:[%s6945_s4 + $0x1c0] sm:$0xff] }
 0x388   : > { %1336 = vmatpush1.bf16.msra.mxu0 %v4805_v22  ;;  %v1488_v22 = vld [vmem:[%s6945_s4 + $0x1e0] sm:$0xff] }
 0x389   : > { %1337 = vmatprep.subr.bf16.mxu0 %v4810_v23  ;;  %v1485_v23 = vld [vmem:[%s6945_s4 + $0x1c8] sm:$0xff] }
 0x38c   : > { %1338 = vmatpush2.bf16.msra.mxu0 %v4808_v24  ;;  %v4432_v24 = vcombine.low %v1484_v21, %v1488_v22 }
 0x38d   : > { %1339 = vmatprep.subr.bf16.mxu0 %v4813_v25  ;;  %v4433_v25 = vcombine.high %v1484_v21, %v1488_v22  ;;  %v1433_v21 = vld [vmem:[%s6945_s4 + $0x28] sm:$0xff] }
 0x38f   : > { %2238 = vmatprep.subr.bf16.mxu1 %v4433_v25 }
 0x390   : > { %1340 = vmatpush2.bf16.msra.mxu0 %v4811_v26  ;;  %v1489_v26 = vld [vmem:[%s6945_s4 + $0x1e8] sm:$0xff]  ;;  %2239 = vmatpush1.bf16.msra.mxu1 %v4432_v24 }
 0x391   : > { %1341 = vmatprep.subr.bf16.mxu0 %v4816_v27  ;;  %v1476_v27 = vld [vmem:[%s6945_s4 + $0x180] sm:$0xff] }
 0x394   : > { %1342 = vmatpush2.bf16.msra.mxu0 %v4814_v29  ;;  %v1480_v29 = vld [vmem:[%s6945_s4 + $0x1a0] sm:$0xff] }
 0x395   : > { %1343 = vmatprep.subr.bf16.mxu0 %v4819_v31  ;;  %v4434_v31 = vcombine.low %v1485_v23, %v1489_v26 }
 0x398   : > { %1344 = vmatpush2.bf16.msra.mxu0 %v4817_v33  ;;  %v4435_v33 = vcombine.high %v1485_v23, %v1489_v26  ;;  %v1548_v26 = vld [vmem:[%s6945_s4 + $0x3c0] sm:$0xff] }
 0x399   : > { %1345 = vmatprep.subr.bf16.mxu0 %v4822_v34  ;;  %v4425_v34 = vcombine.high %v1476_v27, %v1480_v29 }
 0x39b   : > { %2240 = vmatprep.subr.bf16.mxu1 %v4425_v34 }
 0x39c   : > { %1346 = vmatpush2.bf16.msra.mxu0 %v4820_v35  ;;  %v1477_v35 = vld [vmem:[%s6945_s4 + $0x188] sm:$0xff] }
 0x39d   : > { %1347 = vmatprep.subr.bf16.mxu0 %v4825_v36  ;;  %v1481_v36 = vld [vmem:[%s6945_s4 + $0x1a8] sm:$0xff] }
 0x3a0   : > { %1348 = vmatpush2.bf16.msra.mxu0 %v4823_v37  ;;  %v1468_v37 = vld [vmem:[%s6945_s4 + $0x140] sm:$0xff] }
 0x3a1   : > { %1349 = vmatprep.subr.bf16.mxu0 %v4828_v49  ;;  %v1465_v49 = vld [vmem:[%s6945_s4 + $0x128] sm:$0xff] }
 0x3a4   : > { %1350 = vmatpush2.bf16.msra.mxu0 %v4826_v48  ;;  %v1461_v48 = vld [vmem:[%s6945_s4 + $0x108] sm:$0xff] }
 0x3a5   : > { %1351 = vmatprep.subr.bf16.mxu0 %v4831_v32 }
 0x3a8   : > { %1352 = vmatpush2.bf16.msra.mxu0 %v4829_v51  ;;  %v4411_v51 = vcombine.high %v1461_v48, %v1465_v49 }
 0x3a9   : > { %2281 = vmatprep.subr.bf16.mxu0 %v4435_v33 }
 0x412   : > { %v948_v38 = vpop.f32.mrf.mxu0 }
 0x414   : > { %v4680_v39 = vpop.f32.mrf.mxu0 }
 0x415   : > { %v1472_v39 = vld [vmem:[%s6945_s4 + $0x160] sm:$0xff] }
 0x416   : > { %v951_v40 = vpop.f32.mrf.mxu0 }
 0x418   : > { %v4681_v41 = vpop.f32.mrf.mxu0 }
 0x419   : > { %v1473_v41 = vld [vmem:[%s6945_s4 + $0x168] sm:$0xff] }
 0x41b   : > { %v996_v42 = vpop.f32.mrf.mxu0 }
 0x41d   : > { %v4686_v43 = vpop.f32.mrf.mxu0 }
 0x41e   : > { %v4426_v43 = vcombine.low %v1477_v35, %v1481_v36 }
 0x41f   : > { %v999_v44 = vpop.f32.mrf.mxu0 }
 0x420   : > { %v4718_v57 = vpack.i.bf16 %v999_v44, %v996_v42  ;;  %v4424_v42 = vcombine.low %v1476_v27, %v1480_v29  ;;  %v4417_v44 = vcombine.high %v1468_v37, %v1472_v39  ;;  %v1552_v27 = vld [vmem:[%s6945_s4 + $0x3e0] sm:$0xff]  ;;  %v1549_v29 = vld [vmem:[%s6945_s4 + $0x3c8] sm:$0xff] }
 0x421   : > { %v4687_v45 = vpop.f32.mrf.mxu0 }
 0x422   : > { %2241 = vmatpush1.bf16.msra.mxu1 %v4424_v42 }
 0x423   : > { %v1040_v46 = vpop.f32.mrf.mxu0  ;;  %2242 = vmatprep.subr.bf16.mxu1 %v4417_v44 }
 0x425   : > { %v4692_v47 = vpop.f32.mrf.mxu0 }
 0x426   : > { %v1464_v47 = vld [vmem:[%s6945_s4 + $0x120] sm:$0xff] }
 0x427   : > { %v1043_v30 = vpop.f32.mrf.mxu0 }
 0x429   : > { %v4693_v50 = vpop.f32.mrf.mxu0 }
 0x42b   : > { %v1088_v52 = vpop.f32.mrf.mxu0 }
 0x42d   : > { %v4698_v53 = vpop.f32.mrf.mxu0 }
 0x42e   : > { %v1456_v53 = vld [vmem:[%s6945_s4 + $0xe0] sm:$0xff] }
 0x42f   : > { %v1091_v54 = vpop.f32.mrf.mxu0 }
 0x430   : > { %v4713_v55 = vpack.i.bf16 %v1091_v54, %v1088_v52  ;;  %v1452_v52 = vld [vmem:[%s6945_s4 + $0xc0] sm:$0xff]  ;;  %v1453_v54 = vld [vmem:[%s6945_s4 + $0xc8] sm:$0xff] }
 0x431   : > { %v4699_v56 = vpop.f32.mrf.mxu0 }
 0x432   : > { %4714 = vrot.lane.b32.xlu1 %v4713_v55, %s5206_s22  ;;  %v1457_v55 = vld [vmem:[%s6945_s4 + $0xe8] sm:$0xff] }
 0x436   : > { %4719 = vrot.lane.b32.xlu1 %v4718_v57, %s5206_s22  ;;  %v4410_v57 = vcombine.low %v1461_v48, %v1465_v49 }
 0x4a4   : > { %v4715_v58 = vpop.permute.xlu1 %4714 }
 0x4a5   : > { %v4717_v59 = vunpack.i.h.bf16 %v4715_v58  ;;  %v4716_v63 = vunpack.i.l.bf16 %v4715_v58  ;;  %v4401_v58 = vcombine.high %v1452_v52, %v1456_v53 }
 0x4a7   : > { %v1114_v0 = vsel %vm1111_vm2, %v1040_v46, %v4716_v63  ;;  %v1115_v1 = vsel %vm1111_vm2, %v1043_v30, %v4717_v59  ;;  %v1460_v46 = vld [vmem:[%s6945_s4 + $0x100] sm:$0xff]  ;;  %v4416_v30 = vcombine.low %v1468_v37, %v1472_v39  ;;  %v4403_v59 = vcombine.high %v1453_v54, %v1457_v55 }
 0x4a8   : > { %v4720_v2 = vpop.permute.xlu1 %4719  ;;  %v1117_v3 = vpack.c.bf16 %v1115_v1, %v1114_v0  ;;  %v4409_v32 = vcombine.high %v1460_v46, %v1464_v47  ;;  %v4408_v56 = vcombine.low %v1460_v46, %v1464_v47  ;;  %v1444_v63 = vld [vmem:[%s6945_s4 + $0x80] sm:$0xff]  ;;  %v1445_v1 = vld [vmem:[%s6945_s4 + $0x88] sm:$0xff]  ;;  %v4496_v37 = vcombine.low %v1548_v26, %v1552_v27 }
 0x4a9   : > { %v4722_v4 = vunpack.i.h.bf16 %v4720_v2  ;;  %v4721_v5 = vunpack.i.l.bf16 %v4720_v2  ;;  %2243 = vmatpush1.bf16.msra.mxu1 %v4416_v30  ;;  %v1448_v0 = vld [vmem:[%s6945_s4 + $0xa0] sm:$0xff]  ;;  %v1449_v2 = vld [vmem:[%s6945_s4 + $0xa8] sm:$0xff] }
 0x4aa   : > { %1353 = vmatprep.mubr.bf16.mxu0 %v1117_v3  ;;  %2244 = vmatprep.subr.bf16.mxu1 %v4409_v32  ;;  %v4400_v3 = vcombine.low %v1452_v52, %v1456_v53  ;;  %v1544_v52 = vld [vmem:[%s6945_s4 + $0x3a0] sm:$0xff]  ;;  %v1541_v53 = vld [vmem:[%s6945_s4 + $0x388] sm:$0xff] }
 0x4ab   : > { %v1113_v6 = vsel %vm1111_vm2, %v951_v40, %v4722_v4  ;;  %v1112_v7 = vsel %vm1111_vm2, %v948_v38, %v4721_v5  ;;  %v4427_v38 = vcombine.high %v1477_v35, %v1481_v36  ;;  %v1469_v40 = vld [vmem:[%s6945_s4 + $0x148] sm:$0xff]  ;;  %v4402_v4 = vcombine.low %v1453_v54, %v1457_v55 }
 0x4ac   : > { %v1116_v8 = vpack.c.bf16 %v1113_v6, %v1112_v7  ;;  %v4419_v45 = vcombine.high %v1469_v40, %v1473_v41  ;;  %v4418_v50 = vcombine.low %v1469_v40, %v1473_v41  ;;  %v4393_v5 = vcombine.high %v1444_v63, %v1448_v0  ;;  %v1436_v7 = vld [vmem:[%s6945_s4 + $0x40] sm:$0xff]  ;;  %v1545_v55 = vld [vmem:[%s6945_s4 + $0x3a8] sm:$0xff] }
 0x4ad   : > { %2245 = vmatpush1.bf16.msra.mxu1 %v4408_v56  ;;  %v4395_v6 = vcombine.high %v1445_v1, %v1449_v2  ;;  %v4497_v35 = vcombine.high %v1548_v26, %v1552_v27  ;;  %v1513_v26 = vld [vmem:[%s6945_s4 + $0x2a8] sm:$0xff] }
 0x4ae   : > { %1354 = vmatmul.mubr.bf16.vlgmr.msra.gmra.mxu0 %v1116_v8  ;;  %2246 = vmatprep.subr.bf16.mxu1 %v4401_v58  ;;  %v1440_v8 = vld [vmem:[%s6945_s4 + $0x60] sm:$0xff]  ;;  %v4491_v58 = vcombine.high %v1541_v53, %v1545_v55 }
 0x4af   : > { %2282 = vmatpush1.bf16.msra.mxu0 %v4434_v31  ;;  %v4384_v22 = vcombine.low %v1436_v7, %v1440_v8  ;;  %v1553_v31 = vld [vmem:[%s6945_s4 + $0x3e8] sm:$0xff] }
 0x4b0   : > { %2283 = vmatprep.subr.bf16.mxu0 %v4427_v38  ;;  %v4499_v36 = vcombine.high %v1549_v29, %v1553_v31  ;;  %v4498_v38 = vcombine.low %v1549_v29, %v1553_v31 }
 0x4b1   : > { %2247 = vmatpush1.bf16.msra.mxu1 %v4400_v3 }
 0x4b2   : > { %2248 = vmatprep.subr.bf16.mxu1 %v4393_v5 }
 0x4b3   : > { %2284 = vmatpush1.bf16.msra.mxu0 %v4426_v43 }
 0x4b4   : > { %2285 = vmatprep.subr.bf16.mxu0 %v4419_v45 }
 0x4b7   : > { %2286 = vmatpush1.bf16.msra.mxu0 %v4418_v50 }
 0x4b8   : > { %2287 = vmatprep.subr.bf16.mxu0 %v4411_v51  ;;  %v1540_v51 = vld [vmem:[%s6945_s4 + $0x380] sm:$0xff] }
 0x4b9   : > { %v4489_v54 = vcombine.high %v1540_v51, %v1544_v52  ;;  %v4488_v56 = vcombine.low %v1540_v51, %v1544_v52 }
 0x4bb   : > { %2288 = vmatpush1.bf16.msra.mxu0 %v4410_v57  ;;  %v4490_v57 = vcombine.low %v1541_v53, %v1545_v55  ;;  %v1490_v55 = vld [vmem:[%s6945_s4 + $0x1f0] sm:$0xff] }
 0x4bc   : > { %2289 = vmatprep.subr.bf16.mxu0 %v4403_v59  ;;  %v1532_v59 = vld [vmem:[%s6945_s4 + $0x340] sm:$0xff] }
 0x4bf   : > { %2290 = vmatpush1.bf16.msra.mxu0 %v4402_v4 }
 0x4c0   : > { %2291 = vmatprep.subr.bf16.mxu0 %v4395_v6  ;;  %v1524_v6 = vld [vmem:[%s6945_s4 + $0x300] sm:$0xff] }
 0x56e   : > { %v1355_v11 = vpop.f32.mrf.mxu0 }
 0x56f   : > { %v5575_v13 = vadd.f32 %v1355_v11, %v1154_v10  ;;  %v4394_v11 = vcombine.low %v1445_v1, %v1449_v2  ;;  %v1537_v2 = vld [vmem:[%s6945_s4 + $0x368] sm:$0xff] }
 0x570   : > { %v1357_v12 = vpop.f32.mrf.mxu0 }
 0x571   : > { %v5577_v14 = vadd.f32 %v1357_v12, %v1158_v28  ;;  %v4385_v12 = vcombine.high %v1436_v7, %v1440_v8  ;;  %2292 = vmatpush1.bf16.msra.mxu0 %v4394_v11  ;;  %v1528_v7 = vld [vmem:[%s6945_s4 + $0x320] sm:$0xff]  ;;  %v1525_v8 = vld [vmem:[%s6945_s4 + $0x308] sm:$0xff] }
 0x572   : > { %v1359_v15 = vpop.f32.mrf.mxu0  ;;  %v1516_v11 = vld [vmem:[%s6945_s4 + $0x2c0] sm:$0xff] }
 0x573   : > { %v1364_v16 = vadd.f32 %v5577_v14, %v5575_v13  ;;  %v5581_v18 = vadd.f32 %v1359_v15, %v1154_v10  ;;  %v1441_v10 = vld [vmem:[%s6945_s4 + $0x68] sm:$0xff] }
 0x574   : > { %v1361_v17 = vpop.f32.mrf.mxu0  ;;  %v4387_v15 = vcombine.high %v1437_v9, %v1441_v10  ;;  %v4386_v23 = vcombine.low %v1437_v9, %v1441_v10  ;;  %v4472_v9 = vcombine.low %v1524_v6, %v1528_v7  ;;  %v4473_v10 = vcombine.high %v1524_v6, %v1528_v7  ;;  %v4295_v7 = vld [vmem:[%s6951_s10 + $0x4] sm:$0x3] }
 0x575   : > { %v5583_v19 = vadd.f32 %v1361_v17, %v1158_v28  ;;  %1365 = vadd.xlane.f32.xlu0 %v1364_v16  ;;  %v4392_v28 = vcombine.low %v1444_v63, %v1448_v0  ;;  %v1428_v16 = vld [vmem:[%s6945_s4] sm:$0xff]  ;;  %v1533_v0 = vld [vmem:[%s6945_s4 + $0x348] sm:$0xff] }
 0x576   : > { %v1432_v17 = vld [vmem:[%s6945_s4 + $0x20] sm:$0xff]  ;;  %2293 = vmatprep.subr.bf16.mxu0 %v4387_v15  ;;  %v4482_v4 = vcombine.low %v1533_v0, %v1537_v2  ;;  %v4483_v5 = vcombine.high %v1533_v0, %v1537_v2 }
 0x577   : > { %v1367_v20 = vadd.f32 %v5583_v19, %v5581_v18  ;;  %2249 = vmatpush1.bf16.msra.mxu1 %v4392_v28  ;;  %v4377_v24 = vcombine.high %v1428_v16, %v1432_v17  ;;  %v4376_v33 = vcombine.low %v1428_v16, %v1432_v17  ;;  %2294 = vmatpush1.bf16.msra.mxu0 %v4386_v23  ;;  %v1536_v63 = vld [vmem:[%s6945_s4 + $0x360] sm:$0xff]  ;;  %v1529_v28 = vld [vmem:[%s6945_s4 + $0x328] sm:$0xff] }
 0x578   : > { %2250 = vmatprep.subr.bf16.mxu1 %v4385_v12  ;;  %v4481_v1 = vcombine.high %v1532_v59, %v1536_v63  ;;  %v4480_v3 = vcombine.low %v1532_v59, %v1536_v63  ;;  %v1520_v12 = vld [vmem:[%s6945_s4 + $0x2e0] sm:$0xff]  ;;  %v4474_v15 = vcombine.low %v1525_v8, %v1529_v28  ;;  %v4475_v16 = vcombine.high %v1525_v8, %v1529_v28 }
 0x579   : > { %1368 = vadd.xlane.f32.xlu1 %v1367_v20  ;;  %v1429_v20 = vld [vmem:[%s6945_s4 + $0x8] sm:$0xff]  ;;  %v4465_v17 = vcombine.high %v1516_v11, %v1520_v12  ;;  %v4464_v27 = vcombine.low %v1516_v11, %v1520_v12  ;;  %v1404_v28 = vrot.slane %v4295_v7, %v5393_v61  ;;  %v1400_v12 = vrot.slane %v4295_v7, %v5396_v62 }
 0x57a   : > { %v4379_v25 = vcombine.high %v1429_v20, %v1433_v21  ;;  %v4378_v34 = vcombine.low %v1429_v20, %v1433_v21  ;;  %v1517_v20 = vld [vmem:[%s6945_s4 + $0x2c8] sm:$0xff] }
 0x57b   : > { %2251 = vmatpush1.bf16.msra.mxu1 %v4384_v22  ;;  %v1521_v21 = vld [vmem:[%s6945_s4 + $0x2e8] sm:$0xff]  ;;  %v1508_v22 = vld [vmem:[%s6945_s4 + $0x280] sm:$0xff] }
 0x57c   : > { %2252 = vmatprep.subr.bf16.mxu1 %v4377_v24  ;;  %2295 = vmatprep.subr.bf16.mxu0 %v4379_v25  ;;  %v4467_v23 = vcombine.high %v1517_v20, %v1521_v21  ;;  %v1512_v24 = vld [vmem:[%s6945_s4 + $0x2a0] sm:$0xff]  ;;  %v1509_v25 = vld [vmem:[%s6945_s4 + $0x288] sm:$0xff]  ;;  %v4466_v29 = vcombine.low %v1517_v20, %v1521_v21 }
 0x57d   : > { %2296 = vmatpush1.bf16.msra.mxu0 %v4378_v34  ;;  %v4457_v31 = vcombine.high %v1508_v22, %v1512_v24  ;;  %v1500_v34 = vld [vmem:[%s6945_s4 + $0x240] sm:$0xff] }
 0x57e   : > { %2297 = vmatprep.subr.bf16.mxu0 %v4499_v36  ;;  %v1501_v36 = vld [vmem:[%s6945_s4 + $0x248] sm:$0xff] }
 0x57f   : > { %2253 = vmatpush1.bf16.msra.mxu1 %v4376_v33  ;;  %v4459_v33 = vcombine.high %v1509_v25, %v1513_v26 }
 0x580   : > { %2254 = vmatprep.subr.bf16.mxu1 %v4497_v35  ;;  %v1504_v35 = vld [vmem:[%s6945_s4 + $0x260] sm:$0xff] }
 0x581   : > { %2298 = vmatpush2.bf16.msra.mxu0 %v4498_v38  ;;  %v4456_v38 = vcombine.low %v1508_v22, %v1512_v24 }
 0x582   : > { %2299 = vmatprep.subr.bf16.mxu0 %v4491_v58  ;;  %v1491_v58 = vld [vmem:[%s6945_s4 + $0x1f8] sm:$0xff] }
 0x583   : > { %2255 = vmatpush2.bf16.msra.mxu1 %v4496_v37  ;;  %v1505_v37 = vld [vmem:[%s6945_s4 + $0x268] sm:$0xff] }
 0x584   : > { %2256 = vmatprep.subr.bf16.mxu1 %v4489_v54  ;;  %v1486_v54 = vld [vmem:[%s6945_s4 + $0x1d0] sm:$0xff] }
 0x585   : > { %2300 = vmatpush2.bf16.msra.mxu0 %v4490_v57  ;;  %v4437_v57 = vcombine.high %v1486_v54, %v1490_v55  ;;  %v4436_v59 = vcombine.low %v1486_v54, %v1490_v55  ;;  %v1454_v55 = vld [vmem:[%s6945_s4 + $0xd0] sm:$0xff] }
 0x586   : > { %2301 = vmatprep.subr.bf16.mxu0 %v4483_v5 }
 0x587   : > { %2257 = vmatpush2.bf16.msra.mxu1 %v4488_v56  ;;  %v1487_v56 = vld [vmem:[%s6945_s4 + $0x1d8] sm:$0xff] }
 0x588   : > { %2258 = vmatprep.subr.bf16.mxu1 %v4481_v1  ;;  %v4438_v63 = vcombine.low %v1487_v56, %v1491_v58  ;;  %v4439_v0 = vcombine.high %v1487_v56, %v1491_v58  ;;  %v1458_v56 = vld [vmem:[%s6945_s4 + $0xf0] sm:$0xff]  ;;  %v1459_v58 = vld [vmem:[%s6945_s4 + $0xf8] sm:$0xff] }
 0x589   : > { %2302 = vmatpush2.bf16.msra.mxu0 %v4482_v4 }
 0x58a   : > { %2303 = vmatprep.subr.bf16.mxu0 %v4475_v16 }
 0x58b   : > { %2259 = vmatpush2.bf16.msra.mxu1 %v4480_v3 }
 0x58c   : > { %2260 = vmatprep.subr.bf16.mxu1 %v4473_v10 }
 0x58d   : > { %2304 = vmatpush2.bf16.msra.mxu0 %v4474_v15 }
 0x58e   : > { %2305 = vmatprep.subr.bf16.mxu0 %v4467_v23 }
 0x58f   : > { %2261 = vmatpush2.bf16.msra.mxu1 %v4472_v9  ;;  %v4296_v9 = vld [vmem:[%s6951_s10 + $0x6] sm:$0x3] }
 0x590   : > { %2262 = vmatprep.subr.bf16.mxu1 %v4465_v17  ;;  %v1419_v16 = vrot.slane %v4296_v9, %v5393_v61  ;;  %v1415_v17 = vrot.slane %v4296_v9, %v5396_v62 }
 0x591   : > { %2306 = vmatpush2.bf16.msra.mxu0 %v4466_v29 }
 0x592   : > { %2307 = vmatprep.subr.bf16.mxu0 %v4459_v33 }
 0x593   : > { %2263 = vmatpush2.bf16.msra.mxu1 %v4464_v27 }
 0x594   : > { %2264 = vmatprep.subr.bf16.mxu1 %v4457_v31  ;;  %v1482_v31 = vld [vmem:[%s6945_s4 + $0x1b0] sm:$0xff] }
 0x597   : > { %2265 = vmatpush2.bf16.msra.mxu1 %v4456_v38  ;;  %v1474_v38 = vld [vmem:[%s6945_s4 + $0x170] sm:$0xff] }
 0x5fe   : > { %v1366_v39 = vpop.xlane.xlu0 %1365 }
 0x5ff   : > { %v1370_v40 = vmul.f32 0.00390625, %v1366_v39  ;;  %v4458_v39 = vcombine.low %v1509_v25, %v1513_v26 }
 0x601   : > { %v5696_v41 = vsub.f32 %v5575_v13, %v1370_v40  ;;  %v5699_v42 = vsub.f32 %v5577_v14, %v1370_v40  ;;  %v4449_v40 = vcombine.high %v1500_v34, %v1504_v35  ;;  %2308 = vmatpush2.bf16.msra.mxu0 %v4458_v39  ;;  %v1471_v39 = vld [vmem:[%s6945_s4 + $0x158] sm:$0xff] }
 0x602   : > { %v1369_v43 = vpop.xlane.xlu1 %1368 }
 0x603   : > { %v1371_v44 = vmul.f32 0.00390625, %v1369_v43  ;;  %v1376_v45 = vmul.f32 %v5696_v41, %v5696_v41  ;;  %v1377_v46 = vmul.f32 %v5699_v42, %v5699_v42  ;;  %v4451_v43 = vcombine.high %v1501_v36, %v1505_v37  ;;  %2266 = vmatprep.subr.bf16.mxu1 %v4449_v40  ;;  %v1475_v40 = vld [vmem:[%s6945_s4 + $0x178] sm:$0xff] }
 0x605   : > { %v5706_v47 = vsub.f32 %v5581_v18, %v1371_v44  ;;  %v5709_v48 = vsub.f32 %v5583_v19, %v1371_v44  ;;  %v1380_v49 = vadd.f32 %v1377_v46, %v1376_v45  ;;  %v1492_v44 = vld [vmem:[%s6945_s4 + $0x200] sm:$0xff]  ;;  %v1493_v46 = vld [vmem:[%s6945_s4 + $0x208] sm:$0xff]  ;;  %2309 = vmatprep.subr.bf16.mxu0 %v4451_v43 }
 0x606   : > { %v1496_v45 = vld [vmem:[%s6945_s4 + $0x220] sm:$0xff] }
 0x607   : > { %1381 = vadd.xlane.f32.xlu0 %v1380_v49  ;;  %v1378_v30 = vmul.f32 %v5706_v47, %v5706_v47  ;;  %v1379_v50 = vmul.f32 %v5709_v48, %v5709_v48  ;;  %v1497_v49 = vld [vmem:[%s6945_s4 + $0x228] sm:$0xff]  ;;  %v4440_v52 = vcombine.low %v1492_v44, %v1496_v45 }
 0x608   : > { %v4443_v51 = vcombine.high %v1493_v46, %v1497_v49  ;;  %v4442_v53 = vcombine.low %v1493_v46, %v1497_v49  ;;  %v4423_v46 = vcombine.high %v1471_v39, %v1475_v40  ;;  %v1462_v49 = vld [vmem:[%s6945_s4 + $0x110] sm:$0xff] }
 0x609   : > { %v1383_v32 = vadd.f32 %v1379_v50, %v1378_v30  ;;  %v4448_v30 = vcombine.low %v1500_v34, %v1504_v35  ;;  %v4450_v50 = vcombine.low %v1501_v36, %v1505_v37  ;;  %v1470_v35 = vld [vmem:[%s6945_s4 + $0x150] sm:$0xff] }
 0x60b   : > { %1384 = vadd.xlane.f32.xlu0 %v1383_v32  ;;  %v4441_v32 = vcombine.high %v1492_v44, %v1496_v45  ;;  %2267 = vmatpush2.bf16.msra.mxu1 %v4448_v30  ;;  %v4421_v45 = vcombine.high %v1470_v35, %v1474_v38  ;;  %v1466_v30 = vld [vmem:[%s6945_s4 + $0x130] sm:$0xff] }
 0x60c   : > { %2310 = vmatpush2.bf16.msra.mxu0 %v4450_v50  ;;  %v1463_v50 = vld [vmem:[%s6945_s4 + $0x118] sm:$0xff] }
 0x60d   : > { %2268 = vmatprep.subr.bf16.mxu1 %v4441_v32  ;;  %2311 = vmatprep.subr.bf16.mxu0 %v4443_v51  ;;  %v1467_v32 = vld [vmem:[%s6945_s4 + $0x138] sm:$0xff]  ;;  %v4420_v51 = vcombine.low %v1470_v35, %v1474_v38  ;;  %v1546_v38 = vld [vmem:[%s6945_s4 + $0x3b0] sm:$0xff] }
 0x60e   : > { %v4415_v54 = vcombine.high %v1463_v50, %v1467_v32 }
 0x60f   : > { %2269 = vmatpush2.bf16.msra.mxu1 %v4440_v52  ;;  %v4422_v52 = vcombine.low %v1471_v39, %v1475_v40  ;;  %v1543_v39 = vld [vmem:[%s6945_s4 + $0x398] sm:$0xff] }
 0x610   : > { %2312 = vmatpush2.bf16.msra.mxu0 %v4442_v53  ;;  %2324 = vmatprep.subr.bf16.mxu1 %v4437_v57  ;;  %v4413_v53 = vcombine.high %v1462_v49, %v1466_v30  ;;  %v1455_v57 = vld [vmem:[%s6945_s4 + $0xd8] sm:$0xff] }
 0x611   : > { %2367 = vmatprep.subr.bf16.mxu0 %v4439_v0  ;;  %v4405_v0 = vcombine.high %v1454_v55, %v1458_v56  ;;  %v4406_v7 = vcombine.low %v1455_v57, %v1459_v58  ;;  %v1547_v40 = vld [vmem:[%s6945_s4 + $0x3b8] sm:$0xff] }
 0x690   : > { %v1382_v1 = vpop.xlane.xlu0 %1381 }
 0x691   : > { %v1386_v2 = vmul.f32 0.00390625, %v1382_v1  ;;  %v4407_v1 = vcombine.high %v1455_v57, %v1459_v58  ;;  %v1527_v57 = vld [vmem:[%s6945_s4 + $0x318] sm:$0xff] }
 0x692   : > { %v1531_v58 = vld [vmem:[%s6945_s4 + $0x338] sm:$0xff] }
 0x693   : > { %v1388_v3 = vadd.f32 1e-05, %v1386_v2  ;;  %v1446_v2 = vld [vmem:[%s6945_s4 + $0x90] sm:$0xff] }
 0x694   : > { %v1385_v4 = vpop.xlane.xlu0 %1384 }
 0x695   : > { %5108 = vrsqrt.f32 %v1388_v3  ;;  %v1387_v5 = vmul.f32 0.00390625, %v1385_v4  ;;  %v1450_v3 = vld [vmem:[%s6945_s4 + $0xb0] sm:$0xff]  ;;  %v1447_v4 = vld [vmem:[%s6945_s4 + $0x98] sm:$0xff] }
 0x697   : > { %v1389_v6 = vadd.f32 1e-05, %v1387_v5  ;;  %v1451_v5 = vld [vmem:[%s6945_s4 + $0xb8] sm:$0xff] }
 0x698   : > { %v4399_v9 = vcombine.high %v1447_v4, %v1451_v5 }
 0x699   : > { %5110 = vrsqrt.f32 %v1389_v6  ;;  %v4404_v6 = vcombine.low %v1454_v55, %v1458_v56  ;;  %v1526_v55 = vld [vmem:[%s6945_s4 + $0x310] sm:$0xff] }
 0x69a   : > { %v1530_v56 = vld [vmem:[%s6945_s4 + $0x330] sm:$0xff] }
 0x6a2   : > { %v5109_v8 = vpop.eup %5108 }
 0x6a3   : > { %v1393_v10 = vmul.f32 %v5109_v8, %v5699_v42  ;;  %v1392_v11 = vmul.f32 %v5109_v8, %v5696_v41  ;;  %v1478_v41 = vld [vmem:[%s6945_s4 + $0x190] sm:$0xff]  ;;  %v4397_v8 = vcombine.high %v1446_v2, %v1450_v3 }
 0x6a4   : > { %v4429_v36 = vcombine.high %v1478_v41, %v1482_v31  ;;  %v4428_v43 = vcombine.low %v1478_v41, %v1482_v31  ;;  %v1554_v41 = vld [vmem:[%s6945_s4 + $0x3f0] sm:$0xff]  ;;  %v1551_v31 = vld [vmem:[%s6945_s4 + $0x3d8] sm:$0xff] }
 0x6a5   : > { %v1408_v21 = vmul.f32 %v1404_v28, %v1393_v10  ;;  %v1407_v23 = vmul.f32 %v1400_v12, %v1392_v11  ;;  %v1438_v10 = vld [vmem:[%s6945_s4 + $0x50] sm:$0xff]  ;;  %v1439_v11 = vld [vmem:[%s6945_s4 + $0x58] sm:$0xff] }
 0x6a6   : > { %v5111_v15 = vpop.eup %5110 }
 0x6a7   : > { %v1395_v20 = vmul.f32 %v5111_v15, %v5709_v48  ;;  %v1394_v22 = vmul.f32 %v5111_v15, %v5706_v47  ;;  %v1423_v42 = vadd.f32 %v1419_v16, %v1408_v21  ;;  %v1422_v27 = vadd.f32 %v1415_v17, %v1407_v23  ;;  %v1479_v48 = vld [vmem:[%s6945_s4 + $0x198] sm:$0xff]  ;;  %v1430_v21 = vld [vmem:[%s6945_s4 + $0x10] sm:$0xff] }
 0x6a8   : > { %v1483_v47 = vld [vmem:[%s6945_s4 + $0x1b8] sm:$0xff]  ;;  %v4396_v15 = vcombine.low %v1446_v2, %v1450_v3  ;;  %v1518_v2 = vld [vmem:[%s6945_s4 + $0x2d0] sm:$0xff] }
 0x6a9   : > { %v1410_v24 = vmul.f32 %v1404_v28, %v1395_v20  ;;  %v1409_v25 = vmul.f32 %v1400_v12, %v1394_v22  ;;  %v4431_v37 = vcombine.high %v1479_v48, %v1483_v47  ;;  %v4430_v44 = vcombine.low %v1479_v48, %v1483_v47  ;;  %v1442_v28 = vld [vmem:[%s6945_s4 + $0x70] sm:$0xff]  ;;  %v1443_v12 = vld [vmem:[%s6945_s4 + $0x78] sm:$0xff] }
 0x6aa   : > { %v4391_v20 = vcombine.high %v1439_v11, %v1443_v12  ;;  %v1434_v22 = vld [vmem:[%s6945_s4 + $0x30] sm:$0xff]  ;;  %v1431_v23 = vld [vmem:[%s6945_s4 + $0x18] sm:$0xff] }
 0x6ab   : > { %v1425_v26 = vadd.f32 %v1419_v16, %v1410_v24  ;;  %v1424_v29 = vadd.f32 %v1415_v17, %v1409_v25  ;;  %v4398_v16 = vcombine.low %v1447_v4, %v1451_v5  ;;  %v4389_v17 = vcombine.high %v1438_v10, %v1442_v28  ;;  %v1435_v24 = vld [vmem:[%s6945_s4 + $0x38] sm:$0xff]  ;;  %v1522_v3 = vld [vmem:[%s6945_s4 + $0x2f0] sm:$0xff] }
 0x6ac   : > { %v4388_v25 = vcombine.low %v1438_v10, %v1442_v28  ;;  %v1555_v48 = vld [vmem:[%s6945_s4 + $0x3f8] sm:$0xff]  ;;  %v4380_v47 = vcombine.low %v1430_v21, %v1434_v22  ;;  %v1510_v10 = vld [vmem:[%s6945_s4 + $0x290] sm:$0xff] }
 0x6ad   : > { %v1427_v33 = vpack.c.bf16 %v1425_v26, %v1423_v42  ;;  %v5837_v34 = vpack.c.bf16 %v1424_v29, %v1422_v27  ;;  %v4390_v42 = vcombine.low %v1439_v11, %v1443_v12  ;;  %v4381_v26 = vcombine.high %v1430_v21, %v1434_v22  ;;  %v1550_v29 = vld [vmem:[%s6945_s4 + $0x3d0] sm:$0xff]  ;;  %v1519_v4 = vld [vmem:[%s6945_s4 + $0x2d8] sm:$0xff] }
 0x6ae   : > { %v4383_v27 = vcombine.high %v1431_v23, %v1435_v24  ;;  %v4501_v35 = vcombine.high %v1550_v29, %v1554_v41  ;;  %v1523_v5 = vld [vmem:[%s6945_s4 + $0x2f8] sm:$0xff]  ;;  %v1514_v28 = vld [vmem:[%s6945_s4 + $0x2b0] sm:$0xff] }
 0x6af   : > { %2270 = vmatprep.mubr.bf16.mxu1 %v1427_v33  ;;  %2313 = vmatprep.mubr.bf16.mxu0 %v1427_v33  ;;  %v1511_v11 = vld [vmem:[%s6945_s4 + $0x298] sm:$0xff]  ;;  %v1502_v21 = vld [vmem:[%s6945_s4 + $0x250] sm:$0xff] }
 0x6b0   : > { %2271 = vmatmul.mubr.bf16.vlgmr.msra.gmra.mxu1 %v5837_v34  ;;  %2314 = vmatmul.mubr.bf16.vlgmr.msra.gmra.mxu0 %v5837_v34  ;;  %v1515_v12 = vld [vmem:[%s6945_s4 + $0x2b8] sm:$0xff]  ;;  %v1506_v22 = vld [vmem:[%s6945_s4 + $0x270] sm:$0xff] }
 0x6b1   : > { %2325 = vmatpush1.bf16.msra.mxu1 %v4436_v59  ;;  %2368 = vmatpush1.bf16.msra.mxu0 %v4438_v63  ;;  %v4412_v59 = vcombine.low %v1462_v49, %v1466_v30  ;;  %v4414_v63 = vcombine.low %v1463_v50, %v1467_v32  ;;  %v1534_v49 = vld [vmem:[%s6945_s4 + $0x350] sm:$0xff]  ;;  %v1535_v50 = vld [vmem:[%s6945_s4 + $0x358] sm:$0xff] }
 0x6b2   : > { %2356 = vmatprep.mubr.bf16.mxu1 %v1427_v33  ;;  %2399 = vmatprep.mubr.bf16.mxu0 %v1427_v33  ;;  %v4382_v33 = vcombine.low %v1431_v23, %v1435_v24  ;;  %v1538_v30 = vld [vmem:[%s6945_s4 + $0x370] sm:$0xff]  ;;  %v1539_v32 = vld [vmem:[%s6945_s4 + $0x378] sm:$0xff] }
 0x6b3   : > { %2326 = vmatprep.subr.bf16.mxu1 %v4429_v36  ;;  %2369 = vmatprep.subr.bf16.mxu0 %v4431_v37  ;;  %v4503_v36 = vcombine.high %v1551_v31, %v1555_v48  ;;  %v1542_v37 = vld [vmem:[%s6945_s4 + $0x390] sm:$0xff]  ;;  %v1503_v23 = vld [vmem:[%s6945_s4 + $0x258] sm:$0xff] }
 0x6b4   : > { %v1507_v24 = vld [vmem:[%s6945_s4 + $0x278] sm:$0xff] }
 0x6b5   : > { %2327 = vmatpush1.bf16.msra.mxu1 %v4428_v43  ;;  %2370 = vmatpush1.bf16.msra.mxu0 %v4430_v44  ;;  %v4500_v43 = vcombine.low %v1550_v29, %v1554_v41  ;;  %v4502_v44 = vcombine.low %v1551_v31, %v1555_v48  ;;  %v1494_v29 = vld [vmem:[%s6945_s4 + $0x210] sm:$0xff]  ;;  %v1495_v31 = vld [vmem:[%s6945_s4 + $0x218] sm:$0xff] }
 0x6b6   : > { %2328 = vmatprep.subr.bf16.mxu1 %v4421_v45  ;;  %2371 = vmatprep.subr.bf16.mxu0 %v4423_v46  ;;  %v4493_v45 = vcombine.high %v1542_v37, %v1546_v38  ;;  %v4495_v46 = vcombine.high %v1543_v39, %v1547_v40  ;;  %v1498_v41 = vld [vmem:[%s6945_s4 + $0x230] sm:$0xff]  ;;  %v1499_v48 = vld [vmem:[%s6945_s4 + $0x238] sm:$0xff] }
 0x6b9   : > { %2329 = vmatpush1.bf16.msra.mxu1 %v4420_v51  ;;  %2372 = vmatpush1.bf16.msra.mxu0 %v4422_v52  ;;  %v4492_v51 = vcombine.low %v1542_v37, %v1546_v38  ;;  %v4494_v52 = vcombine.low %v1543_v39, %v1547_v40  ;;  %v4444_v37 = vcombine.low %v1494_v29, %v1498_v41  ;;  %v4834_v39 = vld [vmem:[%s6947_s6 + $0x74] ss:$8 sps:$4 sm:$0xff]  }
 0x6ba   : > { %2330 = vmatprep.subr.bf16.mxu1 %v4413_v53  ;;  %2373 = vmatprep.subr.bf16.mxu0 %v4415_v54  ;;  %v4485_v53 = vcombine.high %v1534_v49, %v1538_v30  ;;  %v4487_v54 = vcombine.high %v1535_v50, %v1539_v32  ;;  %v4446_v38 = vcombine.low %v1495_v31, %v1499_v48  ;;  %v4837_v40 = vld [vmem:[%s6947_s6 + $0x174] ss:$8 sps:$4 sm:$0xff]  }
 0x6bd   : > { %2331 = vmatpush1.bf16.msra.mxu1 %v4412_v59  ;;  %2374 = vmatpush1.bf16.msra.mxu0 %v4414_v63  ;;  %v4484_v59 = vcombine.low %v1534_v49, %v1538_v30  ;;  %v4486_v63 = vcombine.low %v1535_v50, %v1539_v32  ;;  %v4838_v49 = vld [vmem:[%s6947_s6 + $0x60] ss:$8 sps:$4 sm:$0xff]   ;;  %v4849_v50 = vld [vmem:[%s6947_s6 + $0x154] ss:$8 sps:$4 sm:$0xff]   ;;  %v4844_v32 = vld [vmem:[%s6947_s6 + $0x50] ss:$8 sps:$4 sm:$0xff]  }
 0x6be   : > { %2332 = vmatprep.subr.bf16.mxu1 %v4405_v0  ;;  %2375 = vmatprep.subr.bf16.mxu0 %v4407_v1  ;;  %v4477_v0 = vcombine.high %v1526_v55, %v1530_v56  ;;  %v4479_v1 = vcombine.high %v1527_v57, %v1531_v58  ;;  %v4841_v30 = vld [vmem:[%s6947_s6 + $0x160] ss:$8 sps:$4 sm:$0xff]  }
 0x6c1   : > { %2333 = vmatpush1.bf16.msra.mxu1 %v4404_v6  ;;  %2376 = vmatpush1.bf16.msra.mxu0 %v4406_v7  ;;  %v4476_v6 = vcombine.low %v1526_v55, %v1530_v56  ;;  %v4478_v7 = vcombine.low %v1527_v57, %v1531_v58  ;;  %v4853_v55 = vld [vmem:[%s6947_s6 + $0x140] ss:$8 sps:$4 sm:$0xff]   ;;  %v4858_v56 = vld [vmem:[%s6947_s6 + $0x34] ss:$8 sps:$4 sm:$0xff]   ;;  %v4856_v58 = vld [vmem:[%s6947_s6 + $0x30] ss:$8 sps:$4 sm:$0xff]  }
 0x6c2   : > { %2334 = vmatprep.subr.bf16.mxu1 %v4397_v8  ;;  %2377 = vmatprep.subr.bf16.mxu0 %v4399_v9  ;;  %v4469_v8 = vcombine.high %v1518_v2, %v1522_v3  ;;  %v4471_v9 = vcombine.high %v1519_v4, %v1523_v5  ;;  %v4861_v57 = vld [vmem:[%s6947_s6 + $0x134] ss:$8 sps:$4 sm:$0xff]  }
 0x6c5   : > { %2335 = vmatpush1.bf16.msra.mxu1 %v4396_v15  ;;  %2378 = vmatpush1.bf16.msra.mxu0 %v4398_v16  ;;  %v4468_v15 = vcombine.low %v1518_v2, %v1522_v3  ;;  %v4470_v16 = vcombine.low %v1519_v4, %v1523_v5  ;;  %v4865_v2 = vld [vmem:[%s6947_s6 + $0x120] ss:$8 sps:$4 sm:$0xff]   ;;  %v4870_v3 = vld [vmem:[%s6947_s6 + $0x14] ss:$8 sps:$4 sm:$0xff]   ;;  %v4868_v5 = vld [vmem:[%s6947_s6 + $0x10] ss:$8 sps:$4 sm:$0xff]  }
 0x6c6   : > { %2336 = vmatprep.subr.bf16.mxu1 %v4389_v17  ;;  %2379 = vmatprep.subr.bf16.mxu0 %v4391_v20  ;;  %v4461_v17 = vcombine.high %v1510_v10, %v1514_v28  ;;  %v4463_v20 = vcombine.high %v1511_v11, %v1515_v12  ;;  %v4873_v4 = vld [vmem:[%s6947_s6 + $0x114] ss:$8 sps:$4 sm:$0xff]  }
 0x6c9   : > { %2337 = vmatpush1.bf16.msra.mxu1 %v4388_v25  ;;  %2380 = vmatpush1.bf16.msra.mxu0 %v4390_v42  ;;  %v4460_v25 = vcombine.low %v1510_v10, %v1514_v28  ;;  %v4462_v42 = vcombine.low %v1511_v11, %v1515_v12  ;;  %v4877_v10 = vld [vmem:[%s6947_s6 + $0x100] ss:$8 sps:$4 sm:$0xff]   ;;  %v4882_v28 = vld [vmem:[%s6947_s6 + $0xf4] ss:$8 sps:$4 sm:$0xff]   ;;  %v4880_v12 = vld [vmem:[%s6947_s6 + $0xf0] ss:$8 sps:$4 sm:$0xff]  }
 0x6ca   : > { %2338 = vmatprep.subr.bf16.mxu1 %v4381_v26  ;;  %2381 = vmatprep.subr.bf16.mxu0 %v4383_v27  ;;  %v4453_v26 = vcombine.high %v1502_v21, %v1506_v22  ;;  %v4455_v27 = vcombine.high %v1503_v23, %v1507_v24  ;;  %v4885_v11 = vld [vmem:[%s6947_s6 + $0x1f4] ss:$8 sps:$4 sm:$0xff]  }
 0x6cd   : > { %2339 = vmatpush1.bf16.msra.mxu1 %v4380_v47  ;;  %2382 = vmatpush1.bf16.msra.mxu0 %v4382_v33  ;;  %v4452_v47 = vcombine.low %v1502_v21, %v1506_v22  ;;  %v4454_v33 = vcombine.low %v1503_v23, %v1507_v24  ;;  %v4889_v21 = vld [vmem:[%s6947_s6 + $0x1e0] ss:$8 sps:$4 sm:$0xff]   ;;  %v4894_v22 = vld [vmem:[%s6947_s6 + $0xd4] ss:$8 sps:$4 sm:$0xff]   ;;  %v4892_v24 = vld [vmem:[%s6947_s6 + $0xd0] ss:$8 sps:$4 sm:$0xff]  }
 0x6ce   : > { %2340 = vmatprep.subr.bf16.mxu1 %v4501_v35  ;;  %2383 = vmatprep.subr.bf16.mxu0 %v4503_v36  ;;  %v4445_v35 = vcombine.high %v1494_v29, %v1498_v41  ;;  %v4447_v36 = vcombine.high %v1495_v31, %v1499_v48  ;;  %v4897_v23 = vld [vmem:[%s6947_s6 + $0x1d4] ss:$8 sps:$4 sm:$0xff]   ;;  %v4901_v29 = vld [vmem:[%s6947_s6 + $0x1c0] ss:$8 sps:$4 sm:$0xff]   ;;  %v4904_v48 = vld [vmem:[%s6947_s6 + $0xb0] ss:$8 sps:$4 sm:$0xff]  }
 0x6cf   : > { %v4906_v41 = vld [vmem:[%s6947_s6 + $0xb4] ss:$8 sps:$4 sm:$0xff]  }
 0x6d0   : > { %v4909_v31 = vld [vmem:[%s6947_s6 + $0x1b4] ss:$8 sps:$4 sm:$0xff]  }
 0x6d1   : > { %2341 = vmatpush2.bf16.msra.mxu1 %v4500_v43  ;;  %2384 = vmatpush2.bf16.msra.mxu0 %v4502_v44  ;;  %v4832_v43 = vld [vmem:[%s6947_s6 + $0x70] ss:$8 sps:$4 sm:$0xff]  }
 0x6d2   : > { %2342 = vmatprep.subr.bf16.mxu1 %v4493_v45  ;;  %2385 = vmatprep.subr.bf16.mxu0 %v4495_v46  ;;  %v4835_v44 = vld [vmem:[%s6947_s6 + $0x170] ss:$8 sps:$4 sm:$0xff]   ;;  %v4840_v45 = vld [vmem:[%s6947_s6 + $0x64] ss:$8 sps:$4 sm:$0xff]  }
 0x6d3   : > { %v4843_v46 = vld [vmem:[%s6947_s6 + $0x164] ss:$8 sps:$4 sm:$0xff]  }
 0x6d5   : > { %2343 = vmatpush2.bf16.msra.mxu1 %v4492_v51  ;;  %2386 = vmatpush2.bf16.msra.mxu0 %v4494_v52  ;;  %v4847_v51 = vld [vmem:[%s6947_s6 + $0x150] ss:$8 sps:$4 sm:$0xff]   ;;  %v4852_v52 = vld [vmem:[%s6947_s6 + $0x44] ss:$8 sps:$4 sm:$0xff]  }
 0x6d6   : > { %2344 = vmatprep.subr.bf16.mxu1 %v4485_v53  ;;  %2387 = vmatprep.subr.bf16.mxu0 %v4487_v54  ;;  %v4855_v53 = vld [vmem:[%s6947_s6 + $0x144] ss:$8 sps:$4 sm:$0xff]   ;;  %v4850_v54 = vld [vmem:[%s6947_s6 + $0x40] ss:$8 sps:$4 sm:$0xff]  }
 0x6d9   : > { %2345 = vmatpush2.bf16.msra.mxu1 %v4484_v59  ;;  %2388 = vmatpush2.bf16.msra.mxu0 %v4486_v63  ;;  %v4859_v59 = vld [vmem:[%s6947_s6 + $0x130] ss:$8 sps:$4 sm:$0xff]   ;;  %v4864_v63 = vld [vmem:[%s6947_s6 + $0x24] ss:$8 sps:$4 sm:$0xff]  }
 0x6da   : > { %2346 = vmatprep.subr.bf16.mxu1 %v4477_v0  ;;  %2389 = vmatprep.subr.bf16.mxu0 %v4479_v1  ;;  %v4867_v0 = vld [vmem:[%s6947_s6 + $0x124] ss:$8 sps:$4 sm:$0xff]   ;;  %v4862_v1 = vld [vmem:[%s6947_s6 + $0x20] ss:$8 sps:$4 sm:$0xff]  }
 0x6dd   : > { %2347 = vmatpush2.bf16.msra.mxu1 %v4476_v6  ;;  %2390 = vmatpush2.bf16.msra.mxu0 %v4478_v7  ;;  %v4871_v6 = vld [vmem:[%s6947_s6 + $0x110] ss:$8 sps:$4 sm:$0xff]   ;;  %v4876_v7 = vld [vmem:[%s6947_s6 + $0x4] ss:$8 sps:$4 sm:$0xff]  }
 0x6de   : > { %2348 = vmatprep.subr.bf16.mxu1 %v4469_v8  ;;  %2391 = vmatprep.subr.bf16.mxu0 %v4471_v9  ;;  %v4879_v8 = vld [vmem:[%s6947_s6 + $0x104] ss:$8 sps:$4 sm:$0xff]   ;;  %v4874_v9 = vld [vmem:[%s6947_s6] ss:$8 sps:$4 sm:$0xff]  }
 0x6e1   : > { %2349 = vmatpush2.bf16.msra.mxu1 %v4468_v15  ;;  %2392 = vmatpush2.bf16.msra.mxu0 %v4470_v16  ;;  %v4883_v15 = vld [vmem:[%s6947_s6 + $0x1f0] ss:$8 sps:$4 sm:$0xff]   ;;  %v4888_v16 = vld [vmem:[%s6947_s6 + $0xe4] ss:$8 sps:$4 sm:$0xff]  }
 0x6e2   : > { %2350 = vmatprep.subr.bf16.mxu1 %v4461_v17  ;;  %2393 = vmatprep.subr.bf16.mxu0 %v4463_v20  ;;  %v4891_v17 = vld [vmem:[%s6947_s6 + $0x1e4] ss:$8 sps:$4 sm:$0xff]   ;;  %v4886_v20 = vld [vmem:[%s6947_s6 + $0xe0] ss:$8 sps:$4 sm:$0xff]  }
 0x6e5   : > { %2351 = vmatpush2.bf16.msra.mxu1 %v4460_v25  ;;  %2394 = vmatpush2.bf16.msra.mxu0 %v4462_v42  ;;  %v4895_v25 = vld [vmem:[%s6947_s6 + $0x1d0] ss:$8 sps:$4 sm:$0xff]   ;;  %v4900_v42 = vld [vmem:[%s6947_s6 + $0xc4] ss:$8 sps:$4 sm:$0xff]  }
 0x6e6   : > { %2352 = vmatprep.subr.bf16.mxu1 %v4453_v26  ;;  %2395 = vmatprep.subr.bf16.mxu0 %v4455_v27  ;;  %v4903_v26 = vld [vmem:[%s6947_s6 + $0x1c4] ss:$8 sps:$4 sm:$0xff]   ;;  %v4898_v27 = vld [vmem:[%s6947_s6 + $0xc0] ss:$8 sps:$4 sm:$0xff]  }
 0x6e9   : > { %2353 = vmatpush2.bf16.msra.mxu1 %v4452_v47  ;;  %2396 = vmatpush2.bf16.msra.mxu0 %v4454_v33  ;;  %v4907_v47 = vld [vmem:[%s6947_s6 + $0x1b0] ss:$8 sps:$4 sm:$0xff]   ;;  %v4912_v33 = vld [vmem:[%s6947_s6 + $0xa4] ss:$8 sps:$4 sm:$0xff]  }
 0x6ea   : > { %2354 = vmatprep.subr.bf16.mxu1 %v4445_v35  ;;  %2397 = vmatprep.subr.bf16.mxu0 %v4447_v36  ;;  %v4915_v35 = vld [vmem:[%s6947_s6 + $0x1a4] ss:$8 sps:$4 sm:$0xff]   ;;  %v4910_v36 = vld [vmem:[%s6947_s6 + $0xa0] ss:$8 sps:$4 sm:$0xff]  }
 0x6ed   : > { %2355 = vmatpush2.bf16.msra.mxu1 %v4444_v37  ;;  %2398 = vmatpush2.bf16.msra.mxu0 %v4446_v38  ;;  %v4913_v37 = vld [vmem:[%s6947_s6 + $0x1a0] ss:$8 sps:$4 sm:$0xff]   ;;  %v4918_v38 = vld [vmem:[%s6947_s6 + $0x94] ss:$8 sps:$4 sm:$0xff]  }
 0x6ee   : > { %3618 = vmatprep.subr.bf16.mxu1 %v4834_v39  ;;  %3661 = vmatprep.subr.bf16.mxu0 %v4837_v40  ;;  %v4921_v39 = vld [vmem:[%s6947_s6 + $0x194] ss:$8 sps:$4 sm:$0xff]   ;;  %v4916_v40 = vld [vmem:[%s6947_s6 + $0x90] ss:$8 sps:$4 sm:$0xff]  }
 0x6f0   : > { %2357 = vmatmul.mubr.bf16.vlgmr.msra.gmra.mxu1 %v5837_v34  ;;  %2400 = vmatmul.mubr.bf16.vlgmr.msra.gmra.mxu0 %v5837_v34  ;;  %v4846_v34 = vld [vmem:[%s6947_s6 + $0x54] ss:$8 sps:$4 sm:$0xff]  }
 0x6f1   : > { %3619 = vmatpush1.bf16.msra.mxu1 %v4832_v43  ;;  %3662 = vmatpush1.bf16.msra.mxu0 %v4835_v44  ;;  %v4919_v43 = vld [vmem:[%s6947_s6 + $0x190] ss:$8 sps:$4 sm:$0xff]   ;;  %v4924_v44 = vld [vmem:[%s6947_s6 + $0x84] ss:$8 sps:$4 sm:$0xff]  }
 0x6f2   : > { %3620 = vmatprep.subr.bf16.mxu1 %v4840_v45  ;;  %3663 = vmatprep.subr.bf16.mxu0 %v4843_v46  ;;  %v4927_v45 = vld [vmem:[%s6947_s6 + $0x184] ss:$8 sps:$4 sm:$0xff]   ;;  %v4922_v46 = vld [vmem:[%s6947_s6 + $0x80] ss:$8 sps:$4 sm:$0xff]  }
 0x6f5   : > { %3621 = vmatpush1.bf16.msra.mxu1 %v4838_v49  ;;  %3664 = vmatpush1.bf16.msra.mxu0 %v4841_v30  ;;  %v4925_v49 = vld [vmem:[%s6947_s6 + $0x180] ss:$8 sps:$4 sm:$0xff]   ;;  %v4930_v30 = vld [vmem:[%s6947_s6 + $0x274] ss:$8 sps:$4 sm:$0xff]  }
 0x6f6   : > { %3622 = vmatprep.subr.bf16.mxu1 %v4846_v34  ;;  %3665 = vmatprep.subr.bf16.mxu0 %v4849_v50  ;;  %v4933_v34 = vld [vmem:[%s6947_s6 + $0x374] ss:$8 sps:$4 sm:$0xff]   ;;  %v1568_v50 = vsub.s32 2, %v5390_v60 }
 0x6f9   : > { %3623 = vmatpush1.bf16.msra.mxu1 %v4844_v32  ;;  %3666 = vmatpush1.bf16.msra.mxu0 %v4847_v51  ;;  %v6213_v32 = vld [vmem:[%s6946_s5] sm:$0xff]  ;;  %v1572_v51 = vsub.s32 3, %v5390_v60 }
 0x6fa   : > { %3624 = vmatprep.subr.bf16.mxu1 %v4852_v52  ;;  %3667 = vmatprep.subr.bf16.mxu0 %v4855_v53  ;;  %v1561_v52 = vrot.slane %v6213_v32, %v5396_v62  ;;  %v1569_v53 = vrot.slane %v6213_v32, %v1568_v50 }
 0x6fd   : > { %3625 = vmatpush1.bf16.msra.mxu1 %v4850_v54  ;;  %3668 = vmatpush1.bf16.msra.mxu0 %v4853_v55 }
 0x6fe   : > { %3626 = vmatprep.subr.bf16.mxu1 %v4858_v56  ;;  %3669 = vmatprep.subr.bf16.mxu0 %v4861_v57  ;;  %v1565_v56 = vrot.slane %v6213_v32, %v5393_v61  ;;  %v1573_v57 = vrot.slane %v6213_v32, %v1572_v51 }
 0x701   : > { %3627 = vmatpush1.bf16.msra.mxu1 %v4856_v58  ;;  %3670 = vmatpush1.bf16.msra.mxu0 %v4859_v59 }
 0x702   : > { %3628 = vmatprep.subr.bf16.mxu1 %v4864_v63  ;;  %3671 = vmatprep.subr.bf16.mxu0 %v4867_v0 }
 0x705   : > { %3629 = vmatpush1.bf16.msra.mxu1 %v4862_v1  ;;  %3672 = vmatpush1.bf16.msra.mxu0 %v4865_v2 }
 0x706   : > { %3630 = vmatprep.subr.bf16.mxu1 %v4870_v3  ;;  %3673 = vmatprep.subr.bf16.mxu0 %v4873_v4 }
 0x709   : > { %3631 = vmatpush1.bf16.msra.mxu1 %v4868_v5  ;;  %3674 = vmatpush1.bf16.msra.mxu0 %v4871_v6 }
 0x70a   : > { %3632 = vmatprep.subr.bf16.mxu1 %v4876_v7  ;;  %3675 = vmatprep.subr.bf16.mxu0 %v4879_v8 }
 0x70d   : > { %3633 = vmatpush1.bf16.msra.mxu1 %v4874_v9  ;;  %3676 = vmatpush1.bf16.msra.mxu0 %v4877_v10 }
 0x70e   : > { %3634 = vmatprep.subr.bf16.mxu1 %v4882_v28  ;;  %3677 = vmatprep.subr.bf16.mxu0 %v4885_v11 }
 0x711   : > { %3635 = vmatpush2.bf16.msra.mxu1 %v4880_v12  ;;  %3678 = vmatpush2.bf16.msra.mxu0 %v4883_v15 }
 0x712   : > { %3636 = vmatprep.subr.bf16.mxu1 %v4888_v16  ;;  %3679 = vmatprep.subr.bf16.mxu0 %v4891_v17 }
 0x715   : > { %3637 = vmatpush2.bf16.msra.mxu1 %v4886_v20  ;;  %3680 = vmatpush2.bf16.msra.mxu0 %v4889_v21 }
 0x716   : > { %3638 = vmatprep.subr.bf16.mxu1 %v4894_v22  ;;  %3681 = vmatprep.subr.bf16.mxu0 %v4897_v23 }
 0x719   : > { %3639 = vmatpush2.bf16.msra.mxu1 %v4892_v24  ;;  %3682 = vmatpush2.bf16.msra.mxu0 %v4895_v25 }
 0x71a   : > { %3640 = vmatprep.subr.bf16.mxu1 %v4900_v42  ;;  %3683 = vmatprep.subr.bf16.mxu0 %v4903_v26 }
 0x71d   : > { %3641 = vmatpush2.bf16.msra.mxu1 %v4898_v27  ;;  %3684 = vmatpush2.bf16.msra.mxu0 %v4901_v29 }
 0x71e   : > { %3642 = vmatprep.subr.bf16.mxu1 %v4906_v41  ;;  %3685 = vmatprep.subr.bf16.mxu0 %v4909_v31 }
 0x721   : > { %3643 = vmatpush2.bf16.msra.mxu1 %v4904_v48  ;;  %3686 = vmatpush2.bf16.msra.mxu0 %v4907_v47 }
 0x722   : > { %3644 = vmatprep.subr.bf16.mxu1 %v4912_v33  ;;  %3687 = vmatprep.subr.bf16.mxu0 %v4915_v35 }
 0x725   : > { %3645 = vmatpush2.bf16.msra.mxu1 %v4910_v36  ;;  %3688 = vmatpush2.bf16.msra.mxu0 %v4913_v37 }
 0x726   : > { %3646 = vmatprep.subr.bf16.mxu1 %v4918_v38  ;;  %3689 = vmatprep.subr.bf16.mxu0 %v4921_v39 }
 0x729   : > { %3647 = vmatpush2.bf16.msra.mxu1 %v4916_v40  ;;  %3690 = vmatpush2.bf16.msra.mxu0 %v4919_v43  ;;  %v1576_v43 = vsub.s32 4, %v5390_v60 }
 0x72a   : > { %3648 = vmatprep.subr.bf16.mxu1 %v4924_v44  ;;  %3691 = vmatprep.subr.bf16.mxu0 %v4927_v45 }
 0x72d   : > { %3649 = vmatpush2.bf16.msra.mxu1 %v4922_v46  ;;  %3692 = vmatpush2.bf16.msra.mxu0 %v4925_v49 }
 0x72e   : > { %3704 = vmatprep.subr.bf16.mxu1 %v4930_v30  ;;  %3747 = vmatprep.subr.bf16.mxu0 %v4933_v34  ;;  %v1584_v30 = vsub.s32 6, %v5390_v60 }
 0x770   : > { %v2272_v54 = vpop.f32.mrf.mxu1  ;;  %v2315_v55 = vpop.f32.mrf.mxu0 }
 0x771   : > { %v6222_v58 = vadd.f32 %v2272_v54, %v1561_v52  ;;  %v6224_v59 = vadd.f32 %v2315_v55, %v1569_v53 }
 0x772   : > { %v2274_v63 = vpop.f32.mrf.mxu1  ;;  %v2317_v0 = vpop.f32.mrf.mxu0 }
 0x773   : > { %v6227_v1 = vmul.f32 0.70710677, %v6222_v58  ;;  %v6230_v2 = vmul.f32 0.70710677, %v6224_v59  ;;  %v6232_v3 = vadd.f32 %v2274_v63, %v1565_v56  ;;  %v6234_v4 = vadd.f32 %v2317_v0, %v1573_v57 }
 0x774   : > { %v2276_v8 = vpop.f32.mrf.mxu1  ;;  %v2319_v17 = vpop.f32.mrf.mxu0 }
 0x775   : > { %v2474_v5 = vand.u32 2147483647, %v6227_v1  ;;  %v6238_v6 = vand.u32 2147483647, %v6230_v2  ;;  %v6241_v7 = vmul.f32 0.70710677, %v6232_v3  ;;  %v6251_v23 = vadd.f32 %v2276_v8, %v1561_v52 }
 0x776   : > { %v6246_v11 = vmul.f32 0.70710677, %v6234_v4  ;;  %v2278_v20 = vpop.f32.mrf.mxu1  ;;  %v6253_v24 = vadd.f32 %v2319_v17, %v1569_v53  ;;  %v2321_v48 = vpop.f32.mrf.mxu0  ;;  %v6295_v8 = vrot.slane %v6213_v32, %v1584_v30  ;;  %vm2442_vm3 = vcmp.lt.f32.partialorder %v6227_v1, 0.0 }
 0x777   : > { %v2490_v9 = vmul.f32 0.3275911, %v2474_v5  ;;  %v2492_v10 = vmul.f32 0.3275911, %v6238_v6  ;;  %v2475_v28 = vand.u32 2147483647, %v6241_v7  ;;  %v6255_v25 = vadd.f32 %v2278_v20, %v1565_v56 }
 0x778   : > { %v6249_v22 = vand.u32 2147483647, %v6246_v11  ;;  %v6259_v26 = vmul.f32 0.70710677, %v6251_v23  ;;  %v6262_v29 = vmul.f32 0.70710677, %v6253_v24  ;;  %v6272_v36 = vadd.f32 %v2321_v48, %v1573_v57 }
 0x779   : > { %v2506_v12 = vadd.f32 1.0, %v2490_v9  ;;  %v2508_v15 = vadd.f32 1.0, %v2492_v10  ;;  %v2491_v16 = vmul.f32 0.3275911, %v2475_v28  ;;  %v6266_v31 = vmul.f32 0.70710677, %v6255_v25 }
 0x77a   : > { %v2493_v42 = vmul.f32 0.3275911, %v6249_v22  ;;  %v2482_v41 = vand.u32 2147483647, %v6259_v26  ;;  %v2484_v33 = vand.u32 2147483647, %v6262_v29  ;;  %v6290_v56 = vrot.slane %v6213_v32, %v1576_v43 }
 0x77b   : > { %5112 = vrcp.f32 %v2506_v12  ;;  %v2507_v21 = vadd.f32 1.0, %v2491_v16  ;;  %v6270_v35 = vand.u32 2147483647, %v6266_v31  ;;  %v2699_v45 = vsub.f32 0.0, %v2475_v28 }
 0x77c   : > { %5114 = vrcp.f32 %v2508_v15  ;;  %v2509_v27 = vadd.f32 1.0, %v2493_v42  ;;  %v2498_v47 = vmul.f32 0.3275911, %v2482_v41  ;;  %v2500_v38 = vmul.f32 0.3275911, %v2484_v33 }
 0x77d   : > { %5116 = vrcp.f32 %v2507_v21  ;;  %v2499_v39 = vmul.f32 0.3275911, %v6270_v35  ;;  %v6279_v49 = vmul.f32 0.70710677, %v6272_v36  ;;  %v2698_v51 = vsub.f32 0.0, %v2474_v5 }
 0x77e   : > { %5118 = vrcp.f32 %v2509_v27  ;;  %v2514_v37 = vadd.f32 1.0, %v2498_v47  ;;  %v2516_v40 = vadd.f32 1.0, %v2500_v38  ;;  %v2706_v54 = vsub.f32 0.0, %v2482_v41 }
 0x77f   : > { %v2515_v46 = vadd.f32 1.0, %v2499_v39  ;;  %v6287_v55 = vand.u32 2147483647, %v6279_v49  ;;  %v2715_v0 = vmul.f32 %v2699_v45, %v2475_v28  ;;  %v1580_v15 = vsub.s32 5, %v5390_v60 }
 0x780   : > { %5120 = vrcp.f32 %v2514_v37  ;;  %v2714_v16 = vmul.f32 %v2698_v51, %v2474_v5  ;;  %v2700_v20 = vsub.f32 0.0, %v6238_v6  ;;  %v2701_v21 = vsub.f32 0.0, %v6249_v22 }
 0x781   : > { %5122 = vrcp.f32 %v2516_v40  ;;  %v2501_v12 = vmul.f32 0.3275911, %v6287_v55  ;;  %v2722_v48 = vmul.f32 %v2706_v54, %v2482_v41  ;;  %v2732_v37 = vmul.f32 1.442695, %v2715_v0 }
 0x782   : > { %5124 = vrcp.f32 %v2515_v46  ;;  %v2708_v39 = vsub.f32 0.0, %v2484_v33  ;;  %v2707_v40 = vsub.f32 0.0, %v6270_v35  ;;  %v2730_v46 = vmul.f32 1.442695, %v2714_v16 }
 0x783   : > { %v2517_v47 = vadd.f32 1.0, %v2501_v12  ;;  %v2716_v30 = vmul.f32 %v2700_v20, %v6238_v6  ;;  %v2717_v51 = vmul.f32 %v2701_v21, %v6249_v22  ;;  %v1588_v54 = vsub.s32 7, %v5390_v60 }
 0x784   : > { %v2723_v16 = vmul.f32 %v2707_v40, %v6270_v35  ;;  %vm2444_vm4 = vcmp.lt.f32.partialorder %v6230_v2, 0.0  ;;  %vm2443_vm5 = vcmp.lt.f32.partialorder %v6241_v7, 0.0  ;;  %vm2450_vm6 = vcmp.lt.f32.partialorder %v6259_v26, 0.0 }
 0x785   : > { %5126 = vrcp.f32 %v2517_v47  ;;  %v2736_v20 = vmul.f32 1.442695, %v2717_v51  ;;  %vm2445_vm7 = vcmp.lt.f32.partialorder %v6246_v11, 0.0  ;;  %vm2452_vm8 = vcmp.lt.f32.partialorder %v6262_v29, 0.0 }
 0x786   : > { %5128 = vpow2.f32 %v2732_v37  ;;  %vm2451_vm9 = vcmp.lt.f32.partialorder %v6266_v31, 0.0  ;;  %vm2453_vm10 = vcmp.lt.f32.partialorder %v6279_v49, 0.0  ;;  %v2418_v11 = vmul.f32 0.5, %v6251_v23 }
 0x787   : > { %5130 = vpow2.f32 %v2730_v46 }
 0x788   : > { %v6276_v44 = vpop.eup %5112 }
 0x789   : > { %v6282_v34 = vpop.eup %5114  ;;  %v2554_v50 = vmul.f32 1.0614054, %v6276_v44 }
 0x78a   : > { %v2556_v52 = vmul.f32 1.0614054, %v6282_v34  ;;  %v6292_v57 = vpop.eup %5116 }
 0x78b   : > { %v2570_v53 = vadd.f32 -1.4531521, %v2554_v50  ;;  %v2555_v10 = vmul.f32 1.0614054, %v6292_v57  ;;  %v6304_v28 = vpop.eup %5118 }
 0x78c   : > { %v2572_v63 = vadd.f32 -1.4531521, %v2556_v52  ;;  %v2557_v38 = vmul.f32 1.0614054, %v6304_v28  ;;  %v2746_v52 = vmul.f32 1.442695, %v2722_v48 }
 0x78d   : > { %v2586_v9 = vmul.f32 %v6276_v44, %v2570_v53  ;;  %v2571_v27 = vadd.f32 -1.4531521, %v2555_v10  ;;  %v6313_v53 = vrot.slane %v6213_v32, %v1580_v15  ;;  %v2724_v10 = vmul.f32 %v2708_v39, %v2484_v33 }
 0x78e   : > { %v2588_v17 = vmul.f32 %v6282_v34, %v2572_v63  ;;  %v2573_v50 = vadd.f32 -1.4531521, %v2557_v38  ;;  %v6316_v63 = vpop.eup %5120  ;;  %v2734_v15 = vmul.f32 1.442695, %v2716_v30  ;;  %5132 = vpow2.f32 %v2746_v52 }
 0x78f   : > { %v2602_v42 = vadd.f32 1.4214138, %v2586_v9  ;;  %v2587_v45 = vmul.f32 %v6292_v57, %v2571_v27  ;;  %v2562_v22 = vmul.f32 1.0614054, %v6316_v63  ;;  %v6323_v60 = vpop.eup %5122  ;;  %v2709_v27 = vsub.f32 0.0, %v6287_v55 }
 0x790   : > { %v2604_v43 = vadd.f32 1.4214138, %v2588_v17  ;;  %v2589_v9 = vmul.f32 %v6304_v28, %v2573_v50  ;;  %v2564_v47 = vmul.f32 1.0614054, %v6323_v60  ;;  %v2750_v37 = vmul.f32 1.442695, %v2724_v10  ;;  %v6329_v38 = vpop.eup %5124 }
 0x791   : > { %v2618_v5 = vmul.f32 %v6276_v44, %v2602_v42  ;;  %v2603_v41 = vadd.f32 1.4214138, %v2587_v45  ;;  %v2578_v42 = vadd.f32 -1.4531521, %v2562_v22  ;;  %5134 = vpow2.f32 %v2734_v15 }
 0x792   : > { %v2620_v12 = vmul.f32 %v6282_v34, %v2604_v43  ;;  %v2605_v17 = vadd.f32 1.4214138, %v2589_v9  ;;  %v2580_v45 = vadd.f32 -1.4531521, %v2564_v47  ;;  %v2563_v46 = vmul.f32 1.0614054, %v6329_v38 }
 0x793   : > { %v2634_v0 = vadd.f32 -0.28449672, %v2618_v5  ;;  %v2619_v6 = vmul.f32 %v6292_v57, %v2603_v41  ;;  %v2594_v40 = vmul.f32 %v6316_v63, %v2578_v42  ;;  %v2748_v5 = vmul.f32 1.442695, %v2723_v16 }
 0x794   : > { %v2621_v48 = vmul.f32 %v6304_v28, %v2605_v17  ;;  %v2636_v35 = vadd.f32 -0.28449672, %v2620_v12  ;;  %5136 = vpow2.f32 %v2736_v20  ;;  %v2725_v51 = vmul.f32 %v2709_v27, %v6287_v55 }
 0x795   : > { %v2635_v21 = vadd.f32 -0.28449672, %v2619_v6  ;;  %v2650_v33 = vmul.f32 %v6276_v44, %v2634_v0  ;;  %v2610_v50 = vadd.f32 1.4214138, %v2594_v40  ;;  %v2596_v52 = vmul.f32 %v6323_v60, %v2580_v45  ;;  %v6342_v6 = vpop.eup %5126 }
 0x796   : > { %v2637_v43 = vadd.f32 -0.28449672, %v2621_v48  ;;  %5138 = vpow2.f32 %v2750_v37  ;;  %v2579_v0 = vadd.f32 -1.4531521, %v2563_v46  ;;  %v6340_v12 = vrot.slane %v6213_v32, %v1588_v54 }
 0x797   : > { %v2651_v39 = vmul.f32 %v6292_v57, %v2635_v21  ;;  %v2666_v41 = vadd.f32 0.2548296, %v2650_v33  ;;  %v2626_v10 = vmul.f32 %v6316_v63, %v2610_v50  ;;  %v2652_v22 = vmul.f32 %v6282_v34, %v2636_v35  ;;  %v5129_v33 = vpop.eup %5128 }
 0x798   : > { %v2653_v9 = vmul.f32 %v6304_v28, %v2637_v43  ;;  %v2612_v16 = vadd.f32 1.4214138, %v2596_v52  ;;  %v2595_v55 = vmul.f32 %v6329_v38, %v2579_v0  ;;  %5140 = vpow2.f32 %v2748_v5 }
 0x799   : > { %v2667_v30 = vadd.f32 0.2548296, %v2651_v39  ;;  %v2642_v17 = vadd.f32 -0.28449672, %v2626_v10  ;;  %v2565_v20 = vmul.f32 1.0614054, %v6342_v6  ;;  %v2682_v32 = vmul.f32 %v6276_v44, %v2666_v41  ;;  %v5131_v44 = vpop.eup %5130 }
 0x79a   : > { %v2752_v21 = vmul.f32 1.442695, %v2725_v51  ;;  %v6349_v42 = vmul.f32 0.5, %v6222_v58  ;;  %v2628_v54 = vmul.f32 %v6323_v60, %v2612_v16  ;;  %v2611_v27 = vadd.f32 1.4214138, %v2595_v55 }
 0x79b   : > { %v2683_v15 = vmul.f32 %v6292_v57, %v2667_v30  ;;  %v2669_v48 = vadd.f32 0.2548296, %v2653_v9  ;;  %v2658_v47 = vmul.f32 %v6316_v63, %v2642_v17  ;;  %v2581_v37 = vadd.f32 -1.4531521, %v2565_v20  ;;  %v5133_v46 = vpop.eup %5132 }
 0x79c   : > { %v5207_v57 = vmov 1.0   ;;  %v2668_v39 = vadd.f32 0.2548296, %v2652_v22  ;;  %v2644_v58 = vadd.f32 -0.28449672, %v2628_v54  ;;  %v2627_v40 = vmul.f32 %v6329_v38, %v2611_v27 }
 0x79d   : > { %v2458_v35 = vsel %vm2442_vm3, -1.0, %v5207_v57  ;;  %v2763_v5 = vmul.f32 %v5129_v33, %v2683_v15  ;;  %v2674_v43 = vadd.f32 0.2548296, %v2658_v47  ;;  %v2597_v45 = vmul.f32 %v6342_v6, %v2581_v37 }
 0x79e   : > { %5142 = vpow2.f32 %v2752_v21  ;;  %v2762_v30 = vmul.f32 %v5131_v44, %v2682_v32  ;;  %v2660_v50 = vmul.f32 %v6323_v60, %v2644_v58  ;;  %v2643_v51 = vadd.f32 -0.28449672, %v2627_v40  ;;  %v5135_v7 = vpop.eup %5134 }
 0x79f   : > { %v2460_v1 = vsel %vm2444_vm4, -1.0, %v5207_v57  ;;  %v2685_v41 = vmul.f32 %v6304_v28, %v2669_v48  ;;  %v2690_v52 = vmul.f32 %v6316_v63, %v2674_v43  ;;  %v2613_v0 = vadd.f32 1.4214138, %v2597_v45 }
 0x7a0   : > { %v2684_v9 = vmul.f32 %v6282_v34, %v2668_v39  ;;  %v2676_v10 = vadd.f32 0.2548296, %v2660_v50  ;;  %v2659_v22 = vmul.f32 %v6329_v38, %v2643_v51  ;;  %v2459_v16 = vsel %vm2443_vm5, -1.0, %v5207_v57 }
 0x7a1   : > { %v2779_v55 = vsub.f32 1.0, %v2763_v5  ;;  %v2770_v15 = vmul.f32 %v5133_v46, %v2690_v52  ;;  %v2629_v2 = vmul.f32 %v6342_v6, %v2613_v0  ;;  %v5137_v17 = vpop.eup %5136  ;;  %v2778_v20 = vsub.f32 1.0, %v2762_v30 }
 0x7a2   : > { %v2692_v28 = vmul.f32 %v6323_v60, %v2676_v10  ;;  %v2675_v63 = vadd.f32 0.2548296, %v2659_v22  ;;  %v2765_v21 = vmul.f32 %v5137_v17, %v2685_v41  ;;  %v2466_v26 = vsel %vm2450_vm6, -1.0, %v5207_v57 }
 0x7a3   : > { %v5139_v34 = vpop.eup %5138  ;;  %v2786_v32 = vsub.f32 1.0, %v2770_v15  ;;  %v2645_v54 = vadd.f32 -0.28449672, %v2629_v2  ;;  %v2764_v27 = vmul.f32 %v5135_v7, %v2684_v9  ;;  %v2795_v37 = vmul.f32 %v2779_v55, %v2459_v16 }
 0x7a4   : > { %v2772_v33 = vmul.f32 %v5139_v34, %v2692_v28  ;;  %v2691_v48 = vmul.f32 %v6329_v38, %v2675_v63  ;;  %v2794_v58 = vmul.f32 %v2778_v20, %v2458_v35  ;;  %v2411_v40 = vmul.f32 0.5, %v6232_v3 }
 0x7a5   : > { %v5141_v47 = vpop.eup %5140  ;;  %v2802_v39 = vmul.f32 %v2786_v32, %v2466_v26  ;;  %v2661_v60 = vmul.f32 %v6342_v6, %v2645_v54  ;;  %v2413_v43 = vmul.f32 0.5, %v6234_v4  ;;  %v2461_v45 = vsel %vm2445_vm7, -1.0, %v5207_v57 }
 0x7a6   : > { %v2788_v44 = vsub.f32 1.0, %v2772_v33  ;;  %v2771_v5 = vmul.f32 %v5141_v47, %v2691_v48  ;;  %v2781_v46 = vsub.f32 1.0, %v2765_v21  ;;  %v2780_v30 = vsub.f32 1.0, %v2764_v27 }
 0x7a7   : > { %v2677_v38 = vadd.f32 0.2548296, %v2661_v60  ;;  %v2468_v31 = vsel %vm2452_vm8, -1.0, %v5207_v57  ;;  %v2467_v50 = vsel %vm2451_vm9, -1.0, %v5207_v57  ;;  %v2811_v51 = vadd.f32 1.0, %v2795_v37 }
 0x7a8   : > { %v2787_v35 = vsub.f32 1.0, %v2771_v5  ;;  %v2818_v3 = vadd.f32 1.0, %v2802_v39  ;;  %v2810_v52 = vadd.f32 1.0, %v2794_v58  ;;  %v2804_v0 = vmul.f32 %v2788_v44, %v2468_v31  ;;  %v4928_v37 = vld [vmem:[%s6947_s6 + $0x270] ss:$8 sps:$4 sm:$0xff]  }
 0x7a9   : > { %v2693_v4 = vmul.f32 %v6342_v6, %v2677_v38  ;;  %v2797_v7 = vmul.f32 %v2781_v46, %v2461_v45  ;;  %v2796_v15 = vmul.f32 %v2780_v30, %v2460_v1  ;;  %v2419_v2 = vmul.f32 0.5, %v6255_v25  ;;  %v4936_v5 = vld [vmem:[%s6947_s6 + $0x264] ss:$8 sps:$4 sm:$0xff]  }
 0x7aa   : > { %v2803_v9 = vmul.f32 %v2787_v35, %v2467_v50  ;;  %v2469_v23 = vsel %vm2453_vm10, -1.0, %v5207_v57  ;;  %v2827_v20 = vmul.f32 %v2811_v51, %v2411_v40  ;;  %v2834_v28 = vmul.f32 %v2818_v3, %v2418_v11  ;;  %v4942_v11 = vld [vmem:[%s6947_s6 + $0x254] ss:$8 sps:$4 sm:$0xff]  }
 0x7ab   : > { %v5143_v41 = vpop.eup %5142  ;;  %v2820_v21 = vadd.f32 1.0, %v2804_v0  ;;  %v2826_v25 = vmul.f32 %v2810_v52, %v6349_v42  ;;  %v2813_v54 = vadd.f32 1.0, %v2797_v7  ;;  %v2812_v33 = vadd.f32 1.0, %v2796_v15 }
 0x7ac   : > { %v2773_v29 = vmul.f32 %v5143_v41, %v2693_v4  ;;  %v2819_v6 = vadd.f32 1.0, %v2803_v9  ;;  %v2420_v48 = vmul.f32 0.5, %v6253_v24  ;;  %v2421_v42 = vmul.f32 0.5, %v6272_v36  ;;  %v4934_v4 = vld [vmem:[%s6947_s6 + $0x260] ss:$8 sps:$4 sm:$0xff]  }
 0x7ad   : > { %v2842_v58 = vpack.c.bf16 %v2834_v28, %v2826_v25  ;;  %v2412_v24 = vmul.f32 0.5, %v6224_v59  ;;  %v2829_v30 = vmul.f32 %v2813_v54, %v2413_v43  ;;  %v4931_v43 = vld [vmem:[%s6947_s6 + $0x370] ss:$8 sps:$4 sm:$0xff]   ;;  %v4945_v28 = vld [vmem:[%s6947_s6 + $0x354] ss:$8 sps:$4 sm:$0xff]   ;;  %vm4231_vm7 = vcmask 124928  }
 0x7ae   : > { %v2789_v63 = vsub.f32 1.0, %v2773_v29  ;;  %v2835_v26 = vmul.f32 %v2819_v6, %v2419_v2  ;;  %v2836_v45 = vmul.f32 %v2820_v21, %v2420_v48  ;;  %v4937_v2 = vld [vmem:[%s6947_s6 + $0x360] ss:$8 sps:$4 sm:$0xff]   ;;  %v4943_v25 = vld [vmem:[%s6947_s6 + $0x350] ss:$8 sps:$4 sm:$0xff]  }
 0x7af   : > { %v2828_v51 = vmul.f32 %v2812_v33, %v2412_v24  ;;  %v4954_v48 = vld [vmem:[%s6947_s6 + $0x234] ss:$8 sps:$4 sm:$0xff]   ;;  %v4949_v24 = vld [vmem:[%s6947_s6 + $0x340] ss:$8 sps:$4 sm:$0xff]  }
 0x7b0   : > { %v2358_v10 = vpop.f32.mrf.mxu1  ;;  %v2401_v22 = vpop.f32.mrf.mxu0  ;;  %v2805_v49 = vmul.f32 %v2789_v63, %v2469_v23  ;;  %v2843_v47 = vpack.c.bf16 %v2835_v26, %v2827_v20  ;;  %v4940_v23 = vld [vmem:[%s6947_s6 + $0x250] ss:$8 sps:$4 sm:$0xff]   ;;  %v4948_v20 = vld [vmem:[%s6947_s6 + $0x244] ss:$8 sps:$4 sm:$0xff]  }
 0x7b1   : > { %v6392_v16 = vadd.f32 %v2358_v10, %v6290_v56  ;;  %v6395_v55 = vadd.f32 %v2401_v22, %v6295_v8  ;;  %v2844_v0 = vpack.c.bf16 %v2836_v45, %v2828_v51  ;;  %v4939_v10 = vld [vmem:[%s6947_s6 + $0x364] ss:$8 sps:$4 sm:$0xff]  }
 0x7b2   : > { %v2360_v17 = vpop.f32.mrf.mxu1  ;;  %v2403_v60 = vpop.f32.mrf.mxu0  ;;  %v2821_v40 = vadd.f32 1.0, %v2805_v49  ;;  %3650 = vmatprep.mubr.bf16.mxu1 %v2843_v47  ;;  %v4960_v45 = vld [vmem:[%s6947_s6 + $0x224] ss:$8 sps:$4 sm:$0xff]  }
 0x7b3   : > { %v6402_v34 = vmul.f32 0.70710677, %v6392_v16  ;;  %v6405_v32 = vmul.f32 0.70710677, %v6395_v55  ;;  %v6408_v1 = vadd.f32 %v2360_v17, %v6313_v53  ;;  %3651 = vmatmul.mubr.bf16.vlgmr.msra.gmra.mxu1 %v2842_v58  ;;  %v6432_v50 = vadd.f32 %v2403_v60, %v6340_v12  ;;  %v4951_v60 = vld [vmem:[%s6947_s6 + $0x344] ss:$8 sps:$4 sm:$0xff]  }
 0x7b4   : > { %v2837_v31 = vmul.f32 %v2821_v40, %v2421_v42  ;;  %v2362_v35 = vpop.f32.mrf.mxu1  ;;  %3705 = vmatpush1.bf16.msra.mxu1 %v4928_v37  ;;  %v2405_v52 = vpop.f32.mrf.mxu0 }
 0x7b5   : > { %v6412_v27 = vand.u32 2147483647, %v6402_v34  ;;  %v6419_v39 = vand.u32 2147483647, %v6405_v32  ;;  %v6429_v38 = vmul.f32 0.70710677, %v6408_v1  ;;  %3706 = vmatprep.subr.bf16.mxu1 %v4936_v5  ;;  %v6454_v7 = vadd.f32 %v2362_v35, %v6290_v56 }
 0x7b6   : > { %v2845_v41 = vpack.c.bf16 %v2837_v31, %v2829_v30  ;;  %v6451_v22 = vmul.f32 0.70710677, %v6432_v50  ;;  %v2364_v29 = vpop.f32.mrf.mxu1  ;;  %v6460_v6 = vadd.f32 %v2405_v52, %v6295_v8  ;;  %v2407_v33 = vpop.f32.mrf.mxu0  ;;  %v4957_v31 = vld [vmem:[%s6947_s6 + $0x334] ss:$8 sps:$4 sm:$0xff]   ;;  %v4958_v52 = vld [vmem:[%s6947_s6 + $0x220] ss:$8 sps:$4 sm:$0xff]  }
 0x7b7   : > { %v2494_v44 = vmul.f32 0.3275911, %v6412_v27  ;;  %v2496_v46 = vmul.f32 0.3275911, %v6419_v39  ;;  %v6435_v59 = vand.u32 2147483647, %v6429_v38  ;;  %v6475_v8 = vadd.f32 %v2364_v29, %v6313_v53 }
 0x7b8   : > { %3693 = vmatprep.mubr.bf16.mxu0 %v2845_v41  ;;  %3707 = vmatpush1.bf16.msra.mxu1 %v4934_v4  ;;  %v6466_v17 = vand.u32 2147483647, %v6451_v22  ;;  %v6469_v56 = vmul.f32 0.70710677, %v6454_v7  ;;  %v6485_v26 = vmul.f32 0.70710677, %v6460_v6  ;;  %v6508_v40 = vadd.f32 %v2407_v33, %v6340_v12 }
 0x7b9   : > { %v2510_v36 = vadd.f32 1.0, %v2494_v44  ;;  %v2512_v3 = vadd.f32 1.0, %v2496_v46  ;;  %v2495_v9 = vmul.f32 0.3275911, %v6435_v59  ;;  %3694 = vmatmul.mubr.bf16.vlgmr.msra.gmra.mxu0 %v2844_v0  ;;  %3708 = vmatprep.subr.bf16.mxu1 %v4942_v11  ;;  %v4946_v53 = vld [vmem:[%s6947_s6 + $0x240] ss:$8 sps:$4 sm:$0xff]  }
 0x7ba   : > { %3748 = vmatpush1.bf16.msra.mxu0 %v4931_v43  ;;  %v2497_v63 = vmul.f32 0.3275911, %v6466_v17  ;;  %v6482_v21 = vand.u32 2147483647, %v6469_v56  ;;  %v6498_v47 = vand.u32 2147483647, %v6485_v26 }
 0x7bb   : > { %5144 = vrcp.f32 %v2510_v36  ;;  %v2511_v15 = vadd.f32 1.0, %v2495_v9  ;;  %3749 = vmatprep.subr.bf16.mxu0 %v4939_v10  ;;  %v6501_v37 = vmul.f32 0.70710677, %v6475_v8  ;;  %v4952_v44 = vld [vmem:[%s6947_s6 + $0x230] ss:$8 sps:$4 sm:$0xff]   ;;  %v2702_v46 = vsub.f32 0.0, %v6412_v27 }
 0x7bc   : > { %5146 = vrcp.f32 %v2512_v3  ;;  %3709 = vmatpush1.bf16.msra.mxu1 %v4940_v23  ;;  %v2513_v54 = vadd.f32 1.0, %v2497_v63  ;;  %v2502_v49 = vmul.f32 0.3275911, %v6482_v21  ;;  %v2504_v42 = vmul.f32 0.3275911, %v6498_v47 }
 0x7bd   : > { %5148 = vrcp.f32 %v2511_v15  ;;  %3710 = vmatprep.subr.bf16.mxu1 %v4948_v20  ;;  %v6514_v5 = vand.u32 2147483647, %v6501_v37  ;;  %v2704_v51 = vsub.f32 0.0, %v6419_v39  ;;  %v4955_v4 = vld [vmem:[%s6947_s6 + $0x330] ss:$8 sps:$4 sm:$0xff]   ;;  %v2703_v9 = vsub.f32 0.0, %v6435_v59 }
 0x7be   : > { %3750 = vmatpush1.bf16.msra.mxu0 %v4937_v2  ;;  %5150 = vrcp.f32 %v2513_v54  ;;  %v2518_v58 = vadd.f32 1.0, %v2502_v49  ;;  %v2520_v30 = vadd.f32 1.0, %v2504_v42  ;;  %v6538_v43 = vmul.f32 0.70710677, %v6508_v40  ;;  %v4963_v11 = vld [vmem:[%s6947_s6 + $0x324] ss:$8 sps:$4 sm:$0xff]  }
 0x7bf   : > { %3751 = vmatprep.subr.bf16.mxu0 %v4945_v28  ;;  %v2503_v3 = vmul.f32 0.3275911, %v6514_v5  ;;  %v4966_v29 = vld [vmem:[%s6947_s6 + $0x214] ss:$8 sps:$4 sm:$0xff]   ;;  %v2718_v15 = vmul.f32 %v2702_v46, %v6412_v27  ;;  %v2705_v23 = vsub.f32 0.0, %v6466_v17  ;;  %v2712_v42 = vsub.f32 0.0, %v6498_v47 }
 0x7c0   : > { %3711 = vmatpush1.bf16.msra.mxu1 %v4946_v53  ;;  %5152 = vrcp.f32 %v2518_v58  ;;  %v6553_v20 = vand.u32 2147483647, %v6538_v43  ;;  %v2710_v53 = vsub.f32 0.0, %v6482_v21  ;;  %v4961_v27 = vld [vmem:[%s6947_s6 + $0x320] ss:$8 sps:$4 sm:$0xff]   ;;  %v2719_v58 = vmul.f32 %v2703_v9, %v6435_v59 }
 0x7c1   : > { %3712 = vmatprep.subr.bf16.mxu1 %v4954_v48  ;;  %5154 = vrcp.f32 %v2520_v30  ;;  %v2519_v10 = vadd.f32 1.0, %v2503_v3  ;;  %v4964_v33 = vld [vmem:[%s6947_s6 + $0x210] ss:$8 sps:$4 sm:$0xff]   ;;  %v2721_v46 = vmul.f32 %v2705_v23, %v6466_v17  ;;  %v4970_v17 = vld [vmem:[%s6947_s6 + $0x200] ss:$8 sps:$4 sm:$0xff]   ;;  %v2728_v9 = vmul.f32 %v2712_v42, %v6498_v47 }
 0x7c2   : > { %3752 = vmatpush1.bf16.msra.mxu0 %v4943_v25  ;;  %v2720_v25 = vmul.f32 %v2704_v51, %v6419_v39  ;;  %v2505_v49 = vmul.f32 0.3275911, %v6553_v20  ;;  %v4969_v39 = vld [vmem:[%s6947_s6 + $0x314] ss:$8 sps:$4 sm:$0xff]   ;;  %v4967_v59 = vld [vmem:[%s6947_s6 + $0x310] ss:$8 sps:$4 sm:$0xff]  }
 0x7c3   : > { %3753 = vmatprep.subr.bf16.mxu0 %v4951_v60  ;;  %5156 = vrcp.f32 %v2519_v10  ;;  %vm2446_vm11 = vcmp.lt.f32.partialorder %v6402_v34, 0.0  ;;  %vm2448_vm12 = vcmp.lt.f32.partialorder %v6405_v32, 0.0  ;;  %vm2454_vm13 = vcmp.lt.f32.partialorder %v6469_v56, 0.0  ;;  %v5005_v34 = vld [vmem:[%s6947_s6 + $0x3b4] ss:$8 sps:$4 sm:$0xff]  }
 0x7c4   : > { %3713 = vmatpush1.bf16.msra.mxu1 %v4952_v44  ;;  %v4972_v44 = vld [vmem:[%s6947_s6 + $0x204] ss:$8 sps:$4 sm:$0xff]   ;;  %v2521_v30 = vadd.f32 1.0, %v2505_v49  ;;  %v4976_v49 = vld [vmem:[%s6947_s6 + $0x2f0] ss:$8 sps:$4 sm:$0xff]   ;;  %vm2447_vm14 = vcmp.lt.f32.partialorder %v6429_v38, 0.0 }
 0x7c5   : > { %3714 = vmatprep.subr.bf16.mxu1 %v4960_v45  ;;  %vm2456_vm15 = vcmp.lt.f32.partialorder %v6485_v26, 0.0  ;;  %vm2455_vm0 = vcmp.lt.f32.partialorder %v6501_v37, 0.0  ;;  %v5009_v38 = vld [vmem:[%s6947_s6 + $0x3a0] ss:$8 sps:$4 sm:$0xff]   ;;  %vm2449_vm1 = vcmp.lt.f32.partialorder %v6451_v22, 0.0  ;;  %vm2457_vm2 = vcmp.lt.f32.partialorder %v6538_v43, 0.0 }
 0x7c6   : > { %3754 = vmatpush1.bf16.msra.mxu0 %v4949_v24  ;;  %v2738_v24 = vmul.f32 1.442695, %v2718_v15  ;;  %5158 = vrcp.f32 %v2521_v30  ;;  %v4975_v15 = vld [vmem:[%s6947_s6 + $0x304] ss:$8 sps:$4 sm:$0xff]   ;;  %v4979_v30 = vld [vmem:[%s6947_s6 + $0x3f0] ss:$8 sps:$4 sm:$0xff]  }
 0x7c7   : > { %3755 = vmatprep.subr.bf16.mxu0 %v4957_v31  ;;  %v2742_v31 = vmul.f32 1.442695, %v2720_v25  ;;  %v4973_v25 = vld [vmem:[%s6947_s6 + $0x300] ss:$8 sps:$4 sm:$0xff]   ;;  %v2471_v32 = vsel %vm2455_vm0, -1.0, %v5207_v57 }
 0x7c8   : > { %v6522_v12 = vpop.eup %5144  ;;  %3715 = vmatpush1.bf16.msra.mxu1 %v4958_v52  ;;  %5160 = vpow2.f32 %v2738_v24  ;;  %v2713_v24 = vsub.f32 0.0, %v6553_v20  ;;  %v5015_v22 = vld [vmem:[%s6947_s6 + $0x390] ss:$8 sps:$4 sm:$0xff]  }
 0x7c9   : > { %v6528_v36 = vpop.eup %5146  ;;  %v2558_v35 = vmul.f32 1.0614054, %v6522_v12  ;;  %3716 = vmatprep.subr.bf16.mxu1 %v4966_v29  ;;  %v2744_v29 = vmul.f32 1.442695, %v2721_v46  ;;  %5162 = vpow2.f32 %v2742_v31 }
 0x7ca   : > { %v2560_v41 = vmul.f32 1.0614054, %v6528_v36  ;;  %v6555_v28 = vpop.eup %5148  ;;  %3756 = vmatpush1.bf16.msra.mxu0 %v4955_v4 }
 0x7cb   : > { %v2574_v0 = vadd.f32 -1.4531521, %v2558_v35  ;;  %v2559_v54 = vmul.f32 1.0614054, %v6555_v28  ;;  %3757 = vmatprep.subr.bf16.mxu0 %v4963_v11  ;;  %v2726_v35 = vmul.f32 %v2710_v53, %v6482_v21  ;;  %v6582_v51 = vpop.eup %5150  ;;  %v4978_v21 = vld [vmem:[%s6947_s6 + $0x2f4] ss:$8 sps:$4 sm:$0xff]  }
 0x7cc   : > { %v2576_v2 = vadd.f32 -1.4531521, %v2560_v41  ;;  %v2711_v41 = vsub.f32 0.0, %v6514_v5  ;;  %3717 = vmatpush1.bf16.msra.mxu1 %v4964_v33  ;;  %v2740_v11 = vmul.f32 1.442695, %v2719_v58 }
 0x7cd   : > { %v2590_v63 = vmul.f32 %v6522_v12, %v2574_v0  ;;  %v2575_v45 = vadd.f32 -1.4531521, %v2559_v54  ;;  %v2561_v0 = vmul.f32 1.0614054, %v6582_v51  ;;  %3718 = vmatprep.subr.bf16.mxu1 %v4972_v44  ;;  %v4981_v58 = vld [vmem:[%s6947_s6 + $0x3f4] ss:$8 sps:$4 sm:$0xff]  }
 0x7ce   : > { %v2592_v60 = vmul.f32 %v6528_v36, %v2576_v2  ;;  %3758 = vmatpush1.bf16.msra.mxu0 %v4961_v27  ;;  %v6598_v2 = vpop.eup %5152  ;;  %v2727_v54 = vmul.f32 %v2711_v41, %v6514_v5  ;;  %5164 = vpow2.f32 %v2740_v11  ;;  %v4984_v5 = vld [vmem:[%s6947_s6 + $0x2e4] ss:$8 sps:$4 sm:$0xff]   ;;  %v4982_v41 = vld [vmem:[%s6947_s6 + $0x2e0] ss:$8 sps:$4 sm:$0xff]  }
 0x7cf   : > { %v2606_v48 = vadd.f32 1.4214138, %v2590_v63  ;;  %v2591_v4 = vmul.f32 %v6555_v28, %v2575_v45  ;;  %3759 = vmatprep.subr.bf16.mxu0 %v4969_v39  ;;  %v2577_v23 = vadd.f32 -1.4531521, %v2561_v0  ;;  %v2754_v63 = vmul.f32 1.442695, %v2726_v35  ;;  %v6609_v33 = vpop.eup %5154 }
 0x7d0   : > { %v2608_v52 = vadd.f32 1.4214138, %v2592_v60  ;;  %v2566_v27 = vmul.f32 1.0614054, %v6598_v2  ;;  %3719 = vmatpush1.bf16.msra.mxu1 %v4970_v17  ;;  %v2758_v60 = vmul.f32 1.442695, %v2728_v9  ;;  %5166 = vpow2.f32 %v2744_v29  ;;  %v6624_v31 = vpop.eup %5156 }
 0x7d1   : > { %v2622_v3 = vmul.f32 %v6522_v12, %v2606_v48  ;;  %v2607_v10 = vadd.f32 1.4214138, %v2591_v4  ;;  %v2593_v48 = vmul.f32 %v6582_v51, %v2577_v23  ;;  %3720 = vmatprep.subr.bf16.mxu1 %v4978_v21  ;;  %5168 = vpow2.f32 %v2754_v63  ;;  %v4990_v17 = vld [vmem:[%s6947_s6 + $0x2d4] ss:$8 sps:$4 sm:$0xff]   ;;  %v4987_v29 = vld [vmem:[%s6947_s6 + $0x3e4] ss:$8 sps:$4 sm:$0xff]  }
 0x7d2   : > { %v2624_v39 = vmul.f32 %v6528_v36, %v2608_v52  ;;  %3760 = vmatpush1.bf16.msra.mxu0 %v4967_v59  ;;  %v2582_v44 = vadd.f32 -1.4531521, %v2566_v27  ;;  %v2568_v46 = vmul.f32 1.0614054, %v6609_v33  ;;  %v2756_v4 = vmul.f32 1.442695, %v2727_v54 }
 0x7d3   : > { %v2638_v47 = vadd.f32 -0.28449672, %v2622_v3  ;;  %v2623_v53 = vmul.f32 %v6555_v28, %v2607_v10  ;;  %3761 = vmatprep.subr.bf16.mxu0 %v4975_v15  ;;  %v2609_v45 = vadd.f32 1.4214138, %v2593_v48  ;;  %v2567_v0 = vmul.f32 1.0614054, %v6624_v31  ;;  %v6649_v54 = vpop.eup %5158 }
 0x7d4   : > { %v2598_v3 = vmul.f32 %v6598_v2, %v2582_v44  ;;  %3721 = vmatpush2.bf16.msra.mxu1 %v4976_v49  ;;  %v2640_v21 = vadd.f32 -0.28449672, %v2624_v39  ;;  %v2584_v11 = vadd.f32 -1.4531521, %v2568_v46  ;;  %5170 = vpow2.f32 %v2758_v60 }
 0x7d5   : > { %v2639_v42 = vadd.f32 -0.28449672, %v2623_v53  ;;  %v2654_v35 = vmul.f32 %v6522_v12, %v2638_v47  ;;  %v2625_v52 = vmul.f32 %v6582_v51, %v2609_v45  ;;  %3722 = vmatprep.subr.bf16.mxu1 %v4984_v5  ;;  %v2729_v10 = vmul.f32 %v2713_v24, %v6553_v20  ;;  %v4988_v20 = vld [vmem:[%s6947_s6 + $0x2d0] ss:$8 sps:$4 sm:$0xff]   ;;  %v4996_v5 = vld [vmem:[%s6947_s6 + $0x2c4] ss:$8 sps:$4 sm:$0xff]   ;;  %v5161_v45 = vpop.eup %5160 }
 0x7d6   : > { %3762 = vmatpush1.bf16.msra.mxu0 %v4973_v25  ;;  %v2614_v9 = vadd.f32 1.4214138, %v2598_v3  ;;  %v2600_v63 = vmul.f32 %v6609_v33, %v2584_v11  ;;  %v2583_v47 = vadd.f32 -1.4531521, %v2567_v0  ;;  %5172 = vpow2.f32 %v2756_v4  ;;  %v4985_v25 = vld [vmem:[%s6947_s6 + $0x3e0] ss:$8 sps:$4 sm:$0xff]   ;;  %v5163_v3 = vpop.eup %5162 }
 0x7d7   : > { %v2655_v59 = vmul.f32 %v6555_v28, %v2639_v42  ;;  %3763 = vmatprep.subr.bf16.mxu0 %v4981_v58  ;;  %v2641_v23 = vadd.f32 -0.28449672, %v2625_v52  ;;  %v2670_v53 = vadd.f32 0.2548296, %v2654_v35  ;;  %v2656_v49 = vmul.f32 %v6528_v36, %v2640_v21  ;;  %v4993_v58 = vld [vmem:[%s6947_s6 + $0x3d4] ss:$8 sps:$4 sm:$0xff]  }
 0x7d8   : > { %v2630_v27 = vmul.f32 %v6598_v2, %v2614_v9  ;;  %3723 = vmatpush2.bf16.msra.mxu1 %v4982_v41  ;;  %v2616_v48 = vadd.f32 1.4214138, %v2600_v63  ;;  %v2599_v60 = vmul.f32 %v6624_v31, %v2583_v47  ;;  %v2569_v44 = vmul.f32 1.0614054, %v6649_v54  ;;  %v4994_v52 = vld [vmem:[%s6947_s6 + $0x2c0] ss:$8 sps:$4 sm:$0xff]  }
 0x7d9   : > { %v2671_v15 = vadd.f32 0.2548296, %v2655_v59  ;;  %v2657_v39 = vmul.f32 %v6582_v51, %v2641_v23  ;;  %3724 = vmatprep.subr.bf16.mxu1 %v4990_v17  ;;  %v2760_v24 = vmul.f32 1.442695, %v2729_v10  ;;  %v4991_v59 = vld [vmem:[%s6947_s6 + $0x3d0] ss:$8 sps:$4 sm:$0xff]   ;;  %v2686_v4 = vmul.f32 %v6522_v12, %v2670_v53 }
 0x7da   : > { %3764 = vmatpush2.bf16.msra.mxu0 %v4979_v30  ;;  %v2646_v42 = vadd.f32 -0.28449672, %v2630_v27  ;;  %v2632_v35 = vmul.f32 %v6609_v33, %v2616_v48  ;;  %v2615_v30 = vadd.f32 1.4214138, %v2599_v60  ;;  %v2585_v21 = vadd.f32 -1.4531521, %v2569_v44 }
 0x7db   : > { %3765 = vmatprep.subr.bf16.mxu0 %v4987_v29  ;;  %v2687_v46 = vmul.f32 %v6555_v28, %v2671_v15  ;;  %v2673_v41 = vadd.f32 0.2548296, %v2657_v39  ;;  %v2672_v28 = vadd.f32 0.2548296, %v2656_v49  ;;  %v5002_v9 = vld [vmem:[%s6947_s6 + $0x2b4] ss:$8 sps:$4 sm:$0xff]   ;;  %v5165_v12 = vpop.eup %5164  ;;  %5174 = vpow2.f32 %v2760_v24 }
 0x7dc   : > { %v2662_v17 = vmul.f32 %v6598_v2, %v2646_v42  ;;  %3725 = vmatpush2.bf16.msra.mxu1 %v4988_v20  ;;  %v2648_v11 = vadd.f32 -0.28449672, %v2632_v35  ;;  %v2631_v0 = vmul.f32 %v6624_v31, %v2615_v30  ;;  %v2601_v29 = vmul.f32 %v6649_v54, %v2585_v21  ;;  %v4999_v15 = vld [vmem:[%s6947_s6 + $0x3c4] ss:$8 sps:$4 sm:$0xff]   ;;  %v4997_v48 = vld [vmem:[%s6947_s6 + $0x3c0] ss:$8 sps:$4 sm:$0xff]  }
 0x7dd   : > { %3726 = vmatprep.subr.bf16.mxu1 %v4996_v5  ;;  %v5167_v23 = vpop.eup %5166  ;;  %v2767_v63 = vmul.f32 %v5165_v12, %v2687_v46  ;;  %v2689_v20 = vmul.f32 %v6582_v51, %v2673_v41  ;;  %v5000_v60 = vld [vmem:[%s6947_s6 + $0x2b0] ss:$8 sps:$4 sm:$0xff]   ;;  %v2688_v5 = vmul.f32 %v6528_v36, %v2672_v28  ;;  %v2470_v28 = vsel %vm2454_vm13, -1.0, %v5207_v57 }
 0x7de   : > { %3766 = vmatpush2.bf16.msra.mxu0 %v4985_v25  ;;  %v2678_v10 = vadd.f32 0.2548296, %v2662_v17  ;;  %v2664_v47 = vmul.f32 %v6609_v33, %v2648_v11  ;;  %v2647_v53 = vadd.f32 -0.28449672, %v2631_v0  ;;  %v5169_v27 = vpop.eup %5168  ;;  %v2766_v25 = vmul.f32 %v5161_v45, %v2686_v4  ;;  %v5006_v17 = vld [vmem:[%s6947_s6 + $0x2a0] ss:$8 sps:$4 sm:$0xff]  }
 0x7df   : > { %3767 = vmatprep.subr.bf16.mxu0 %v4993_v58  ;;  %v2617_v39 = vadd.f32 1.4214138, %v2601_v29  ;;  %v2462_v58 = vsel %vm2446_vm11, -1.0, %v5207_v57  ;;  %v2783_v45 = vsub.f32 1.0, %v2767_v63 }
 0x7e0   : > { %v2694_v49 = vmul.f32 %v6598_v2, %v2678_v10  ;;  %3727 = vmatpush2.bf16.msra.mxu1 %v4994_v52  ;;  %v2680_v42 = vadd.f32 0.2548296, %v2664_v47  ;;  %v2663_v51 = vmul.f32 %v6624_v31, %v2647_v53  ;;  %v5008_v2 = vld [vmem:[%s6947_s6 + $0x2a4] ss:$8 sps:$4 sm:$0xff]   ;;  %v2782_v30 = vsub.f32 1.0, %v2766_v25 }
 0x7e1   : > { %3728 = vmatprep.subr.bf16.mxu1 %v5002_v9  ;;  %v2633_v24 = vmul.f32 %v6649_v54, %v2617_v39  ;;  %v5171_v36 = vpop.eup %5170  ;;  %v2768_v52 = vmul.f32 %v5163_v3, %v2688_v5  ;;  %v5014_v9 = vld [vmem:[%s6947_s6 + $0x294] ss:$8 sps:$4 sm:$0xff]   ;;  %v2463_v3 = vsel %vm2447_vm14, -1.0, %v5207_v57  ;;  %v5012_v53 = vld [vmem:[%s6947_s6 + $0x290] ss:$8 sps:$4 sm:$0xff]  }
 0x7e2   : > { %3768 = vmatpush2.bf16.msra.mxu0 %v4991_v59  ;;  %v2774_v44 = vmul.f32 %v5169_v27, %v2694_v49  ;;  %v2696_v46 = vmul.f32 %v6609_v33, %v2680_v42  ;;  %v2679_v35 = vadd.f32 0.2548296, %v2663_v51  ;;  %v2769_v59 = vmul.f32 %v5167_v23, %v2689_v20  ;;  %v5003_v33 = vld [vmem:[%s6947_s6 + $0x3b0] ss:$8 sps:$4 sm:$0xff]   ;;  %v5020_v39 = vld [vmem:[%s6947_s6 + $0x284] ss:$8 sps:$4 sm:$0xff]  }
 0x7e3   : > { %3769 = vmatprep.subr.bf16.mxu0 %v4999_v15  ;;  %v2649_v41 = vadd.f32 -0.28449672, %v2633_v24  ;;  %v5173_v21 = vpop.eup %5172  ;;  %v2799_v10 = vmul.f32 %v2783_v45, %v2463_v3  ;;  %v2798_v23 = vmul.f32 %v2782_v30, %v2462_v58  ;;  %v2464_v27 = vsel %vm2448_vm12, -1.0, %v5207_v57 }
 0x7e4   : > { %v2790_v4 = vsub.f32 1.0, %v2774_v44  ;;  %3729 = vmatpush2.bf16.msra.mxu1 %v5000_v60  ;;  %v2776_v11 = vmul.f32 %v5171_v36, %v2696_v46  ;;  %v2695_v0 = vmul.f32 %v6624_v31, %v2679_v35  ;;  %v5011_v31 = vld [vmem:[%s6947_s6 + $0x3a4] ss:$8 sps:$4 sm:$0xff]   ;;  %v2785_v63 = vsub.f32 1.0, %v2769_v59 }
 0x7e5   : > { %3730 = vmatprep.subr.bf16.mxu1 %v5008_v2  ;;  %v2665_v56 = vmul.f32 %v6649_v54, %v2649_v41  ;;  %v2784_v25 = vsub.f32 1.0, %v2768_v52  ;;  %v2422_v20 = vmul.f32 0.5, %v6454_v7  ;;  %v2472_v60 = vsel %vm2456_vm15, -1.0, %v5207_v57  ;;  %v5017_v7 = vld [vmem:[%s6947_s6 + $0x394] ss:$8 sps:$4 sm:$0xff]  }
 0x7e6   : > { %3770 = vmatpush2.bf16.msra.mxu0 %v4997_v48  ;;  %v2806_v12 = vmul.f32 %v2790_v4, %v2470_v28  ;;  %v2792_v29 = vsub.f32 1.0, %v2776_v11  ;;  %v2775_v15 = vmul.f32 %v5173_v21, %v2695_v0  ;;  %v2815_v42 = vadd.f32 1.0, %v2799_v10  ;;  %v5023_v4 = vld [vmem:[%s6947_s6 + $0x384] ss:$8 sps:$4 sm:$0xff]   ;;  %v5021_v0 = vld [vmem:[%s6947_s6 + $0x380] ss:$8 sps:$4 sm:$0xff]  }
 0x7e7   : > { %3771 = vmatprep.subr.bf16.mxu0 %v5005_v34  ;;  %v2681_v47 = vadd.f32 0.2548296, %v2665_v56  ;;  %v2465_v51 = vsel %vm2449_vm1, -1.0, %v5207_v57  ;;  %v2814_v44 = vadd.f32 1.0, %v2798_v23  ;;  %v2800_v34 = vmul.f32 %v2784_v25, %v2464_v27  ;;  %v5027_v23 = vld [vmem:[%s6948_s7 + $0x60] ss:$8 sps:$4 sm:$0xff]  }
 0x7e8   : > { %3731 = vmatpush2.bf16.msra.mxu1 %v5006_v17  ;;  %v2791_v49 = vsub.f32 1.0, %v2775_v15  ;;  %v2822_v48 = vadd.f32 1.0, %v2806_v12  ;;  %v5175_v5 = vpop.eup %5174  ;;  %v2808_v2 = vmul.f32 %v2792_v29, %v2472_v60  ;;  %v2801_v24 = vmul.f32 %v2785_v63, %v2465_v51  ;;  %v5032_v63 = vld [vmem:[%s6948_s7 + $0x54] ss:$8 sps:$4 sm:$0xff]   ;;  %v5033_v27 = vld [vmem:[%s6948_s7 + $0x40] ss:$8 sps:$4 sm:$0xff]  }
 0x7e9   : > { %3732 = vmatprep.subr.bf16.mxu1 %v5014_v9  ;;  %v2697_v58 = vmul.f32 %v6649_v54, %v2681_v47  ;;  %v5018_v54 = vld [vmem:[%s6947_s6 + $0x280] ss:$8 sps:$4 sm:$0xff]   ;;  %v2415_v36 = vmul.f32 0.5, %v6408_v1  ;;  %v2423_v45 = vmul.f32 0.5, %v6475_v8  ;;  %v2414_v35 = vmul.f32 0.5, %v6392_v16 }
 0x7ea   : > { %3772 = vmatpush2.bf16.msra.mxu0 %v5003_v33  ;;  %v2807_v26 = vmul.f32 %v2791_v49, %v2471_v32  ;;  %v2838_v30 = vmul.f32 %v2822_v48, %v2422_v20  ;;  %v2824_v1 = vadd.f32 1.0, %v2808_v2  ;;  %v2473_v8 = vsel %vm2457_vm2, -1.0, %v5207_v57  ;;  %v5030_v47 = vld [vmem:[%s6948_s7 + $0x50] ss:$8 sps:$4 sm:$0xff]   ;;  %v5038_v25 = vld [vmem:[%s6948_s7 + $0x34] ss:$8 sps:$4 sm:$0xff]  }
 0x7eb   : > { %3773 = vmatprep.subr.bf16.mxu0 %v5011_v31  ;;  %v2777_v37 = vmul.f32 %v5175_v5, %v2697_v58  ;;  %v2831_v41 = vmul.f32 %v2815_v42, %v2415_v36  ;;  %v2830_v21 = vmul.f32 %v2814_v44, %v2414_v35  ;;  %v2817_v52 = vadd.f32 1.0, %v2801_v24  ;;  %v5036_v20 = vld [vmem:[%s6948_s7 + $0x30] ss:$8 sps:$4 sm:$0xff]   ;;  %v5041_v49 = vld [vmem:[%s6948_s7 + $0x24] ss:$8 sps:$4 sm:$0xff]  }
 0x7ec   : > { %3733 = vmatpush2.bf16.msra.mxu1 %v5012_v53  ;;  %v2823_v46 = vadd.f32 1.0, %v2807_v26  ;;  %v2816_v11 = vadd.f32 1.0, %v2800_v34  ;;  %v2424_v16 = vmul.f32 0.5, %v6460_v6  ;;  %v2417_v9 = vmul.f32 0.5, %v6432_v50  ;;  %v5024_v50 = vld [vmem:[%s6948_s7 + $0x70] ss:$8 sps:$4 sm:$0xff]  }
 0x7ed   : > { %3734 = vmatprep.subr.bf16.mxu1 %v5020_v39  ;;  %v2793_v59 = vsub.f32 1.0, %v2777_v37  ;;  %v2846_v3 = vpack.c.bf16 %v2838_v30, %v2830_v21  ;;  %v2425_v12 = vmul.f32 0.5, %v6508_v40  ;;  %v2416_v56 = vmul.f32 0.5, %v6395_v55  ;;  %v5026_v40 = vld [vmem:[%s6948_s7 + $0x74] ss:$8 sps:$4 sm:$0xff]  }
 0x7ee   : > { %3774 = vmatpush2.bf16.msra.mxu0 %v5009_v38  ;;  %v2839_v17 = vmul.f32 %v2823_v46, %v2423_v45  ;;  %v2840_v31 = vmul.f32 %v2824_v1, %v2424_v16  ;;  %v2833_v10 = vmul.f32 %v2817_v52, %v2417_v9  ;;  %v5029_v55 = vld [vmem:[%s6948_s7 + $0x64] ss:$8 sps:$4 sm:$0xff]   ;;  %v5039_v39 = vld [vmem:[%s6948_s7 + $0x20] ss:$8 sps:$4 sm:$0xff]   ;;  %v5044_v48 = vld [vmem:[%s6948_s7 + $0x14] ss:$8 sps:$4 sm:$0xff]  }
 0x7ef   : > { %3775 = vmatprep.subr.bf16.mxu0 %v5017_v7  ;;  %v2809_v28 = vmul.f32 %v2793_v59, %v2473_v8  ;;  %v2832_v6 = vmul.f32 %v2816_v11, %v2416_v56  ;;  %v5035_v53 = vld [vmem:[%s6948_s7 + $0x44] ss:$8 sps:$4 sm:$0xff]   ;;  %v5042_v60 = vld [vmem:[%s6948_s7 + $0x10] ss:$8 sps:$4 sm:$0xff]   ;;  %v5045_v58 = vld [vmem:[%s6948_s7] ss:$8 sps:$4 sm:$0xff]  }
 0x7f0   : > { %3735 = vmatpush2.bf16.msra.mxu1 %v5018_v54  ;;  %v2847_v33 = vpack.c.bf16 %v2839_v17, %v2831_v41  ;;  %v5047_v32 = vld [vmem:[%s6948_s7 + $0x4] ss:$8 sps:$4 sm:$0xff]   ;;  %v5050_v7 = vld [vmem:[%s6948_s7 + $0xf4] ss:$8 sps:$4 sm:$0xff]   ;;  %v5048_v5 = vld [vmem:[%s6948_s7 + $0xf0] ss:$8 sps:$4 sm:$0xff]  }
 0x7f1   : > { %v2825_v43 = vadd.f32 1.0, %v2809_v28  ;;  %v2848_v38 = vpack.c.bf16 %v2840_v31, %v2832_v6  ;;  %4014 = vmatprep.subr.bf16.mxu1 %v5026_v40  ;;  %v5053_v42 = vld [vmem:[%s6948_s7 + $0xe4] ss:$8 sps:$4 sm:$0xff]   ;;  %v5051_v51 = vld [vmem:[%s6948_s7 + $0xe0] ss:$8 sps:$4 sm:$0xff]  }
 0x7f2   : > { %3776 = vmatpush2.bf16.msra.mxu0 %v5015_v22  ;;  %3736 = vmatprep.mubr.bf16.mxu1 %v2847_v33  ;;  %v5056_v2 = vld [vmem:[%s6948_s7 + $0xd4] ss:$8 sps:$4 sm:$0xff]   ;;  %v5054_v26 = vld [vmem:[%s6948_s7 + $0xd0] ss:$8 sps:$4 sm:$0xff]   ;;  %v5059_v44 = vld [vmem:[%s6948_s7 + $0xc4] ss:$8 sps:$4 sm:$0xff]  }
 0x7f3   : > { %3777 = vmatprep.subr.bf16.mxu0 %v5023_v4  ;;  %v2841_v29 = vmul.f32 %v2825_v43, %v2425_v12  ;;  %3737 = vmatmul.mubr.bf16.vlgmr.msra.gmra.mxu1 %v2846_v3  ;;  %v5057_v24 = vld [vmem:[%s6948_s7 + $0xc0] ss:$8 sps:$4 sm:$0xff]   ;;  %v5062_v37 = vld [vmem:[%s6948_s7 + $0xb4] ss:$8 sps:$4 sm:$0xff]   ;;  %v5060_v54 = vld [vmem:[%s6948_s7 + $0xb0] ss:$8 sps:$4 sm:$0xff]  }
 0x7f4   : > { %4015 = vmatpush1.bf16.msra.mxu1 %v5024_v50  ;;  %v5065_v34 = vld [vmem:[%s6948_s7 + $0xa4] ss:$8 sps:$4 sm:$0xff]   ;;  %v5063_v36 = vld [vmem:[%s6948_s7 + $0xa0] ss:$8 sps:$4 sm:$0xff]   ;;  %v5068_v45 = vld [vmem:[%s6948_s7 + $0x94] ss:$8 sps:$4 sm:$0xff]  }
 0x7f5   : > { %v2849_v15 = vpack.c.bf16 %v2841_v29, %v2833_v10  ;;  %4016 = vmatprep.subr.bf16.mxu1 %v5029_v55  ;;  %v5066_v46 = vld [vmem:[%s6948_s7 + $0x90] ss:$8 sps:$4 sm:$0xff]   ;;  %v5069_v22 = vld [vmem:[%s6948_s7 + $0x80] ss:$8 sps:$4 sm:$0xff]   ;;  %v5071_v35 = vld [vmem:[%s6948_s7 + $0x84] ss:$8 sps:$4 sm:$0xff]  }
 0x7f6   : > { %3778 = vmatpush2.bf16.msra.mxu0 %v5021_v0  ;;  %v4298_v50 = vld [vmem:[%s6951_s10 + $0xa] sm:$0x3] }
 0x7f7   : > { %3779 = vmatprep.mubr.bf16.mxu0 %v2849_v15 }
 0x7f8   : > { %4017 = vmatpush1.bf16.msra.mxu1 %v5027_v23 }
 0x7f9   : > { %3780 = vmatmul.mubr.bf16.vlgmr.msra.gmra.mxu0 %v2848_v38  ;;  %4018 = vmatprep.subr.bf16.mxu1 %v5032_v63  ;;  %v3802_v63 = vrot.slane %v4298_v50, %v5393_v61 }
 0x7fc   : > { %4019 = vmatpush1.bf16.msra.mxu1 %v5030_v47 }
 0x7fd   : > { %4020 = vmatprep.subr.bf16.mxu1 %v5035_v53 }
 0x800   : > { %4021 = vmatpush1.bf16.msra.mxu1 %v5033_v27 }
 0x801   : > { %4022 = vmatprep.subr.bf16.mxu1 %v5038_v25  ;;  %v3798_v25 = vrot.slane %v4298_v50, %v5396_v62 }
 0x804   : > { %4023 = vmatpush1.bf16.msra.mxu1 %v5036_v20 }
 0x805   : > { %4024 = vmatprep.subr.bf16.mxu1 %v5041_v49 }
 0x808   : > { %4025 = vmatpush1.bf16.msra.mxu1 %v5039_v39 }
 0x809   : > { %4026 = vmatprep.subr.bf16.mxu1 %v5044_v48 }
 0x80c   : > { %4027 = vmatpush1.bf16.msra.mxu1 %v5042_v60 }
 0x80d   : > { %4028 = vmatprep.subr.bf16.mxu1 %v5047_v32 }
 0x810   : > { %4029 = vmatpush1.bf16.msra.mxu1 %v5045_v58 }
 0x811   : > { %4030 = vmatprep.subr.bf16.mxu1 %v5050_v7  ;;  %v4299_v7 = vld [vmem:[%s6951_s10 + $0xc] sm:$0x3] }
 0x814   : > { %4031 = vmatpush2.bf16.msra.mxu1 %v5048_v5  ;;  %v3847_v5 = vrot.slane %v4299_v7, %v5396_v62 }
 0x815   : > { %4032 = vmatprep.subr.bf16.mxu1 %v5053_v42  ;;  %v3851_v42 = vrot.slane %v4299_v7, %v5393_v61 }
 0x818   : > { %4033 = vmatpush2.bf16.msra.mxu1 %v5051_v51 }
 0x819   : > { %4034 = vmatprep.subr.bf16.mxu1 %v5056_v2 }
 0x81c   : > { %4035 = vmatpush2.bf16.msra.mxu1 %v5054_v26 }
 0x81d   : > { %4036 = vmatprep.subr.bf16.mxu1 %v5059_v44 }
 0x820   : > { %4037 = vmatpush2.bf16.msra.mxu1 %v5057_v24 }
 0x821   : > { %4038 = vmatprep.subr.bf16.mxu1 %v5062_v37 }
 0x824   : > { %4039 = vmatpush2.bf16.msra.mxu1 %v5060_v54 }
 0x825   : > { %4040 = vmatprep.subr.bf16.mxu1 %v5065_v34 }
 0x828   : > { %4041 = vmatpush2.bf16.msra.mxu1 %v5063_v36 }
 0x829   : > { %4042 = vmatprep.subr.bf16.mxu1 %v5068_v45 }
 0x82c   : > { %4043 = vmatpush2.bf16.msra.mxu1 %v5066_v46 }
 0x82d   : > { %4044 = vmatprep.subr.bf16.mxu1 %v5071_v35 }
 0x830   : > { %4045 = vmatpush2.bf16.msra.mxu1 %v5069_v22 }
 0x873   : > { %v3652_v30 = vpop.f32.mrf.mxu1 }
 0x875   : > { %v3654_v59 = vpop.f32.mrf.mxu1 }
 0x877   : > { %v3656_v41 = vpop.f32.mrf.mxu1 }
 0x879   : > { %v3695_v4 = vpop.f32.mrf.mxu0  ;;  %v3658_v17 = vpop.f32.mrf.mxu1 }
 0x87a   : > { %v3696_v11 = vadd.f32 %v3695_v4, %v3652_v30 }
 0x87b   : > { %v3697_v1 = vpop.f32.mrf.mxu0 }
 0x87c   : > { %v3698_v52 = vadd.f32 %v3697_v1, %v3654_v59 }
 0x87d   : > { %v3699_v8 = vpop.f32.mrf.mxu0 }
 0x87e   : > { %v3700_v0 = vadd.f32 %v3699_v8, %v3656_v41 }
 0x87f   : > { %v3701_v16 = vpop.f32.mrf.mxu0 }
 0x880   : > { %v3702_v43 = vadd.f32 %v3701_v16, %v3658_v17 }
 0x8b3   : > { %v3738_v21 = vpop.f32.mrf.mxu1 }
 0x8b4   : > { %v3739_v3 = vadd.f32 %v3738_v21, %v3696_v11 }
 0x8b5   : > { %v3740_v28 = vpop.f32.mrf.mxu1 }
 0x8b6   : > { %v3741_v33 = vadd.f32 %v3740_v28, %v3698_v52 }
 0x8b7   : > { %v3742_v9 = vpop.f32.mrf.mxu1 }
 0x8b8   : > { %v3743_v56 = vadd.f32 %v3742_v9, %v3700_v0 }
 0x8b9   : > { %v3781_v12 = vpop.f32.mrf.mxu0  ;;  %v3744_v31 = vpop.f32.mrf.mxu1 }
 0x8ba   : > { %v3745_v6 = vadd.f32 %v3744_v31, %v3702_v43  ;;  %v3782_v15 = vadd.f32 %v3781_v12, %v3739_v3 }
 0x8bb   : > { %v3783_v10 = vpop.f32.mrf.mxu0 }
 0x8bc   : > { %v3784_v29 = vadd.f32 %v3783_v10, %v3741_v33  ;;  %v3790_v27 = vadd.f32 %v3782_v15, %v5575_v13 }
 0x8bd   : > { %v3785_v38 = vpop.f32.mrf.mxu0 }
 0x8be   : > { %v3786_v40 = vadd.f32 %v3785_v38, %v3743_v56  ;;  %v3791_v23 = vadd.f32 %v3784_v29, %v5577_v14  ;;  %v3805_v60 = vadd.f32 %v3798_v25, %v3790_v27  ;;  %v6885_v14 = vld.sshfl [vmem:[%s6949_s8] sm:$0x33 pattern:$0x76325410] }
 0x8bf   : > { %v3787_v55 = vpop.f32.mrf.mxu0  ;;  %v4182_v13 = vcombine.high %v6885_v14, %v6885_v14 }
 0x8c0   : > { %v3792_v47 = vadd.f32 %v3786_v40, %v5581_v18  ;;  %v3788_v53 = vadd.f32 %v3787_v55, %v3745_v6  ;;  %v3806_v39 = vadd.f32 %v3802_v63, %v3791_v23  ;;  %v4168_v18 = vld [vmem:[%s6950_s9] sm:$0x7] }
 0x8c1   : > { %4217 = vmatprep.mubr.bf16.mxu0 %v4182_v13 }
 0x8c2   : > { %v3793_v20 = vadd.f32 %v3788_v53, %v5583_v19  ;;  %v3807_v49 = vadd.f32 %v3798_v25, %v3792_v47  ;;  %v5208_v19 = vmov 0  }
 0x8c3   : > { %4723 = vset.pattern.permute.xlu0 %v5208_v19 }
 0x8c4   : > { %v3808_v48 = vadd.f32 %v3802_v63, %v3793_v20  ;;  %v3809_v58 = vpack.c.bf16 %v3807_v49, %v3805_v60  ;;  %4171 = vperm.xlu0 %4723, %v4168_v18  }
 0x8c6   : > { %v3810_v32 = vpack.c.bf16 %v3808_v48, %v3806_v39 }
 0x8c8   : > { %4046 = vmatprep.mubr.bf16.mxu1 %v3810_v32 }
 0x8c9   : > { %4047 = vmatmul.mubr.bf16.vlgmr.msra.gmra.mxu1 %v3809_v58 }
 0x989   : > { %v4048_v51 = vpop.f32.mrf.mxu1 }
 0x98a   : > { %v6897_v2 = vadd.f32 %v4048_v51, %v3847_v5 }
 0x98b   : > { %v4050_v26 = vpop.f32.mrf.mxu1 }
 0x98c   : > { %v6900_v44 = vmul.f32 0.70710677, %v6897_v2  ;;  %v6902_v24 = vadd.f32 %v4050_v26, %v3851_v42 }
 0x98d   : > { %v4052_v37 = vpop.f32.mrf.mxu1 }
 0x98e   : > { %v4073_v54 = vand.u32 2147483647, %v6900_v44  ;;  %v6906_v34 = vmul.f32 0.70710677, %v6902_v24  ;;  %v6908_v36 = vadd.f32 %v4052_v37, %v3847_v5  ;;  %vm4065_vm3 = vcmp.lt.f32.partialorder %v6900_v44, 0.0 }
 0x98f   : > { %v4054_v62 = vpop.f32.mrf.mxu1 }
 0x990   : > { %v4077_v45 = vmul.f32 0.3275911, %v4073_v54  ;;  %v4074_v61 = vand.u32 2147483647, %v6906_v34  ;;  %v6912_v46 = vmul.f32 0.70710677, %v6908_v36  ;;  %v6914_v22 = vadd.f32 %v4054_v62, %v3851_v42 }
 0x991   : > { %v4129_v28 = vsub.f32 0.0, %v4073_v54  ;;  %vm4066_vm4 = vcmp.lt.f32.partialorder %v6906_v34, 0.0 }
 0x992   : > { %v4081_v35 = vadd.f32 1.0, %v4077_v45  ;;  %v4078_v30 = vmul.f32 0.3275911, %v4074_v61  ;;  %v4075_v59 = vand.u32 2147483647, %v6912_v46  ;;  %v4130_v11 = vsub.f32 0.0, %v4074_v61 }
 0x993   : > { %v6918_v4 = vmul.f32 0.70710677, %v6914_v22  ;;  %v4133_v16 = vmul.f32 %v4129_v28, %v4073_v54  ;;  %vm4067_vm5 = vcmp.lt.f32.partialorder %v6912_v46, 0.0 }
 0x994   : > { %5176 = vrcp.f32 %v4081_v35  ;;  %v4082_v41 = vadd.f32 1.0, %v4078_v30  ;;  %v4079_v1 = vmul.f32 0.3275911, %v4075_v59  ;;  %v4131_v0 = vsub.f32 0.0, %v4075_v59 }
 0x995   : > { %v4076_v17 = vand.u32 2147483647, %v6918_v4  ;;  %v4134_v9 = vmul.f32 %v4130_v11, %v4074_v61  ;;  %v4137_v43 = vmul.f32 1.442695, %v4133_v16  ;;  %vm4068_vm6 = vcmp.lt.f32.partialorder %v6918_v4, 0.0 }
 0x996   : > { %5178 = vrcp.f32 %v4082_v41  ;;  %v4083_v8 = vadd.f32 1.0, %v4079_v1  ;;  %v4135_v56 = vmul.f32 %v4131_v0, %v4075_v59  ;;  %v4072_v46 = vsel %vm4068_vm6, -1.0, %v5207_v57 }
 0x997   : > { %v4080_v21 = vmul.f32 0.3275911, %v4076_v17  ;;  %v4132_v12 = vsub.f32 0.0, %v4076_v17  ;;  %v4139_v6 = vmul.f32 1.442695, %v4134_v9 }
 0x998   : > { %5180 = vrcp.f32 %v4083_v8  ;;  %v4141_v23 = vmul.f32 1.442695, %v4135_v56 }
 0x999   : > { %v4084_v52 = vadd.f32 1.0, %v4080_v21  ;;  %v4136_v50 = vmul.f32 %v4132_v12, %v4076_v17  ;;  %v4069_v12 = vsel %vm4065_vm3, -1.0, %v5207_v57 }
 0x99b   : > { %5182 = vrcp.f32 %v4084_v52  ;;  %v4143_v49 = vmul.f32 1.442695, %v4136_v50 }
 0x99c   : > { %5184 = vpow2.f32 %v4137_v43  ;;  %v4070_v43 = vsel %vm4066_vm4, -1.0, %v5207_v57 }
 0x99d   : > { %5186 = vpow2.f32 %v4139_v6 }
 0x99e   : > { %5188 = vpow2.f32 %v4141_v23  ;;  %v4058_v23 = vmul.f32 0.5, %v6902_v24 }
 0x99f   : > { %5190 = vpow2.f32 %v4143_v49 }
 0x9a1   : > { %v5177_v33 = vpop.eup %5176 }
 0x9a2   : > { %v4093_v3 = vmul.f32 1.0614054, %v5177_v33 }
 0x9a3   : > { %v5179_v31 = vpop.eup %5178 }
 0x9a4   : > { %v4097_v10 = vadd.f32 -1.4531521, %v4093_v3  ;;  %v4094_v29 = vmul.f32 1.0614054, %v5179_v31 }
 0x9a5   : > { %v5181_v15 = vpop.eup %5180 }
 0x9a6   : > { %v4101_v38 = vmul.f32 %v5177_v33, %v4097_v10  ;;  %v4098_v40 = vadd.f32 -1.4531521, %v4094_v29  ;;  %v4095_v55 = vmul.f32 1.0614054, %v5181_v15  ;;  %v4071_v10 = vsel %vm4067_vm5, -1.0, %v5207_v57  ;;  %v4172_v57 = vpop.permute.xlu0 %4171 }
 0x9a8   : > { %v4105_v63 = vadd.f32 1.4214138, %v4101_v38  ;;  %v5183_v47 = vpop.eup %5182  ;;  %v4102_v53 = vmul.f32 %v5179_v31, %v4098_v40  ;;  %v4099_v27 = vadd.f32 -1.4531521, %v4095_v55  ;;  %v4059_v55 = vmul.f32 0.5, %v6908_v36 }
 0x9a9   : > { %v4096_v20 = vmul.f32 1.0614054, %v5183_v47  ;;  %v5185_v35 = vpop.eup %5184 }
 0x9aa   : > { %v4109_v25 = vmul.f32 %v5177_v33, %v4105_v63  ;;  %v4106_v39 = vadd.f32 1.4214138, %v4102_v53  ;;  %v4103_v48 = vmul.f32 %v5181_v15, %v4099_v27  ;;  %v5187_v17 = vpop.eup %5186  ;;  %v4060_v63 = vmul.f32 0.5, %v6914_v22 }
 0x9ab   : > { %v4100_v32 = vadd.f32 -1.4531521, %v4096_v20  ;;  %v5189_v28 = vpop.eup %5188  ;;  %v4057_v53 = vmul.f32 0.5, %v6897_v2 }
 0x9ac   : > { %v4113_v60 = vadd.f32 -0.28449672, %v4109_v25  ;;  %v4110_v58 = vmul.f32 %v5179_v31, %v4106_v39  ;;  %v4107_v13 = vadd.f32 1.4214138, %v4103_v48  ;;  %v5191_v3 = vpop.eup %5190 }
 0x9ad   : > { %v4104_v19 = vmul.f32 %v5183_v47, %v4100_v32 }
 0x9ae   : > { %v4117_v18 = vmul.f32 %v5177_v33, %v4113_v60  ;;  %v4114_v7 = vadd.f32 -0.28449672, %v4110_v58  ;;  %v4111_v5 = vmul.f32 %v5181_v15, %v4107_v13 }
 0x9af   : > { %v4108_v51 = vadd.f32 1.4214138, %v4104_v19 }
 0x9b0   : > { %v4121_v42 = vadd.f32 0.2548296, %v4117_v18  ;;  %v4118_v26 = vmul.f32 %v5179_v31, %v4114_v7  ;;  %v4115_v37 = vadd.f32 -0.28449672, %v4111_v5 }
 0x9b1   : > { %v4112_v62 = vmul.f32 %v5183_v47, %v4108_v51 }
 0x9b2   : > { %v4125_v54 = vmul.f32 %v5177_v33, %v4121_v42  ;;  %v4122_v45 = vadd.f32 0.2548296, %v4118_v26  ;;  %v4119_v61 = vmul.f32 %v5181_v15, %v4115_v37 }
 0x9b3   : > { %v4116_v30 = vadd.f32 -0.28449672, %v4112_v62 }
 0x9b4   : > { %v4145_v59 = vmul.f32 %v5185_v35, %v4125_v54  ;;  %v4126_v41 = vmul.f32 %v5179_v31, %v4122_v45  ;;  %v4123_v1 = vadd.f32 0.2548296, %v4119_v61 }
 0x9b5   : > { %v4120_v8 = vmul.f32 %v5183_v47, %v4116_v30 }
 0x9b6   : > { %v4146_v21 = vmul.f32 %v5187_v17, %v4126_v41  ;;  %v4127_v52 = vmul.f32 %v5181_v15, %v4123_v1  ;;  %v4149_v16 = vsub.f32 1.0, %v4145_v59 }
 0x9b7   : > { %v4124_v11 = vadd.f32 0.2548296, %v4120_v8 }
 0x9b8   : > { %v4150_v0 = vsub.f32 1.0, %v4146_v21  ;;  %v4147_v33 = vmul.f32 %v5189_v28, %v4127_v52  ;;  %v4153_v34 = vmul.f32 %v4149_v16, %v4069_v12 }
 0x9b9   : > { %v4128_v9 = vmul.f32 %v5183_v47, %v4124_v11 }
 0x9ba   : > { %v4151_v56 = vsub.f32 1.0, %v4147_v33  ;;  %v4154_v31 = vmul.f32 %v4150_v0, %v4070_v43  ;;  %v4157_v40 = vadd.f32 1.0, %v4153_v34 }
 0x9bb   : > { %v4148_v44 = vmul.f32 %v5191_v3, %v4128_v9 }
 0x9bc   : > { %v4155_v29 = vmul.f32 %v4151_v56, %v4071_v10  ;;  %v4158_v38 = vadd.f32 1.0, %v4154_v31  ;;  %v4161_v20 = vmul.f32 %v4157_v40, %v4057_v53 }
 0x9bd   : > { %v4152_v6 = vsub.f32 1.0, %v4148_v44 }
 0x9be   : > { %v4159_v15 = vadd.f32 1.0, %v4155_v29  ;;  %v4162_v27 = vmul.f32 %v4158_v38, %v4058_v23 }
 0x9bf   : > { %v4156_v50 = vmul.f32 %v4152_v6, %v4072_v46 }
 0x9c0   : > { %v4163_v4 = vmul.f32 %v4159_v15, %v4059_v55 }
 0x9c1   : > { %v4160_v47 = vadd.f32 1.0, %v4156_v50 }
 0x9c2   : > { %v4166_v39 = vpack.c.bf16 %v4163_v4, %v4161_v20 }
 0x9c3   : > { %v4164_v25 = vmul.f32 %v4160_v47, %v4060_v63 }
 0x9c5   : > { %v4167_v49 = vpack.c.bf16 %v4164_v25, %v4162_v27 }
 0x9c7   : > { %4199 = vmatprep.subr.bf16.mxu0 %v4167_v49 }
 0x9c8   : > { %4200 = vmatpush1.bf16.xpose.msra.mxu0 %v4166_v39 }
 0x9cf   : > { %4218 = vmatmul.mubr.bf16.vlgmr.msra.gmra.mxu0 %v6885_v14 }
 0xa8f   : > { %v4219_v36 = vpop.f32.mrf.mxu0 }
 0xa90   : > { %v4220_v48 = vadd.f32 %v4219_v36, %v4172_v57 }
 0xa91   : > { %v4221_v24 = vpop.f32.mrf.mxu0 }
 0xa92   : > { %v4225_v60 = vsub.f32 0.0, %v4220_v48 }
 0xa93   : > { %v4222_v22 = vpop.f32.mrf.mxu0 }
 0xa94   : > { %v4226_v32 = vmul.f32 1.442695, %v4225_v60 }
 0xa95   : > { %v4223_v58 = vpop.f32.mrf.mxu0 }
 0xa96   : > { %5192 = vpow2.f32 %v4226_v32 }
 0xaa3   : > { %v5193_v2 = vpop.eup %5192 }
 0xaa4   : > { %v4228_v13 = vadd.f32 1.0, %v5193_v2 }
 0xaa6   : > { %5194 = vrcp.f32 %v4228_v13 }
 0xab3   : > { %v5195_v18 = vpop.eup %5194 }
 0xab4   : > { %4232 = vst.msk [vmem:[%s384_s23] sm:$0x7] %vm4231_vm7, %v5195_v18 }
 0xab5 PF: > { %s21_s17 = sadd.s32 1, %s5202_s17  }
 0xab6   : > { %p18_p4 = scmp.ge.s32.totalorder %s21_s17, 4  }
 0xab8   :  { %20 = sbr.rel (!%p18_p4) target bundleno = 1 (0x1), region = 100 }

</bundles_post_ra>
